<compile_context>
chip_gen: v7x
topology: tpu7x:2x2x1
jax: 0.10.0
libtpu: 0.0.40
codegen_flags: <defaults>
</compile_context>

<pallas_src>
import functools
import math

import numpy as np
import jax
import jax.numpy as jnp
from jax.experimental import pallas as pl
from jax.experimental.pallas import tpu as pltpu

# ---- small, self-consistent hyper-parameters (module structure preserved) ----
EMBED = 128
HEADS = 4
HEAD_DIM = EMBED // HEADS
VOCAB = 512
LAYERS = 2
MAX_SEQ = 64
LN_EPS = 1e-5                     # nn.LayerNorm default eps
MATMUL_DTYPE = jnp.bfloat16       # weight storage / MXU operand dtype (f32 acc)


def _ln(x, g, b):
    mu = jnp.mean(x, axis=-1, keepdims=True)
    var = jnp.mean(jnp.square(x - mu), axis=-1, keepdims=True)
    return (x - mu) * jax.lax.rsqrt(var + LN_EPS) * g + b


def _gelu(x):
    # tanh-approximation GELU: one EUP tanh + a few VALU ops.
    # TODO(synk): swap in an erf polynomial if bit-level parity with PyTorch's
    # exact-erf nn.GELU is required (deviation is <1e-3 absolute).
    c = 0.7978845608028654  # sqrt(2/pi)
    return 0.5 * x * (1.0 + jnp.tanh(c * (x + 0.044715 * x * x * x)))


# ------------------------ single fused whole-model kernel ------------------------

def _gpt_kernel(*args, n_layers, heads, head_dim):
    n_in = 4 + 12 * n_layers + 4
    in_refs = args[:n_in]
    o_ref = args[n_in]

    x_ref, hmask_ref, bias_ref, gsum_ref = in_refs[:4]
    layer_refs = in_refs[4:4 + 12 * n_layers]
    lnf_g_ref, lnf_b_ref, head_w_ref, head_b_ref = in_refs[4 + 12 * n_layers:]

    e = heads * head_dim
    hmask = hmask_ref[...]      # (H*T*B, E)    1 iff lane belongs to head h
    bias = bias_ref[...]        # (T*B, H*T*B)  0 if same position t else -1e30
    gsum = gsum_ref[...]        # (H*T*B, H*T*B) block-diag ones per head group

    x = x_ref[...].astype(jnp.float32)                     # (T*B, E)

    for li in range(n_layers):
        (ln1_g, ln1_b, wqkv, bqkv, wo, bo, ln2_g, ln2_b,
         w1, b1, w2, b2) = [r[...] for r in layer_refs[12 * li:12 * (li + 1)]]

        # --- attention branch: LN1 -> in_proj -> per-(t, head) softmax attn ---
        h1 = _ln(x, ln1_g, ln1_b)
        qkv = jnp.dot(h1.astype(wqkv.dtype), wqkv,
                      preferred_element_type=jnp.float32) + bqkv    # (rows, 3E)
        q = qkv[:, :e] * (1.0 / math.sqrt(head_dim))
        k = qkv[:, e:2 * e]
        v = qkv[:, 2 * e:]

        # Head-expanded K / V: row (h, t', j) carries k/v[(t', j)] restricted to
        # head-h lanes.  (H*T*B, E) == (128, 128) at the demo shape.
        kexp = jnp.tile(k, (heads, 1)) * hmask
        vexp = jnp.tile(v, (heads, 1)) * hmask

        # One lane-dense NT matmul: s[(t,i), (h,t',j)] = q_h[t,i] . k_h[t',j].
        s = jax.lax.dot_general(q, kexp, (((1,), (1,)), ((), ())),
                                preferred_element_type=jnp.float32) + bias
        s = s - jnp.max(s, axis=-1, keepdims=True)       # softmax-invariant shift
        p = jnp.exp(s)                                   # masked entries -> 0
        denom = jnp.dot(p, gsum, preferred_element_type=jnp.float32)
        p = p / denom                                    # exact per-head softmax

        o = jnp.dot(p, vexp, preferred_element_type=jnp.float32)    # (rows, E)
        attn = jnp.dot(o.astype(wo.dtype), wo,
                       preferred_element_type=jnp.float32) + bo
        x = x + attn                                                # residual

        # --- MLP branch: LN2 -> fc1 -> GELU -> fc2 -> residual ---
        h2 = _ln(x, ln2_g, ln2_b)
        h2 = jnp.dot(h2.astype(w1.dtype), w1,
                     preferred_element_type=jnp.float32) + b1
        h2 = _gelu(h2)
        h2 = jnp.dot(h2.astype(w2.dtype), w2,
                     preferred_element_type=jnp.float32) + b2
        x = x + h2                                                  # residual

    # --- final LayerNorm + vocab head ---
    hf = _ln(x, lnf_g_ref[...], lnf_b_ref[...])
    logits = jnp.dot(hf.astype(head_w_ref.dtype), head_w_ref[...],
                     preferred_element_type=jnp.float32) + head_b_ref[...]
    o_ref[...] = logits.astype(o_ref.dtype)


def _attn_constants(t_len, b_len, heads, head_dim):
    """Precomputed attention masks (passed as kernel operands)."""
    e = heads * head_dim
    tb = t_len * b_len
    cols = heads * tb
    h_row = np.arange(cols) // tb                      # head id of expanded row
    hmask = (h_row[:, None] ==
             (np.arange(e) // head_dim)[None, :]).astype(np.float32)
    t_row = np.arange(tb) // b_len                     # position of query row
    t_col = (np.arange(cols) % tb) // b_len            # position of key column
    bias = np.where(t_row[:, None] == t_col[None, :],
                    0.0, -1e30).astype(np.float32)
    gsum = (h_row[:, None] == h_row[None, :]).astype(np.float32)
    return jnp.asarray(hmask), jnp.asarray(bias), jnp.asarray(gsum)


def gpt_pallas(params, x_tb, *, t_len, b_len):
    rows, e = x_tb.shape
    assert rows == t_len * b_len and e == EMBED
    hmask, bias, gsum = _attn_constants(t_len, b_len, HEADS, HEAD_DIM)

    layer_w = []
    for lp in params["layers"]:
        layer_w += [lp["ln1_g"], lp["ln1_b"], lp["in_proj_w"], lp["in_proj_b"],
                    lp["out_proj_w"], lp["out_proj_b"], lp["ln2_g"], lp["ln2_b"],
                    lp["fc1_w"], lp["fc1_b"], lp["fc2_w"], lp["fc2_b"]]
    final_w = [params["ln_f_g"], params["ln_f_b"],
               params["head_w"], params["head_b"]]
    inputs = [x_tb, hmask, bias, gsum] + layer_w + final_w

    def _full(arr):
        zeros = (0,) * arr.ndim
        return pl.BlockSpec(arr.shape, lambda i, z=zeros: z)

    kernel = functools.partial(_gpt_kernel, n_layers=LAYERS, heads=HEADS,
                               head_dim=HEAD_DIM)
    return pl.pallas_call(
        kernel,
        grid=(1,),                      # single step: no core split at 32 rows
        in_specs=[_full(a) for a in inputs],
        out_specs=pl.BlockSpec((rows, VOCAB), lambda i: (0, 0)),
        out_shape=jax.ShapeDtypeStruct((rows, VOCAB), jnp.float32),
        compiler_params=pltpu.CompilerParams(
            dimension_semantics=("arbitrary",)),
    )(*inputs)


# ------------------------------- model glue -------------------------------

def gpt_forward(params, idx):
    b, t = idx.shape
    assert t <= MAX_SEQ
    # Embedding lookup kept as tiny XLA glue (data-dependent gather).
    # TODO(synk): could become a scalar-prefetch DMA gather inside the kernel
    # if B*T grows.
    tok = jnp.take(params["tok_emb"], idx, axis=0)              # (B, T, E)
    pos = params["pos_emb"][:t]                                 # (T, E)
    x = tok + pos[None, :, :]
    # (T*B, E) row order: each contiguous group of B rows shares one position t
    # (PyTorch seq-first MHA mixes over the batch axis per position).
    x_tb = jnp.transpose(x, (1, 0, 2)).reshape(t * b, EMBED)
    logits_tb = gpt_pallas(params, x_tb, t_len=t, b_len=b)      # (T*B, V)
    return jnp.transpose(logits_tb.reshape(t, b, VOCAB), (1, 0, 2))


def init_params(key):
    keys = jax.random.split(key, 3 + LAYERS)

    def dense(k, shape, dtype=MATMUL_DTYPE, scale=0.02):
        return (scale * jax.random.normal(k, shape, jnp.float32)).astype(dtype)

    params = {
        "tok_emb": dense(keys[0], (VOCAB, EMBED), jnp.float32),
        "pos_emb": dense(keys[1], (MAX_SEQ, EMBED), jnp.float32),
        "ln_f_g": jnp.ones((1, EMBED), jnp.float32),
        "ln_f_b": jnp.zeros((1, EMBED), jnp.float32),
        "head_w": dense(keys[2], (EMBED, VOCAB)),
        "head_b": jnp.zeros((1, VOCAB), jnp.float32),
        "layers": [],
    }
    for li in range(LAYERS):
        lk = jax.random.split(keys[3 + li], 4)
        params["layers"].append({
            "ln1_g": jnp.ones((1, EMBED), jnp.float32),
            "ln1_b": jnp.zeros((1, EMBED), jnp.float32),
            "ln2_g": jnp.ones((1, EMBED), jnp.float32),
            "ln2_b": jnp.zeros((1, EMBED), jnp.float32),
            "in_proj_w": dense(lk[0], (EMBED, 3 * EMBED)),   # stored (in, out)
            "in_proj_b": jnp.zeros((1, 3 * EMBED), jnp.float32),
            "out_proj_w": dense(lk[1], (EMBED, EMBED)),
            "out_proj_b": jnp.zeros((1, EMBED), jnp.float32),
            "fc1_w": dense(lk[2], (EMBED, 4 * EMBED)),
            "fc1_b": jnp.zeros((1, 4 * EMBED), jnp.float32),
            "fc2_w": dense(lk[3], (4 * EMBED, EMBED)),
            "fc2_b": jnp.zeros((1, EMBED), jnp.float32),
        })
    return params


if __name__ == "__main__":
    key = jax.random.PRNGKey(0)
    pkey, ikey = jax.random.split(key)
    params = init_params(pkey)

    B, T = 4, 8
    idx = jax.random.randint(ikey, (B, T), 0, VOCAB, dtype=jnp.int32)

    logits = jax.jit(gpt_forward)(params, idx)
    jax.block_until_ready(logits)
    assert logits.shape == (B, T, VOCAB)
    assert logits.dtype == jnp.float32
    assert bool(jnp.all(jnp.isfinite(logits)))
    print("KERNEL_OK")
</pallas_src>

<mosaic_0001>
module attributes {stable_mosaic.version = 11 : i64} {
  func.func @_gpt_kernel(%arg0: i32, %arg1: memref<32x128xf32, #tpu.memory_space<vmem>>, %arg2: memref<128x128xf32, #tpu.memory_space<vmem>>, %arg3: memref<32x128xf32, #tpu.memory_space<vmem>>, %arg4: memref<128x128xf32, #tpu.memory_space<vmem>>, %arg5: memref<1x128xf32, #tpu.memory_space<vmem>>, %arg6: memref<1x128xf32, #tpu.memory_space<vmem>>, %arg7: memref<128x384xbf16, #tpu.memory_space<vmem>>, %arg8: memref<1x384xf32, #tpu.memory_space<vmem>>, %arg9: memref<128x128xbf16, #tpu.memory_space<vmem>>, %arg10: memref<1x128xf32, #tpu.memory_space<vmem>>, %arg11: memref<1x128xf32, #tpu.memory_space<vmem>>, %arg12: memref<1x128xf32, #tpu.memory_space<vmem>>, %arg13: memref<128x512xbf16, #tpu.memory_space<vmem>>, %arg14: memref<1x512xf32, #tpu.memory_space<vmem>>, %arg15: memref<512x128xbf16, #tpu.memory_space<vmem>>, %arg16: memref<1x128xf32, #tpu.memory_space<vmem>>, %arg17: memref<1x128xf32, #tpu.memory_space<vmem>>, %arg18: memref<1x128xf32, #tpu.memory_space<vmem>>, %arg19: memref<128x384xbf16, #tpu.memory_space<vmem>>, %arg20: memref<1x384xf32, #tpu.memory_space<vmem>>, %arg21: memref<128x128xbf16, #tpu.memory_space<vmem>>, %arg22: memref<1x128xf32, #tpu.memory_space<vmem>>, %arg23: memref<1x128xf32, #tpu.memory_space<vmem>>, %arg24: memref<1x128xf32, #tpu.memory_space<vmem>>, %arg25: memref<128x512xbf16, #tpu.memory_space<vmem>>, %arg26: memref<1x512xf32, #tpu.memory_space<vmem>>, %arg27: memref<512x128xbf16, #tpu.memory_space<vmem>>, %arg28: memref<1x128xf32, #tpu.memory_space<vmem>>, %arg29: memref<1x128xf32, #tpu.memory_space<vmem>>, %arg30: memref<1x128xf32, #tpu.memory_space<vmem>>, %arg31: memref<128x512xbf16, #tpu.memory_space<vmem>>, %arg32: memref<1x512xf32, #tpu.memory_space<vmem>>, %arg33: memref<32x512xf32, #tpu.memory_space<vmem>>) attributes {dimension_semantics = [#tpu.dimension_semantics<arbitrary>], iteration_bounds = array<i64: 1>, scalar_prefetch = 0 : i64, scratch_operands = 0 : i64, tpu.core_type = #tpu.core_type<tc>, window_params = [{pipeline_mode = #tpu.pipeline_mode<synchronous>, transform_indices = @transform_0, window_bounds = array<i64: 32, 128>}, {pipeline_mode = #tpu.pipeline_mode<synchronous>, transform_indices = @transform_1, window_bounds = array<i64: 128, 128>}, {pipeline_mode = #tpu.pipeline_mode<synchronous>, transform_indices = @transform_2, window_bounds = array<i64: 32, 128>}, {pipeline_mode = #tpu.pipeline_mode<synchronous>, transform_indices = @transform_3, window_bounds = array<i64: 128, 128>}, {pipeline_mode = #tpu.pipeline_mode<synchronous>, transform_indices = @transform_4, window_bounds = array<i64: 1, 128>}, {pipeline_mode = #tpu.pipeline_mode<synchronous>, transform_indices = @transform_5, window_bounds = array<i64: 1, 128>}, {pipeline_mode = #tpu.pipeline_mode<synchronous>, transform_indices = @transform_6, window_bounds = array<i64: 128, 384>}, {pipeline_mode = #tpu.pipeline_mode<synchronous>, transform_indices = @transform_7, window_bounds = array<i64: 1, 384>}, {pipeline_mode = #tpu.pipeline_mode<synchronous>, transform_indices = @transform_8, window_bounds = array<i64: 128, 128>}, {pipeline_mode = #tpu.pipeline_mode<synchronous>, transform_indices = @transform_9, window_bounds = array<i64: 1, 128>}, {pipeline_mode = #tpu.pipeline_mode<synchronous>, transform_indices = @transform_10, window_bounds = array<i64: 1, 128>}, {pipeline_mode = #tpu.pipeline_mode<synchronous>, transform_indices = @transform_11, window_bounds = array<i64: 1, 128>}, {pipeline_mode = #tpu.pipeline_mode<synchronous>, transform_indices = @transform_12, window_bounds = array<i64: 128, 512>}, {pipeline_mode = #tpu.pipeline_mode<synchronous>, transform_indices = @transform_13, window_bounds = array<i64: 1, 512>}, {pipeline_mode = #tpu.pipeline_mode<synchronous>, transform_indices = @transform_14, window_bounds = array<i64: 512, 128>}, {pipeline_mode = #tpu.pipeline_mode<synchronous>, transform_indices = @transform_15, window_bounds = array<i64: 1, 128>}, {pipeline_mode = #tpu.pipeline_mode<synchronous>, transform_indices = @transform_16, window_bounds = array<i64: 1, 128>}, {pipeline_mode = #tpu.pipeline_mode<synchronous>, transform_indices = @transform_17, window_bounds = array<i64: 1, 128>}, {pipeline_mode = #tpu.pipeline_mode<synchronous>, transform_indices = @transform_18, window_bounds = array<i64: 128, 384>}, {pipeline_mode = #tpu.pipeline_mode<synchronous>, transform_indices = @transform_19, window_bounds = array<i64: 1, 384>}, {pipeline_mode = #tpu.pipeline_mode<synchronous>, transform_indices = @transform_20, window_bounds = array<i64: 128, 128>}, {pipeline_mode = #tpu.pipeline_mode<synchronous>, transform_indices = @transform_21, window_bounds = array<i64: 1, 128>}, {pipeline_mode = #tpu.pipeline_mode<synchronous>, transform_indices = @transform_22, window_bounds = array<i64: 1, 128>}, {pipeline_mode = #tpu.pipeline_mode<synchronous>, transform_indices = @transform_23, window_bounds = array<i64: 1, 128>}, {pipeline_mode = #tpu.pipeline_mode<synchronous>, transform_indices = @transform_24, window_bounds = array<i64: 128, 512>}, {pipeline_mode = #tpu.pipeline_mode<synchronous>, transform_indices = @transform_25, window_bounds = array<i64: 1, 512>}, {pipeline_mode = #tpu.pipeline_mode<synchronous>, transform_indices = @transform_26, window_bounds = array<i64: 512, 128>}, {pipeline_mode = #tpu.pipeline_mode<synchronous>, transform_indices = @transform_27, window_bounds = array<i64: 1, 128>}, {pipeline_mode = #tpu.pipeline_mode<synchronous>, transform_indices = @transform_28, window_bounds = array<i64: 1, 128>}, {pipeline_mode = #tpu.pipeline_mode<synchronous>, transform_indices = @transform_29, window_bounds = array<i64: 1, 128>}, {pipeline_mode = #tpu.pipeline_mode<synchronous>, transform_indices = @transform_30, window_bounds = array<i64: 128, 512>}, {pipeline_mode = #tpu.pipeline_mode<synchronous>, transform_indices = @transform_31, window_bounds = array<i64: 1, 512>}, {pipeline_mode = #tpu.pipeline_mode<synchronous>, transform_indices = @transform_32, window_bounds = array<i64: 32, 512>}]} {
    %c0 = arith.constant 0 : index
    %c0_0 = arith.constant 0 : index
    %0 = vector.load %arg2[%c0, %c0_0] : memref<128x128xf32, #tpu.memory_space<vmem>>, vector<128x128xf32>
    %c0_1 = arith.constant 0 : index
    %c0_2 = arith.constant 0 : index
    %1 = vector.load %arg3[%c0_1, %c0_2] : memref<32x128xf32, #tpu.memory_space<vmem>>, vector<32x128xf32>
    %c0_3 = arith.constant 0 : index
    %c0_4 = arith.constant 0 : index
    %2 = vector.load %arg4[%c0_3, %c0_4] : memref<128x128xf32, #tpu.memory_space<vmem>>, vector<128x128xf32>
    %c0_5 = arith.constant 0 : index
    %c0_6 = arith.constant 0 : index
    %3 = vector.load %arg1[%c0_5, %c0_6] : memref<32x128xf32, #tpu.memory_space<vmem>>, vector<32x128xf32>
    %c0_7 = arith.constant 0 : index
    %c0_8 = arith.constant 0 : index
    %4 = vector.load %arg5[%c0_7, %c0_8] : memref<1x128xf32, #tpu.memory_space<vmem>>, vector<1x128xf32>
    %c0_9 = arith.constant 0 : index
    %c0_10 = arith.constant 0 : index
    %5 = vector.load %arg6[%c0_9, %c0_10] : memref<1x128xf32, #tpu.memory_space<vmem>>, vector<1x128xf32>
    %c0_11 = arith.constant 0 : index
    %c0_12 = arith.constant 0 : index
    %6 = vector.load %arg7[%c0_11, %c0_12] : memref<128x384xbf16, #tpu.memory_space<vmem>>, vector<128x384xbf16>
    %c0_13 = arith.constant 0 : index
    %c0_14 = arith.constant 0 : index
    %7 = vector.load %arg8[%c0_13, %c0_14] : memref<1x384xf32, #tpu.memory_space<vmem>>, vector<1x384xf32>
    %c0_15 = arith.constant 0 : index
    %c0_16 = arith.constant 0 : index
    %8 = vector.load %arg9[%c0_15, %c0_16] : memref<128x128xbf16, #tpu.memory_space<vmem>>, vector<128x128xbf16>
    %c0_17 = arith.constant 0 : index
    %c0_18 = arith.constant 0 : index
    %9 = vector.load %arg10[%c0_17, %c0_18] : memref<1x128xf32, #tpu.memory_space<vmem>>, vector<1x128xf32>
    %c0_19 = arith.constant 0 : index
    %c0_20 = arith.constant 0 : index
    %10 = vector.load %arg11[%c0_19, %c0_20] : memref<1x128xf32, #tpu.memory_space<vmem>>, vector<1x128xf32>
    %c0_21 = arith.constant 0 : index
    %c0_22 = arith.constant 0 : index
    %11 = vector.load %arg12[%c0_21, %c0_22] : memref<1x128xf32, #tpu.memory_space<vmem>>, vector<1x128xf32>
    %c0_23 = arith.constant 0 : index
    %c0_24 = arith.constant 0 : index
    %12 = vector.load %arg13[%c0_23, %c0_24] : memref<128x512xbf16, #tpu.memory_space<vmem>>, vector<128x512xbf16>
    %c0_25 = arith.constant 0 : index
    %c0_26 = arith.constant 0 : index
    %13 = vector.load %arg14[%c0_25, %c0_26] : memref<1x512xf32, #tpu.memory_space<vmem>>, vector<1x512xf32>
    %c0_27 = arith.constant 0 : index
    %c0_28 = arith.constant 0 : index
    %14 = vector.load %arg15[%c0_27, %c0_28] : memref<512x128xbf16, #tpu.memory_space<vmem>>, vector<512x128xbf16>
    %c0_29 = arith.constant 0 : index
    %c0_30 = arith.constant 0 : index
    %15 = vector.load %arg16[%c0_29, %c0_30] : memref<1x128xf32, #tpu.memory_space<vmem>>, vector<1x128xf32>
    %cst = arith.constant dense<0.000000e+00> : vector<32xf32>
    %16 = vector.multi_reduction <add>, %3, %cst [1] : vector<32x128xf32> to vector<32xf32>
    %17 = vector.shape_cast %16 : vector<32xf32> to vector<32x1xf32>
    %cst_31 = arith.constant 1.280000e+02 : f32
    %18 = vector.broadcast %cst_31 : f32 to vector<32x1xf32>
    %19 = arith.divf %17, %18 : vector<32x1xf32>
    %20 = vector.broadcast %19 : vector<32x1xf32> to vector<32x128xf32>
    %21 = arith.subf %3, %20 : vector<32x128xf32>
    %22 = arith.mulf %21, %21 : vector<32x128xf32>
    %cst_32 = arith.constant dense<0.000000e+00> : vector<32xf32>
    %23 = vector.multi_reduction <add>, %22, %cst_32 [1] : vector<32x128xf32> to vector<32xf32>
    %24 = vector.shape_cast %23 : vector<32xf32> to vector<32x1xf32>
    %cst_33 = arith.constant 1.280000e+02 : f32
    %25 = vector.broadcast %cst_33 : f32 to vector<32x1xf32>
    %26 = arith.divf %24, %25 : vector<32x1xf32>
    %27 = vector.broadcast %19 : vector<32x1xf32> to vector<32x128xf32>
    %28 = arith.subf %3, %27 : vector<32x128xf32>
    %cst_34 = arith.constant 9.99999974E-6 : f32
    %29 = vector.broadcast %cst_34 : f32 to vector<32x1xf32>
    %30 = arith.addf %26, %29 : vector<32x1xf32>
    %31 = math.rsqrt %30 : vector<32x1xf32>
    %32 = vector.broadcast %31 : vector<32x1xf32> to vector<32x128xf32>
    %33 = arith.mulf %28, %32 : vector<32x128xf32>
    %34 = vector.broadcast %4 : vector<1x128xf32> to vector<32x128xf32>
    %35 = arith.mulf %33, %34 : vector<32x128xf32>
    %36 = vector.broadcast %5 : vector<1x128xf32> to vector<32x128xf32>
    %37 = arith.addf %35, %36 : vector<32x128xf32>
    %38 = arith.truncf %37 : vector<32x128xf32> to vector<32x128xbf16>
    %cst_35 = arith.constant dense<0.000000e+00> : vector<32x384xf32>
    %39 = tpu.matmul %38, %6, %cst_35 {dimension_numbers = #tpu.dot_dimension_numbers<[1], [0], [0], [1], [0, 0, 1, 1], [], []>} : vector<32x128xbf16>, vector<128x384xbf16>, vector<32x384xf32> -> vector<32x384xf32>
    %40 = vector.broadcast %7 : vector<1x384xf32> to vector<32x384xf32>
    %41 = arith.addf %39, %40 : vector<32x384xf32>
    %42 = vector.extract_strided_slice %41 {offsets = [0, 0], sizes = [32, 128], strides = [1, 1]} : vector<32x384xf32> to vector<32x128xf32>
    %cst_36 = arith.constant 0.176776692 : f32
    %43 = vector.broadcast %cst_36 : f32 to vector<32x128xf32>
    %44 = arith.mulf %42, %43 : vector<32x128xf32>
    %45 = vector.extract_strided_slice %41 {offsets = [0, 128], sizes = [32, 128], strides = [1, 1]} : vector<32x384xf32> to vector<32x128xf32>
    %46 = vector.extract_strided_slice %41 {offsets = [0, 256], sizes = [32, 128], strides = [1, 1]} : vector<32x384xf32> to vector<32x128xf32>
    %47 = tpu.concatenate %45, %45, %45, %45 in 0 : vector<32x128xf32>, vector<32x128xf32>, vector<32x128xf32>, vector<32x128xf32> -> vector<128x128xf32>
    %48 = arith.mulf %47, %0 : vector<128x128xf32>
    %49 = tpu.concatenate %46, %46, %46, %46 in 0 : vector<32x128xf32>, vector<32x128xf32>, vector<32x128xf32>, vector<32x128xf32> -> vector<128x128xf32>
    %50 = arith.mulf %49, %0 : vector<128x128xf32>
    %cst_37 = arith.constant dense<0.000000e+00> : vector<32x128xf32>
    %51 = tpu.matmul %44, %48, %cst_37 {dimension_numbers = #tpu.dot_dimension_numbers<[1], [1], [0], [0], [0, 0, 1, 0], [], []>} : vector<32x128xf32>, vector<128x128xf32>, vector<32x128xf32> -> vector<32x128xf32>
    %52 = arith.addf %51, %1 : vector<32x128xf32>
    %cst_38 = arith.constant dense<0xFF800000> : vector<32xf32>
    %53 = vector.multi_reduction <maximumf>, %52, %cst_38 [1] : vector<32x128xf32> to vector<32xf32>
    %54 = vector.shape_cast %53 : vector<32xf32> to vector<32x1xf32>
    %55 = vector.broadcast %54 : vector<32x1xf32> to vector<32x128xf32>
    %56 = arith.subf %52, %55 : vector<32x128xf32>
    %57 = math.exp %56 : vector<32x128xf32>
    %cst_39 = arith.constant dense<0.000000e+00> : vector<32x128xf32>
    %58 = tpu.matmul %57, %2, %cst_39 {dimension_numbers = #tpu.dot_dimension_numbers<[1], [0], [0], [1], [0, 0, 1, 1], [], []>} : vector<32x128xf32>, vector<128x128xf32>, vector<32x128xf32> -> vector<32x128xf32>
    %59 = arith.divf %57, %58 : vector<32x128xf32>
    %cst_40 = arith.constant dense<0.000000e+00> : vector<32x128xf32>
    %60 = tpu.matmul %59, %50, %cst_40 {dimension_numbers = #tpu.dot_dimension_numbers<[1], [0], [0], [1], [0, 0, 1, 1], [], []>} : vector<32x128xf32>, vector<128x128xf32>, vector<32x128xf32> -> vector<32x128xf32>
    %61 = arith.truncf %60 : vector<32x128xf32> to vector<32x128xbf16>
    %cst_41 = arith.constant dense<0.000000e+00> : vector<32x128xf32>
    %62 = tpu.matmul %61, %8, %cst_41 {dimension_numbers = #tpu.dot_dimension_numbers<[1], [0], [0], [1], [0, 0, 1, 1], [], []>} : vector<32x128xbf16>, vector<128x128xbf16>, vector<32x128xf32> -> vector<32x128xf32>
    %63 = vector.broadcast %9 : vector<1x128xf32> to vector<32x128xf32>
    %64 = arith.addf %62, %63 : vector<32x128xf32>
    %65 = arith.addf %3, %64 : vector<32x128xf32>
    %cst_42 = arith.constant dense<0.000000e+00> : vector<32xf32>
    %66 = vector.multi_reduction <add>, %65, %cst_42 [1] : vector<32x128xf32> to vector<32xf32>
    %67 = vector.shape_cast %66 : vector<32xf32> to vector<32x1xf32>
    %cst_43 = arith.constant 1.280000e+02 : f32
    %68 = vector.broadcast %cst_43 : f32 to vector<32x1xf32>
    %69 = arith.divf %67, %68 : vector<32x1xf32>
    %70 = vector.broadcast %69 : vector<32x1xf32> to vector<32x128xf32>
    %71 = arith.subf %65, %70 : vector<32x128xf32>
    %72 = arith.mulf %71, %71 : vector<32x128xf32>
    %cst_44 = arith.constant dense<0.000000e+00> : vector<32xf32>
    %73 = vector.multi_reduction <add>, %72, %cst_44 [1] : vector<32x128xf32> to vector<32xf32>
    %74 = vector.shape_cast %73 : vector<32xf32> to vector<32x1xf32>
    %cst_45 = arith.constant 1.280000e+02 : f32
    %75 = vector.broadcast %cst_45 : f32 to vector<32x1xf32>
    %76 = arith.divf %74, %75 : vector<32x1xf32>
    %77 = vector.broadcast %69 : vector<32x1xf32> to vector<32x128xf32>
    %78 = arith.subf %65, %77 : vector<32x128xf32>
    %cst_46 = arith.constant 9.99999974E-6 : f32
    %79 = vector.broadcast %cst_46 : f32 to vector<32x1xf32>
    %80 = arith.addf %76, %79 : vector<32x1xf32>
    %81 = math.rsqrt %80 : vector<32x1xf32>
    %82 = vector.broadcast %81 : vector<32x1xf32> to vector<32x128xf32>
    %83 = arith.mulf %78, %82 : vector<32x128xf32>
    %84 = vector.broadcast %10 : vector<1x128xf32> to vector<32x128xf32>
    %85 = arith.mulf %83, %84 : vector<32x128xf32>
    %86 = vector.broadcast %11 : vector<1x128xf32> to vector<32x128xf32>
    %87 = arith.addf %85, %86 : vector<32x128xf32>
    %88 = arith.truncf %87 : vector<32x128xf32> to vector<32x128xbf16>
    %cst_47 = arith.constant dense<0.000000e+00> : vector<32x512xf32>
    %89 = tpu.matmul %88, %12, %cst_47 {dimension_numbers = #tpu.dot_dimension_numbers<[1], [0], [0], [1], [0, 0, 1, 1], [], []>} : vector<32x128xbf16>, vector<128x512xbf16>, vector<32x512xf32> -> vector<32x512xf32>
    %90 = vector.broadcast %13 : vector<1x512xf32> to vector<32x512xf32>
    %91 = arith.addf %89, %90 : vector<32x512xf32>
    %cst_48 = arith.constant 5.000000e-01 : f32
    %92 = vector.broadcast %cst_48 : f32 to vector<32x512xf32>
    %93 = arith.mulf %92, %91 : vector<32x512xf32>
    %cst_49 = arith.constant 4.471500e-02 : f32
    %94 = vector.broadcast %cst_49 : f32 to vector<32x512xf32>
    %95 = arith.mulf %94, %91 : vector<32x512xf32>
    %96 = arith.mulf %95, %91 : vector<32x512xf32>
    %97 = arith.mulf %96, %91 : vector<32x512xf32>
    %98 = arith.addf %91, %97 : vector<32x512xf32>
    %cst_50 = arith.constant 0.797884583 : f32
    %99 = vector.broadcast %cst_50 : f32 to vector<32x512xf32>
    %100 = arith.mulf %99, %98 : vector<32x512xf32>
    %101 = math.tanh %100 : vector<32x512xf32>
    %cst_51 = arith.constant 1.000000e+00 : f32
    %102 = vector.broadcast %cst_51 : f32 to vector<32x512xf32>
    %103 = arith.addf %102, %101 : vector<32x512xf32>
    %104 = arith.mulf %93, %103 : vector<32x512xf32>
    %105 = arith.truncf %104 : vector<32x512xf32> to vector<32x512xbf16>
    %cst_52 = arith.constant dense<0.000000e+00> : vector<32x128xf32>
    %106 = tpu.matmul %105, %14, %cst_52 {dimension_numbers = #tpu.dot_dimension_numbers<[1], [0], [0], [1], [0, 0, 1, 1], [], []>} : vector<32x512xbf16>, vector<512x128xbf16>, vector<32x128xf32> -> vector<32x128xf32>
    %107 = vector.broadcast %15 : vector<1x128xf32> to vector<32x128xf32>
    %108 = arith.addf %106, %107 : vector<32x128xf32>
    %109 = arith.addf %65, %108 : vector<32x128xf32>
    %c0_53 = arith.constant 0 : index
    %c0_54 = arith.constant 0 : index
    %110 = vector.load %arg17[%c0_53, %c0_54] : memref<1x128xf32, #tpu.memory_space<vmem>>, vector<1x128xf32>
    %c0_55 = arith.constant 0 : index
    %c0_56 = arith.constant 0 : index
    %111 = vector.load %arg18[%c0_55, %c0_56] : memref<1x128xf32, #tpu.memory_space<vmem>>, vector<1x128xf32>
    %c0_57 = arith.constant 0 : index
    %c0_58 = arith.constant 0 : index
    %112 = vector.load %arg19[%c0_57, %c0_58] : memref<128x384xbf16, #tpu.memory_space<vmem>>, vector<128x384xbf16>
    %c0_59 = arith.constant 0 : index
    %c0_60 = arith.constant 0 : index
    %113 = vector.load %arg20[%c0_59, %c0_60] : memref<1x384xf32, #tpu.memory_space<vmem>>, vector<1x384xf32>
    %c0_61 = arith.constant 0 : index
    %c0_62 = arith.constant 0 : index
    %114 = vector.load %arg21[%c0_61, %c0_62] : memref<128x128xbf16, #tpu.memory_space<vmem>>, vector<128x128xbf16>
    %c0_63 = arith.constant 0 : index
    %c0_64 = arith.constant 0 : index
    %115 = vector.load %arg22[%c0_63, %c0_64] : memref<1x128xf32, #tpu.memory_space<vmem>>, vector<1x128xf32>
    %c0_65 = arith.constant 0 : index
    %c0_66 = arith.constant 0 : index
    %116 = vector.load %arg23[%c0_65, %c0_66] : memref<1x128xf32, #tpu.memory_space<vmem>>, vector<1x128xf32>
    %c0_67 = arith.constant 0 : index
    %c0_68 = arith.constant 0 : index
    %117 = vector.load %arg24[%c0_67, %c0_68] : memref<1x128xf32, #tpu.memory_space<vmem>>, vector<1x128xf32>
    %c0_69 = arith.constant 0 : index
    %c0_70 = arith.constant 0 : index
    %118 = vector.load %arg25[%c0_69, %c0_70] : memref<128x512xbf16, #tpu.memory_space<vmem>>, vector<128x512xbf16>
    %c0_71 = arith.constant 0 : index
    %c0_72 = arith.constant 0 : index
    %119 = vector.load %arg26[%c0_71, %c0_72] : memref<1x512xf32, #tpu.memory_space<vmem>>, vector<1x512xf32>
    %c0_73 = arith.constant 0 : index
    %c0_74 = arith.constant 0 : index
    %120 = vector.load %arg27[%c0_73, %c0_74] : memref<512x128xbf16, #tpu.memory_space<vmem>>, vector<512x128xbf16>
    %c0_75 = arith.constant 0 : index
    %c0_76 = arith.constant 0 : index
    %121 = vector.load %arg28[%c0_75, %c0_76] : memref<1x128xf32, #tpu.memory_space<vmem>>, vector<1x128xf32>
    %cst_77 = arith.constant dense<0.000000e+00> : vector<32xf32>
    %122 = vector.multi_reduction <add>, %109, %cst_77 [1] : vector<32x128xf32> to vector<32xf32>
    %123 = vector.shape_cast %122 : vector<32xf32> to vector<32x1xf32>
    %cst_78 = arith.constant 1.280000e+02 : f32
    %124 = vector.broadcast %cst_78 : f32 to vector<32x1xf32>
    %125 = arith.divf %123, %124 : vector<32x1xf32>
    %126 = vector.broadcast %125 : vector<32x1xf32> to vector<32x128xf32>
    %127 = arith.subf %109, %126 : vector<32x128xf32>
    %128 = arith.mulf %127, %127 : vector<32x128xf32>
    %cst_79 = arith.constant dense<0.000000e+00> : vector<32xf32>
    %129 = vector.multi_reduction <add>, %128, %cst_79 [1] : vector<32x128xf32> to vector<32xf32>
    %130 = vector.shape_cast %129 : vector<32xf32> to vector<32x1xf32>
    %cst_80 = arith.constant 1.280000e+02 : f32
    %131 = vector.broadcast %cst_80 : f32 to vector<32x1xf32>
    %132 = arith.divf %130, %131 : vector<32x1xf32>
    %133 = vector.broadcast %125 : vector<32x1xf32> to vector<32x128xf32>
    %134 = arith.subf %109, %133 : vector<32x128xf32>
    %cst_81 = arith.constant 9.99999974E-6 : f32
    %135 = vector.broadcast %cst_81 : f32 to vector<32x1xf32>
    %136 = arith.addf %132, %135 : vector<32x1xf32>
    %137 = math.rsqrt %136 : vector<32x1xf32>
    %138 = vector.broadcast %137 : vector<32x1xf32> to vector<32x128xf32>
    %139 = arith.mulf %134, %138 : vector<32x128xf32>
    %140 = vector.broadcast %110 : vector<1x128xf32> to vector<32x128xf32>
    %141 = arith.mulf %139, %140 : vector<32x128xf32>
    %142 = vector.broadcast %111 : vector<1x128xf32> to vector<32x128xf32>
    %143 = arith.addf %141, %142 : vector<32x128xf32>
    %144 = arith.truncf %143 : vector<32x128xf32> to vector<32x128xbf16>
    %cst_82 = arith.constant dense<0.000000e+00> : vector<32x384xf32>
    %145 = tpu.matmul %144, %112, %cst_82 {dimension_numbers = #tpu.dot_dimension_numbers<[1], [0], [0], [1], [0, 0, 1, 1], [], []>} : vector<32x128xbf16>, vector<128x384xbf16>, vector<32x384xf32> -> vector<32x384xf32>
    %146 = vector.broadcast %113 : vector<1x384xf32> to vector<32x384xf32>
    %147 = arith.addf %145, %146 : vector<32x384xf32>
    %148 = vector.extract_strided_slice %147 {offsets = [0, 0], sizes = [32, 128], strides = [1, 1]} : vector<32x384xf32> to vector<32x128xf32>
    %cst_83 = arith.constant 0.176776692 : f32
    %149 = vector.broadcast %cst_83 : f32 to vector<32x128xf32>
    %150 = arith.mulf %148, %149 : vector<32x128xf32>
    %151 = vector.extract_strided_slice %147 {offsets = [0, 128], sizes = [32, 128], strides = [1, 1]} : vector<32x384xf32> to vector<32x128xf32>
    %152 = vector.extract_strided_slice %147 {offsets = [0, 256], sizes = [32, 128], strides = [1, 1]} : vector<32x384xf32> to vector<32x128xf32>
    %153 = tpu.concatenate %151, %151, %151, %151 in 0 : vector<32x128xf32>, vector<32x128xf32>, vector<32x128xf32>, vector<32x128xf32> -> vector<128x128xf32>
    %154 = arith.mulf %153, %0 : vector<128x128xf32>
    %155 = tpu.concatenate %152, %152, %152, %152 in 0 : vector<32x128xf32>, vector<32x128xf32>, vector<32x128xf32>, vector<32x128xf32> -> vector<128x128xf32>
    %156 = arith.mulf %155, %0 : vector<128x128xf32>
    %cst_84 = arith.constant dense<0.000000e+00> : vector<32x128xf32>
    %157 = tpu.matmul %150, %154, %cst_84 {dimension_numbers = #tpu.dot_dimension_numbers<[1], [1], [0], [0], [0, 0, 1, 0], [], []>} : vector<32x128xf32>, vector<128x128xf32>, vector<32x128xf32> -> vector<32x128xf32>
    %158 = arith.addf %157, %1 : vector<32x128xf32>
    %cst_85 = arith.constant dense<0xFF800000> : vector<32xf32>
    %159 = vector.multi_reduction <maximumf>, %158, %cst_85 [1] : vector<32x128xf32> to vector<32xf32>
    %160 = vector.shape_cast %159 : vector<32xf32> to vector<32x1xf32>
    %161 = vector.broadcast %160 : vector<32x1xf32> to vector<32x128xf32>
    %162 = arith.subf %158, %161 : vector<32x128xf32>
    %163 = math.exp %162 : vector<32x128xf32>
    %cst_86 = arith.constant dense<0.000000e+00> : vector<32x128xf32>
    %164 = tpu.matmul %163, %2, %cst_86 {dimension_numbers = #tpu.dot_dimension_numbers<[1], [0], [0], [1], [0, 0, 1, 1], [], []>} : vector<32x128xf32>, vector<128x128xf32>, vector<32x128xf32> -> vector<32x128xf32>
    %165 = arith.divf %163, %164 : vector<32x128xf32>
    %cst_87 = arith.constant dense<0.000000e+00> : vector<32x128xf32>
    %166 = tpu.matmul %165, %156, %cst_87 {dimension_numbers = #tpu.dot_dimension_numbers<[1], [0], [0], [1], [0, 0, 1, 1], [], []>} : vector<32x128xf32>, vector<128x128xf32>, vector<32x128xf32> -> vector<32x128xf32>
    %167 = arith.truncf %166 : vector<32x128xf32> to vector<32x128xbf16>
    %cst_88 = arith.constant dense<0.000000e+00> : vector<32x128xf32>
    %168 = tpu.matmul %167, %114, %cst_88 {dimension_numbers = #tpu.dot_dimension_numbers<[1], [0], [0], [1], [0, 0, 1, 1], [], []>} : vector<32x128xbf16>, vector<128x128xbf16>, vector<32x128xf32> -> vector<32x128xf32>
    %169 = vector.broadcast %115 : vector<1x128xf32> to vector<32x128xf32>
    %170 = arith.addf %168, %169 : vector<32x128xf32>
    %171 = arith.addf %109, %170 : vector<32x128xf32>
    %cst_89 = arith.constant dense<0.000000e+00> : vector<32xf32>
    %172 = vector.multi_reduction <add>, %171, %cst_89 [1] : vector<32x128xf32> to vector<32xf32>
    %173 = vector.shape_cast %172 : vector<32xf32> to vector<32x1xf32>
    %cst_90 = arith.constant 1.280000e+02 : f32
    %174 = vector.broadcast %cst_90 : f32 to vector<32x1xf32>
    %175 = arith.divf %173, %174 : vector<32x1xf32>
    %176 = vector.broadcast %175 : vector<32x1xf32> to vector<32x128xf32>
    %177 = arith.subf %171, %176 : vector<32x128xf32>
    %178 = arith.mulf %177, %177 : vector<32x128xf32>
    %cst_91 = arith.constant dense<0.000000e+00> : vector<32xf32>
    %179 = vector.multi_reduction <add>, %178, %cst_91 [1] : vector<32x128xf32> to vector<32xf32>
    %180 = vector.shape_cast %179 : vector<32xf32> to vector<32x1xf32>
    %cst_92 = arith.constant 1.280000e+02 : f32
    %181 = vector.broadcast %cst_92 : f32 to vector<32x1xf32>
    %182 = arith.divf %180, %181 : vector<32x1xf32>
    %183 = vector.broadcast %175 : vector<32x1xf32> to vector<32x128xf32>
    %184 = arith.subf %171, %183 : vector<32x128xf32>
    %cst_93 = arith.constant 9.99999974E-6 : f32
    %185 = vector.broadcast %cst_93 : f32 to vector<32x1xf32>
    %186 = arith.addf %182, %185 : vector<32x1xf32>
    %187 = math.rsqrt %186 : vector<32x1xf32>
    %188 = vector.broadcast %187 : vector<32x1xf32> to vector<32x128xf32>
    %189 = arith.mulf %184, %188 : vector<32x128xf32>
    %190 = vector.broadcast %116 : vector<1x128xf32> to vector<32x128xf32>
    %191 = arith.mulf %189, %190 : vector<32x128xf32>
    %192 = vector.broadcast %117 : vector<1x128xf32> to vector<32x128xf32>
    %193 = arith.addf %191, %192 : vector<32x128xf32>
    %194 = arith.truncf %193 : vector<32x128xf32> to vector<32x128xbf16>
    %cst_94 = arith.constant dense<0.000000e+00> : vector<32x512xf32>
    %195 = tpu.matmul %194, %118, %cst_94 {dimension_numbers = #tpu.dot_dimension_numbers<[1], [0], [0], [1], [0, 0, 1, 1], [], []>} : vector<32x128xbf16>, vector<128x512xbf16>, vector<32x512xf32> -> vector<32x512xf32>
    %196 = vector.broadcast %119 : vector<1x512xf32> to vector<32x512xf32>
    %197 = arith.addf %195, %196 : vector<32x512xf32>
    %cst_95 = arith.constant 5.000000e-01 : f32
    %198 = vector.broadcast %cst_95 : f32 to vector<32x512xf32>
    %199 = arith.mulf %198, %197 : vector<32x512xf32>
    %cst_96 = arith.constant 4.471500e-02 : f32
    %200 = vector.broadcast %cst_96 : f32 to vector<32x512xf32>
    %201 = arith.mulf %200, %197 : vector<32x512xf32>
    %202 = arith.mulf %201, %197 : vector<32x512xf32>
    %203 = arith.mulf %202, %197 : vector<32x512xf32>
    %204 = arith.addf %197, %203 : vector<32x512xf32>
    %cst_97 = arith.constant 0.797884583 : f32
    %205 = vector.broadcast %cst_97 : f32 to vector<32x512xf32>
    %206 = arith.mulf %205, %204 : vector<32x512xf32>
    %207 = math.tanh %206 : vector<32x512xf32>
    %cst_98 = arith.constant 1.000000e+00 : f32
    %208 = vector.broadcast %cst_98 : f32 to vector<32x512xf32>
    %209 = arith.addf %208, %207 : vector<32x512xf32>
    %210 = arith.mulf %199, %209 : vector<32x512xf32>
    %211 = arith.truncf %210 : vector<32x512xf32> to vector<32x512xbf16>
    %cst_99 = arith.constant dense<0.000000e+00> : vector<32x128xf32>
    %212 = tpu.matmul %211, %120, %cst_99 {dimension_numbers = #tpu.dot_dimension_numbers<[1], [0], [0], [1], [0, 0, 1, 1], [], []>} : vector<32x512xbf16>, vector<512x128xbf16>, vector<32x128xf32> -> vector<32x128xf32>
    %213 = vector.broadcast %121 : vector<1x128xf32> to vector<32x128xf32>
    %214 = arith.addf %212, %213 : vector<32x128xf32>
    %215 = arith.addf %171, %214 : vector<32x128xf32>
    %c0_100 = arith.constant 0 : index
    %c0_101 = arith.constant 0 : index
    %216 = vector.load %arg29[%c0_100, %c0_101] : memref<1x128xf32, #tpu.memory_space<vmem>>, vector<1x128xf32>
    %c0_102 = arith.constant 0 : index
    %c0_103 = arith.constant 0 : index
    %217 = vector.load %arg30[%c0_102, %c0_103] : memref<1x128xf32, #tpu.memory_space<vmem>>, vector<1x128xf32>
    %cst_104 = arith.constant dense<0.000000e+00> : vector<32xf32>
    %218 = vector.multi_reduction <add>, %215, %cst_104 [1] : vector<32x128xf32> to vector<32xf32>
    %219 = vector.shape_cast %218 : vector<32xf32> to vector<32x1xf32>
    %cst_105 = arith.constant 1.280000e+02 : f32
    %220 = vector.broadcast %cst_105 : f32 to vector<32x1xf32>
    %221 = arith.divf %219, %220 : vector<32x1xf32>
    %222 = vector.broadcast %221 : vector<32x1xf32> to vector<32x128xf32>
    %223 = arith.subf %215, %222 : vector<32x128xf32>
    %224 = arith.mulf %223, %223 : vector<32x128xf32>
    %cst_106 = arith.constant dense<0.000000e+00> : vector<32xf32>
    %225 = vector.multi_reduction <add>, %224, %cst_106 [1] : vector<32x128xf32> to vector<32xf32>
    %226 = vector.shape_cast %225 : vector<32xf32> to vector<32x1xf32>
    %cst_107 = arith.constant 1.280000e+02 : f32
    %227 = vector.broadcast %cst_107 : f32 to vector<32x1xf32>
    %228 = arith.divf %226, %227 : vector<32x1xf32>
    %229 = vector.broadcast %221 : vector<32x1xf32> to vector<32x128xf32>
    %230 = arith.subf %215, %229 : vector<32x128xf32>
    %cst_108 = arith.constant 9.99999974E-6 : f32
    %231 = vector.broadcast %cst_108 : f32 to vector<32x1xf32>
    %232 = arith.addf %228, %231 : vector<32x1xf32>
    %233 = math.rsqrt %232 : vector<32x1xf32>
    %234 = vector.broadcast %233 : vector<32x1xf32> to vector<32x128xf32>
    %235 = arith.mulf %230, %234 : vector<32x128xf32>
    %236 = vector.broadcast %216 : vector<1x128xf32> to vector<32x128xf32>
    %237 = arith.mulf %235, %236 : vector<32x128xf32>
    %238 = vector.broadcast %217 : vector<1x128xf32> to vector<32x128xf32>
    %239 = arith.addf %237, %238 : vector<32x128xf32>
    %240 = arith.truncf %239 : vector<32x128xf32> to vector<32x128xbf16>
    %c0_109 = arith.constant 0 : index
    %c0_110 = arith.constant 0 : index
    %241 = vector.load %arg31[%c0_109, %c0_110] : memref<128x512xbf16, #tpu.memory_space<vmem>>, vector<128x512xbf16>
    %cst_111 = arith.constant dense<0.000000e+00> : vector<32x512xf32>
    %242 = tpu.matmul %240, %241, %cst_111 {dimension_numbers = #tpu.dot_dimension_numbers<[1], [0], [0], [1], [0, 0, 1, 1], [], []>} : vector<32x128xbf16>, vector<128x512xbf16>, vector<32x512xf32> -> vector<32x512xf32>
    %c0_112 = arith.constant 0 : index
    %c0_113 = arith.constant 0 : index
    %243 = vector.load %arg32[%c0_112, %c0_113] : memref<1x512xf32, #tpu.memory_space<vmem>>, vector<1x512xf32>
    %244 = vector.broadcast %243 : vector<1x512xf32> to vector<32x512xf32>
    %245 = arith.addf %242, %244 : vector<32x512xf32>
    %c0_114 = arith.constant 0 : index
    %c0_115 = arith.constant 0 : index
    %246 = vector.load %arg33[%c0_114, %c0_115] : memref<32x512xf32, #tpu.memory_space<vmem>>, vector<32x512xf32>
    tpu.vector_store %arg33[%c0_114, %c0_115], %245 {strides = array<i32>} : memref<32x512xf32, #tpu.memory_space<vmem>>, vector<32x512xf32>,
    return
  }
  func.func @transform_0(%arg0: i32) -> (i32, i32) {
    %c0_i32 = arith.constant 0 : i32
    %c0_i32_0 = arith.constant 0 : i32
    %c0_i32_1 = arith.constant 0 : i32
    return %c0_i32, %c0_i32_0 : i32, i32
  }
  func.func @transform_1(%arg0: i32) -> (i32, i32) {
    %c0_i32 = arith.constant 0 : i32
    %c0_i32_0 = arith.constant 0 : i32
    %c0_i32_1 = arith.constant 0 : i32
    return %c0_i32, %c0_i32_0 : i32, i32
  }
  func.func @transform_2(%arg0: i32) -> (i32, i32) {
    %c0_i32 = arith.constant 0 : i32
    %c0_i32_0 = arith.constant 0 : i32
    %c0_i32_1 = arith.constant 0 : i32
    return %c0_i32, %c0_i32_0 : i32, i32
  }
  func.func @transform_3(%arg0: i32) -> (i32, i32) {
    %c0_i32 = arith.constant 0 : i32
    %c0_i32_0 = arith.constant 0 : i32
    %c0_i32_1 = arith.constant 0 : i32
    return %c0_i32, %c0_i32_0 : i32, i32
  }
  func.func @transform_4(%arg0: i32) -> (i32, i32) {
    %c0_i32 = arith.constant 0 : i32
    %c0_i32_0 = arith.constant 0 : i32
    %c0_i32_1 = arith.constant 0 : i32
    return %c0_i32, %c0_i32_0 : i32, i32
  }
  func.func @transform_5(%arg0: i32) -> (i32, i32) {
    %c0_i32 = arith.constant 0 : i32
    %c0_i32_0 = arith.constant 0 : i32
    %c0_i32_1 = arith.constant 0 : i32
    return %c0_i32, %c0_i32_0 : i32, i32
  }
  func.func @transform_6(%arg0: i32) -> (i32, i32) {
    %c0_i32 = arith.constant 0 : i32
    %c0_i32_0 = arith.constant 0 : i32
    %c0_i32_1 = arith.constant 0 : i32
    return %c0_i32, %c0_i32_0 : i32, i32
  }
  func.func @transform_7(%arg0: i32) -> (i32, i32) {
    %c0_i32 = arith.constant 0 : i32
    %c0_i32_0 = arith.constant 0 : i32
    %c0_i32_1 = arith.constant 0 : i32
    return %c0_i32, %c0_i32_0 : i32, i32
  }
  func.func @transform_8(%arg0: i32) -> (i32, i32) {
    %c0_i32 = arith.constant 0 : i32
    %c0_i32_0 = arith.constant 0 : i32
    %c0_i32_1 = arith.constant 0 : i32
    return %c0_i32, %c0_i32_0 : i32, i32
  }
  func.func @transform_9(%arg0: i32) -> (i32, i32) {
    %c0_i32 = arith.constant 0 : i32
    %c0_i32_0 = arith.constant 0 : i32
    %c0_i32_1 = arith.constant 0 : i32
    return %c0_i32, %c0_i32_0 : i32, i32
  }
  func.func @transform_10(%arg0: i32) -> (i32, i32) {
    %c0_i32 = arith.constant 0 : i32
    %c0_i32_0 = arith.constant 0 : i32
    %c0_i32_1 = arith.constant 0 : i32
    return %c0_i32, %c0_i32_0 : i32, i32
  }
  func.func @transform_11(%arg0: i32) -> (i32, i32) {
    %c0_i32 = arith.constant 0 : i32
    %c0_i32_0 = arith.constant 0 : i32
    %c0_i32_1 = arith.constant 0 : i32
    return %c0_i32, %c0_i32_0 : i32, i32
  }
  func.func @transform_12(%arg0: i32) -> (i32, i32) {
    %c0_i32 = arith.constant 0 : i32
    %c0_i32_0 = arith.constant 0 : i32
    %c0_i32_1 = arith.constant 0 : i32
    return %c0_i32, %c0_i32_0 : i32, i32
  }
  func.func @transform_13(%arg0: i32) -> (i32, i32) {
    %c0_i32 = arith.constant 0 : i32
    %c0_i32_0 = arith.constant 0 : i32
    %c0_i32_1 = arith.constant 0 : i32
    return %c0_i32, %c0_i32_0 : i32, i32
  }
  func.func @transform_14(%arg0: i32) -> (i32, i32) {
    %c0_i32 = arith.constant 0 : i32
    %c0_i32_0 = arith.constant 0 : i32
    %c0_i32_1 = arith.constant 0 : i32
    return %c0_i32, %c0_i32_0 : i32, i32
  }
  func.func @transform_15(%arg0: i32) -> (i32, i32) {
    %c0_i32 = arith.constant 0 : i32
    %c0_i32_0 = arith.constant 0 : i32
    %c0_i32_1 = arith.constant 0 : i32
    return %c0_i32, %c0_i32_0 : i32, i32
  }
  func.func @transform_16(%arg0: i32) -> (i32, i32) {
    %c0_i32 = arith.constant 0 : i32
    %c0_i32_0 = arith.constant 0 : i32
    %c0_i32_1 = arith.constant 0 : i32
    return %c0_i32, %c0_i32_0 : i32, i32
  }
  func.func @transform_17(%arg0: i32) -> (i32, i32) {
    %c0_i32 = arith.constant 0 : i32
    %c0_i32_0 = arith.constant 0 : i32
    %c0_i32_1 = arith.constant 0 : i32
    return %c0_i32, %c0_i32_0 : i32, i32
  }
  func.func @transform_18(%arg0: i32) -> (i32, i32) {
    %c0_i32 = arith.constant 0 : i32
    %c0_i32_0 = arith.constant 0 : i32
    %c0_i32_1 = arith.constant 0 : i32
    return %c0_i32, %c0_i32_0 : i32, i32
  }
  func.func @transform_19(%arg0: i32) -> (i32, i32) {
    %c0_i32 = arith.constant 0 : i32
    %c0_i32_0 = arith.constant 0 : i32
    %c0_i32_1 = arith.constant 0 : i32
    return %c0_i32, %c0_i32_0 : i32, i32
  }
  func.func @transform_20(%arg0: i32) -> (i32, i32) {
    %c0_i32 = arith.constant 0 : i32
    %c0_i32_0 = arith.constant 0 : i32
    %c0_i32_1 = arith.constant 0 : i32
    return %c0_i32, %c0_i32_0 : i32, i32
  }
  func.func @transform_21(%arg0: i32) -> (i32, i32) {
    %c0_i32 = arith.constant 0 : i32
    %c0_i32_0 = arith.constant 0 : i32
    %c0_i32_1 = arith.constant 0 : i32
    return %c0_i32, %c0_i32_0 : i32, i32
  }
  func.func @transform_22(%arg0: i32) -> (i32, i32) {
    %c0_i32 = arith.constant 0 : i32
    %c0_i32_0 = arith.constant 0 : i32
    %c0_i32_1 = arith.constant 0 : i32
    return %c0_i32, %c0_i32_0 : i32, i32
  }
  func.func @transform_23(%arg0: i32) -> (i32, i32) {
    %c0_i32 = arith.constant 0 : i32
    %c0_i32_0 = arith.constant 0 : i32
    %c0_i32_1 = arith.constant 0 : i32
    return %c0_i32, %c0_i32_0 : i32, i32
  }
  func.func @transform_24(%arg0: i32) -> (i32, i32) {
    %c0_i32 = arith.constant 0 : i32
    %c0_i32_0 = arith.constant 0 : i32
    %c0_i32_1 = arith.constant 0 : i32
    return %c0_i32, %c0_i32_0 : i32, i32
  }
  func.func @transform_25(%arg0: i32) -> (i32, i32) {
    %c0_i32 = arith.constant 0 : i32
    %c0_i32_0 = arith.constant 0 : i32
    %c0_i32_1 = arith.constant 0 : i32
    return %c0_i32, %c0_i32_0 : i32, i32
  }
  func.func @transform_26(%arg0: i32) -> (i32, i32) {
    %c0_i32 = arith.constant 0 : i32
    %c0_i32_0 = arith.constant 0 : i32
    %c0_i32_1 = arith.constant 0 : i32
    return %c0_i32, %c0_i32_0 : i32, i32
  }
  func.func @transform_27(%arg0: i32) -> (i32, i32) {
    %c0_i32 = arith.constant 0 : i32
    %c0_i32_0 = arith.constant 0 : i32
    %c0_i32_1 = arith.constant 0 : i32
    return %c0_i32, %c0_i32_0 : i32, i32
  }
  func.func @transform_28(%arg0: i32) -> (i32, i32) {
    %c0_i32 = arith.constant 0 : i32
    %c0_i32_0 = arith.constant 0 : i32
    %c0_i32_1 = arith.constant 0 : i32
    return %c0_i32, %c0_i32_0 : i32, i32
  }
  func.func @transform_29(%arg0: i32) -> (i32, i32) {
    %c0_i32 = arith.constant 0 : i32
    %c0_i32_0 = arith.constant 0 : i32
    %c0_i32_1 = arith.constant 0 : i32
    return %c0_i32, %c0_i32_0 : i32, i32
  }
  func.func @transform_30(%arg0: i32) -> (i32, i32) {
    %c0_i32 = arith.constant 0 : i32
    %c0_i32_0 = arith.constant 0 : i32
    %c0_i32_1 = arith.constant 0 : i32
    return %c0_i32, %c0_i32_0 : i32, i32
  }
  func.func @transform_31(%arg0: i32) -> (i32, i32) {
    %c0_i32 = arith.constant 0 : i32
    %c0_i32_0 = arith.constant 0 : i32
    %c0_i32_1 = arith.constant 0 : i32
    return %c0_i32, %c0_i32_0 : i32, i32
  }
  func.func @transform_32(%arg0: i32) -> (i32, i32) {
    %c0_i32 = arith.constant 0 : i32
    %c0_i32_0 = arith.constant 0 : i32
    %c0_i32_1 = arith.constant 0 : i32
    return %c0_i32, %c0_i32_0 : i32, i32
  }
}

</mosaic_0001>

<bundles_post_ra>
// kernel: gpt_forward.1
= control target key start
LH: loop header
LB: loop body
LE: loop exit
PB: predicated region body
PF: predicated region fallthrough
CT: control target
= control target key end

     0   :  { %s6207_s6 = smov 1   ;;  %s6208_s10 = smov 2   ;;  %s7278_s0 = inlined_call_operand.smem [shape: u32[33], index: -1, kind: input, shape index: {}] }
   0x1   :  { %s6273_s5 = sld [smem:[%s7278_s0]]   ;;  %s6209_s14 = smov 3  }
   0x2   :  { %s6278_s9 = sld [smem:[%s7278_s0 + %s6207_s6]]   ;;  %s6210_s18 = smov 4  }
   0x3   :  { %s6283_s13 = sld [smem:[%s7278_s0 + %s6208_s10]]   ;;  %s6211_s22 = smov 5  }
   0x4   :  { %s6288_s17 = sld [smem:[%s7278_s0 + %s6209_s14]]   ;;  %s6212_s26 = smov 6  }
   0x5   :  { %s6293_s21 = sld [smem:[%s7278_s0 + %s6210_s18]]   ;;  %s6213_s30 = smov 7  }
   0x6   :  { %s6298_s25 = sld [smem:[%s7278_s0 + %s6211_s22]]   ;;  %s6214_s4 = smov 8  }
   0x7   :  { %7288 = sst [smem:[#allocation41_spill]] %s6273_s5  ;;  %s6215_s10 = smov 9  }
   0x8   :  { %7289 = sst [smem:[#allocation42_spill]] %s6278_s9  ;;  %s6216_s15 = smov 10  }
   0x9   :  { %7290 = sst [smem:[#allocation43_spill]] %s6283_s13  ;;  %s6217_s20 = smov 11  }
   0xa   :  { %7291 = sst [smem:[#allocation44_spill]] %s6288_s17  ;;  %s6219_s1 = smov 13  }
   0xb   :  { %s6303_s29 = sld [smem:[%s7278_s0 + %s6212_s26]]   ;;  %s6218_s26 = smov 12  }
   0xc   :  { %s6308_s3 = sld [smem:[%s7278_s0 + %s6213_s30]]   ;;  %s6220_s7 = smov 14  }
   0xd   :  { %s6313_s8 = sld [smem:[%s7278_s0 + %s6214_s4]]   ;;  %s6222_s22 = smov 16  }
   0xe   :  { %s6318_s14 = sld [smem:[%s7278_s0 + %s6215_s10]]   ;;  %s6223_s28 = smov 17  }
   0xf   :  { %s6323_s19 = sld [smem:[%s7278_s0 + %s6216_s15]]   ;;  %s6221_s15 = smov 15  }
  0x10   :  { %s6328_s24 = sld [smem:[%s7278_s0 + %s6217_s20]]  }
  0x11   :  { %s6333_s30 = sld [smem:[%s7278_s0 + %s6218_s26]]  }
  0x12   :  { %s6338_s6 = sld [smem:[%s7278_s0 + %s6219_s1]]  }
  0x13   :  { %7292 = sst [smem:[#allocation45_spill]] %s6313_s8 }
  0x14   :  { %s6343_s12 = sld [smem:[%s7278_s0 + %s6220_s7]]   ;;  %s6224_s7 = smov 18  }
  0x15   :  { %s6348_s20 = sld [smem:[%s7278_s0 + %s6221_s15]]   ;;  %s6225_s15 = smov 19  }
  0x16   :  { %s6353_s27 = sld [smem:[%s7278_s0 + %s6222_s22]]   ;;  %s6226_s22 = smov 20  }
  0x17   :  { %7293 = sst [smem:[#allocation46_spill]] %s6333_s30 }
  0x18   :  { %s6358_s4 = sld [smem:[%s7278_s0 + %s6223_s28]]   ;;  %s6227_s28 = smov 21  }
  0x19   :  { %s6363_s30 = sld [smem:[%s7278_s0 + %s6224_s7]]   ;;  %s6228_s7 = smov 22  }
  0x1a   :  { %s6368_s8 = sld [smem:[%s7278_s0 + %s6225_s15]]   ;;  %s6229_s15 = smov 23  }
  0x1b   :  { %s6383_s13 = sld [smem:[%s7278_s0 + %s6228_s7]]   ;;  %s6232_s7 = smov 26  }
  0x1c   :  { %7294 = sst [smem:[#allocation47_spill]] %s6353_s27 }
  0x1d   :  { %s6373_s27 = sld [smem:[%s7278_s0 + %s6226_s22]]   ;;  %s6230_s22 = smov 24  }
  0x1e   :  { %7295 = sst [smem:[#allocation48_spill]] %s6358_s4 }
  0x1f   :  { %s6378_s4 = sld [smem:[%s7278_s0 + %s6227_s28]]   ;;  %s6231_s28 = smov 25  }
  0x20   :  { %s6388_s9 = sld [smem:[%s7278_s0 + %s6229_s15]]   ;;  %s6233_s15 = smov 27  }
  0x21   :  { %7298 = sst [smem:[#allocation51_spill]] %s6383_s13 }
  0x22   :  { %s6393_s17 = sld [smem:[%s7278_s0 + %s6230_s22]]   ;;  %s6234_s22 = smov 28  }
  0x23   :  { %7296 = sst [smem:[#allocation49_spill]] %s6373_s27 }
  0x24   :  { %s6403_s13 = sld [smem:[%s7278_s0 + %s6232_s7]]   ;;  %s6236_s7 = smov 30  }
  0x25   :  { %7297 = sst [smem:[#allocation50_spill]] %s6378_s4 }
  0x26   :  { %7299 = sst [smem:[#allocation52_spill]] %s6388_s9 }
  0x27   :  { %s6398_s4 = sld [smem:[%s7278_s0 + %s6231_s28]]   ;;  %s6235_s28 = smov 29  }
  0x28   :  { %s6408_s9 = sld [smem:[%s7278_s0 + %s6233_s15]]   ;;  %s6237_s15 = smov 31  }
  0x29   :  { %s6413_s5 = sld [smem:[%s7278_s0 + %s6234_s22]]   ;;  %s6238_s22 = smov 32  }
  0x2a   :  { %s6423_s27 = sld [smem:[%s7278_s0 + %s6236_s7]]  }
  0x2d   :  { %7300 = sst [smem:[#allocation53_spill]] %s6398_s4 }
  0x2e   :  { %7301 = sst [smem:[#allocation54_spill]] %s6408_s9 }
  0x2f   :  { %7302 = sst [smem:[#allocation55_spill]] %s6413_s5 }
  0x30   :  { %s6418_s4 = sld [smem:[%s7278_s0 + %s6235_s28]]  }
  0x31   :  { %s6428_s9 = sld [smem:[%s7278_s0 + %s6237_s15]]  }
  0x32   :  { %s6433_s5 = sld [smem:[%s7278_s0 + %s6238_s22]]  }
  0x33   :  { %70 = vsyncpa [#allocation3], 0 }
  0x34   :  { %71 = vsyncpa [#allocation5], 0 }
  0x35   :  { %72 = vsyncpa [#allocation8], 0 }
  0x36   :  { %73 = vsyncpa [#allocation11], 0 }
  0x37   :  { %74 = vsyncpa [#allocation14], 0 }
  0x38   :  { %75 = vsyncpa [#allocation17], 0 }
  0x39   :  { %76 = vsyncpa [#allocation20], 0 }
  0x3a   :  { %77 = vsyncpa [#allocation23], 0 }
  0x3b   :  { %78 = vsyncpa [#allocation26], 0 }
  0x3c   :  { %79 = vsyncpa [#allocation29], 0  ;;  %s6239_s28 = smov [#allocation4]   ;;  %s6240_s2 = smov [#allocation7]  }
  0x3d   :  { %s104_s1 = sshll.u32 %s6239_s28, 4  ;;  %s126_s7 = sshll.u32 %s6240_s2, 4  ;;  %s105_s1 = int_to_ptr.vmem [resolvable:$true] %s104_s1  ;;  %s127_s7 = int_to_ptr.vmem [resolvable:$true] %s126_s7 }
  0x3e   :  { %s5769_s0 = scalar_lea.hbm %s6298_s25, 16 }
  0x3f   :  { %p5770_p0 = scmp.ne.s32.totalorder %s6298_s25, %s5769_s0  ;;  %p5773_p1 = scmp.lt.u32.totalorder %s5769_s0, %s6298_s25 }
  0x41   :  { %p5775_p2 = pnand %p5773_p1, %p5770_p0 }
  0x43   :  { %5778 = shalt.err (!%p5775_p2)
}
  0x44   :  { %s5779_s10 = scalar_lea.vmem %s105_s1, 16  ;;  %s5783_s11 = scalar_lea.vmem %s105_s1, 32 }
  0x45   :  { %p5780_p3 = scmp.ne.s32.totalorder %s105_s1, %s5779_s10  ;;  %p5784_p4 = scmp.lt.s32.totalorder %s105_s1, %s105_s1 }
  0x46   :  { %p5785_p5 = scmp.lt.s32.totalorder %s5783_s11, %s5779_s10 }
  0x48   :  { %p5786_p6 = por %p5785_p5, %p5784_p4 }
  0x4a   :  { %p5787_p7 = pnand %p5786_p6, %p5780_p3 }
  0x4c   :  { %5790 = shalt.err (!%p5787_p7)
}
  0x4d   :  { %107 = dma.hbm_to_vmem [thread:$0]  %s6298_s25, 16, %s105_s1, [#allocation5]  }
  0x4e   :  { %s5791_s15 = scalar_lea.hbm %s6308_s3, 48 }
  0x4f   :  { %p5792_p8 = scmp.ne.s32.totalorder %s6308_s3, %s5791_s15  ;;  %p5795_p9 = scmp.lt.u32.totalorder %s5791_s15, %s6308_s3 }
  0x51   :  { %p5797_p10 = pnand %p5795_p9, %p5792_p8 }
  0x53   :  { %5800 = shalt.err (!%p5797_p10)
}
  0x54   :  { %s5801_s16 = scalar_lea.vmem %s127_s7, 48  ;;  %s5805_s18 = scalar_lea.vmem %s127_s7, 64 }
  0x55   :  { %p5802_p11 = scmp.ne.s32.totalorder %s127_s7, %s5801_s16  ;;  %p5806_p12 = scmp.lt.s32.totalorder %s127_s7, %s127_s7 }
  0x56   :  { %p5807_p13 = scmp.lt.s32.totalorder %s5805_s18, %s5801_s16 }
  0x58   :  { %p5808_p0 = por %p5807_p13, %p5806_p12 }
  0x5a   :  { %p5809_p1 = pnand %p5808_p0, %p5802_p11 }
  0x5c   :  { %5812 = shalt.err (!%p5809_p1)
}
  0x5d   :  { %129 = dma.hbm_to_vmem [thread:$0]  %s6308_s3, 48, %s127_s7, [#allocation8]  }
  0x5e   :  { %s6241_s22 = smov [#allocation10]   ;;  %s6242_s23 = smov [#allocation13]  }
  0x5f   :  { %s148_s25 = sshll.u32 %s6241_s22, 4  ;;  %s170_s26 = sshll.u32 %s6242_s23, 4  ;;  %s149_s25 = int_to_ptr.vmem [resolvable:$true] %s148_s25  ;;  %s171_s26 = int_to_ptr.vmem [resolvable:$true] %s170_s26 }
  0x60   :  { %s5813_s28 = scalar_lea.hbm %s6323_s19, 16 }
  0x61   :  { %p5814_p2 = scmp.ne.s32.totalorder %s6323_s19, %s5813_s28  ;;  %p5817_p3 = scmp.lt.u32.totalorder %s5813_s28, %s6323_s19 }
  0x63   :  { %p5819_p4 = pnand %p5817_p3, %p5814_p2 }
  0x65   :  { %5822 = shalt.err (!%p5819_p4)
}
  0x66   :  { %s5823_s1 = scalar_lea.vmem %s149_s25, 16  ;;  %s5827_s2 = scalar_lea.vmem %s149_s25, 32 }
  0x67   :  { %p5824_p5 = scmp.ne.s32.totalorder %s149_s25, %s5823_s1  ;;  %p5828_p6 = scmp.lt.s32.totalorder %s149_s25, %s149_s25 }
  0x68   :  { %p5829_p7 = scmp.lt.s32.totalorder %s5827_s2, %s5823_s1 }
  0x6a   :  { %p5830_p8 = por %p5829_p7, %p5828_p6 }
  0x6c   :  { %p5831_p9 = pnand %p5830_p8, %p5824_p5 }
  0x6e   :  { %5834 = shalt.err (!%p5831_p9)
}
  0x6f   :  { %151 = dma.hbm_to_vmem [thread:$0]  %s6323_s19, 16, %s149_s25, [#allocation11]  }
  0x70   :  { %s5835_s3 = scalar_lea.hbm %s6338_s6, 64 }
  0x71   :  { %p5836_p10 = scmp.ne.s32.totalorder %s6338_s6, %s5835_s3  ;;  %p5839_p11 = scmp.lt.u32.totalorder %s5835_s3, %s6338_s6 }
  0x73   :  { %p5841_p12 = pnand %p5839_p11, %p5836_p10 }
  0x75   :  { %5844 = shalt.err (!%p5841_p12)
}
  0x76   :  { %s5845_s7 = scalar_lea.vmem %s171_s26, 64  ;;  %p5850_p0 = scmp.lt.s32.totalorder %s171_s26, %s171_s26 }
  0x77   :  { %p5846_p13 = scmp.ne.s32.totalorder %s171_s26, %s5845_s7  ;;  %p5851_p1 = scmp.lt.s32.totalorder %s5845_s7, %s5845_s7 }
  0x79   :  { %p5852_p2 = por %p5851_p1, %p5850_p0 }
  0x7b   :  { %p5853_p3 = pnand %p5852_p2, %p5846_p13 }
  0x7d   :  { %5856 = shalt.err (!%p5853_p3)
}
  0x7e   :  { %173 = dma.hbm_to_vmem [thread:$0]  %s6338_s6, 64, %s171_s26, [#allocation14]  }
  0x7f   :  { %s6243_s0 = smov [#allocation16]   ;;  %s6244_s19 = smov [#allocation19]  }
  0x80   :  { %s192_s10 = sshll.u32 %s6243_s0, 4  ;;  %s218_s11 = sshll.u32 %s6244_s19, 4  ;;  %s193_s10 = int_to_ptr.vmem [resolvable:$true] %s192_s10  ;;  %s219_s11 = int_to_ptr.vmem [resolvable:$true] %s218_s11 }
  0x81   :  { %s5857_s15 = scalar_lea.hbm %s6348_s20, 16 }
  0x82   :  { %p5858_p4 = scmp.ne.s32.totalorder %s6348_s20, %s5857_s15  ;;  %p5861_p5 = scmp.lt.u32.totalorder %s5857_s15, %s6348_s20 }
  0x84   :  { %p5863_p6 = pnand %p5861_p5, %p5858_p4 }
  0x86   :  { %5866 = shalt.err (!%p5863_p6)
}
  0x87   :  { %s5867_s16 = scalar_lea.vmem %s193_s10, 16  ;;  %s5871_s18 = scalar_lea.vmem %s193_s10, 32 }
  0x88   :  { %p5868_p7 = scmp.ne.s32.totalorder %s193_s10, %s5867_s16  ;;  %p5872_p8 = scmp.lt.s32.totalorder %s193_s10, %s193_s10 }
  0x89   :  { %p5873_p9 = scmp.lt.s32.totalorder %s5871_s18, %s5867_s16 }
  0x8b   :  { %p5874_p10 = por %p5873_p9, %p5872_p8 }
  0x8d   :  { %p5875_p11 = pnand %p5874_p10, %p5868_p7 }
  0x8f   :  { %5878 = shalt.err (!%p5875_p11)
}
  0x90   :  { %195 = dma.hbm_to_vmem [thread:$0]  %s6348_s20, 16, %s193_s10, [#allocation17]  }
  0x91   :  { %s5879_s6 = scalar_lea.hbm %s6368_s8, 48 }
  0x92   :  { %p5880_p12 = scmp.ne.s32.totalorder %s6368_s8, %s5879_s6  ;;  %p5883_p13 = scmp.lt.u32.totalorder %s5879_s6, %s6368_s8 }
  0x94   :  { %p5885_p0 = pnand %p5883_p13, %p5880_p12 }
  0x96   :  { %5888 = shalt.err (!%p5885_p0)
}
  0x97   :  { %s5889_s22 = scalar_lea.vmem %s219_s11, 48  ;;  %s5893_s25 = scalar_lea.vmem %s219_s11, 64 }
  0x98   :  { %p5890_p1 = scmp.ne.s32.totalorder %s219_s11, %s5889_s22  ;;  %p5894_p2 = scmp.lt.s32.totalorder %s219_s11, %s219_s11 }
  0x99   :  { %p5895_p3 = scmp.lt.s32.totalorder %s5893_s25, %s5889_s22 }
  0x9b   :  { %p5896_p4 = por %p5895_p3, %p5894_p2 }
  0x9d   :  { %p5897_p5 = pnand %p5896_p4, %p5890_p1 }
  0x9f   :  { %5900 = shalt.err (!%p5897_p5)
}
  0xa0   :  { %221 = dma.hbm_to_vmem [thread:$0]  %s6368_s8, 48, %s219_s11, [#allocation20]  }
  0xa1   :  { %s6245_s23 = smov [#allocation22]   ;;  %s5901_s26 = scalar_lea.hbm %s6393_s17, 4096 }
  0xa2   :  { %s245_s20 = sshll.u32 %s6245_s23, 4  ;;  %p5902_p6 = scmp.ne.s32.totalorder %s6393_s17, %s5901_s26  ;;  %s246_s20 = int_to_ptr.vmem [resolvable:$true] %s245_s20 }
  0xa3   :  { %p5905_p7 = scmp.lt.u32.totalorder %s5901_s26, %s6393_s17 }
  0xa5   :  { %p5907_p8 = pnand %p5905_p7, %p5902_p6 }
  0xa7   :  { %5910 = shalt.err (!%p5907_p8)
}
  0xa8   :  { %s5911_s28 = scalar_lea.vmem %s246_s20, 4096  ;;  %p5916_p10 = scmp.lt.s32.totalorder %s246_s20, %s246_s20 }
  0xa9   :  { %p5912_p9 = scmp.ne.s32.totalorder %s246_s20, %s5911_s28  ;;  %p5917_p11 = scmp.lt.s32.totalorder %s5911_s28, %s5911_s28 }
  0xab   :  { %p5918_p12 = por %p5917_p11, %p5916_p10 }
  0xad   :  { %p5919_p13 = pnand %p5918_p12, %p5912_p9 }
  0xaf   :  { %5922 = shalt.err (!%p5919_p13)
}
  0xb0   :  { %s6246_s1 = smov 256   ;;  %s6247_s8 = smov 16  }
  0xb1   :  { %251 = dma.hbm_to_vmem [thread:$0]  %s6393_s17, 4096, %s246_s20, [#allocation23], %s6246_s1, %s6246_s1, %s6247_s8  }
  0xb2   :  { %s6248_s2 = smov [#allocation25]   ;;  %s6249_s7 = smov [#allocation28]  }
  0xb3   :  { %s267_s3 = sshll.u32 %s6248_s2, 4  ;;  %s293_s0 = sshll.u32 %s6249_s7, 4  ;;  %s268_s3 = int_to_ptr.vmem [resolvable:$true] %s267_s3  ;;  %s294_s0 = int_to_ptr.vmem [resolvable:$true] %s293_s0 }
  0xb4   :  { %s5923_s10 = scalar_lea.hbm %s6403_s13, 4096 }
  0xb5   :  { %p5924_p0 = scmp.ne.s32.totalorder %s6403_s13, %s5923_s10  ;;  %p5927_p1 = scmp.lt.u32.totalorder %s5923_s10, %s6403_s13 }
  0xb7   :  { %p5929_p2 = pnand %p5927_p1, %p5924_p0 }
  0xb9   :  { %5932 = shalt.err (!%p5929_p2)
}
  0xba   :  { %s5933_s19 = scalar_lea.vmem %s268_s3, 4096  ;;  %p5938_p4 = scmp.lt.s32.totalorder %s268_s3, %s268_s3 }
  0xbb   :  { %p5934_p3 = scmp.ne.s32.totalorder %s268_s3, %s5933_s19  ;;  %p5939_p5 = scmp.lt.s32.totalorder %s5933_s19, %s5933_s19 }
  0xbd   :  { %p5940_p6 = por %p5939_p5, %p5938_p4 }
  0xbf   :  { %p5941_p7 = pnand %p5940_p6, %p5934_p3 }
  0xc1   :  { %5944 = shalt.err (!%p5941_p7)
}
  0xc2   :  { %s6250_s11 = smov 64   ;;  %s6251_s17 = smov 4  }
  0xc3   :  { %273 = dma.hbm_to_vmem [thread:$0]  %s6403_s13, 4096, %s268_s3, [#allocation26], %s6250_s11, %s6250_s11, %s6251_s17  }
  0xc4   :  { %s5945_s15 = scalar_lea.hbm %s6423_s27, 4096 }
  0xc5   :  { %p5946_p8 = scmp.ne.s32.totalorder %s6423_s27, %s5945_s15  ;;  %p5949_p9 = scmp.lt.u32.totalorder %s5945_s15, %s6423_s27 }
  0xc7   :  { %p5951_p10 = pnand %p5949_p9, %p5946_p8 }
  0xc9   :  { %5954 = shalt.err (!%p5951_p10)
}
  0xca   :  { %s5955_s16 = scalar_lea.vmem %s294_s0, 4096  ;;  %p5960_p12 = scmp.lt.s32.totalorder %s294_s0, %s294_s0 }
  0xcb   :  { %p5956_p11 = scmp.ne.s32.totalorder %s294_s0, %s5955_s16  ;;  %p5961_p13 = scmp.lt.s32.totalorder %s5955_s16, %s5955_s16 }
  0xcd   :  { %p5962_p0 = por %p5961_p13, %p5960_p12 }
  0xcf   :  { %p5963_p1 = pnand %p5962_p0, %p5956_p11 }
  0xd1   :  { %5966 = shalt.err (!%p5963_p1)
}
  0xd2   :  { %299 = dma.hbm_to_vmem [thread:$0]  %s6423_s27, 4096, %s294_s0, [#allocation29], %s6246_s1, %s6246_s1, %s6247_s8  }
  0xd3   :  { %s6252_s13 = smov [#allocation2]   ;;  %s6253_s6 = smov [#allocation6]  }
  0xd4   :  { %s94_s18 = sshll.u32 %s6252_s13, 4  ;;  %s113_s22 = sshll.u32 %s6253_s6, 4  ;;  %s95_s18 = int_to_ptr.vmem [resolvable:$true] %s94_s18  ;;  %s114_s22 = int_to_ptr.vmem [resolvable:$true] %s113_s22 }
  0xd5   :  { %s5967_s25 = scalar_lea.hbm %s6293_s21, 16 }
  0xd6   :  { %p5968_p2 = scmp.ne.s32.totalorder %s6293_s21, %s5967_s25  ;;  %p5971_p3 = scmp.lt.u32.totalorder %s5967_s25, %s6293_s21 }
  0xd8   :  { %p5973_p4 = pnand %p5971_p3, %p5968_p2 }
  0xda   :  { %5976 = shalt.err (!%p5973_p4)
}
  0xdb   :  { %s5977_s23 = scalar_lea.vmem %s95_s18, 16  ;;  %s5981_s20 = scalar_lea.vmem %s95_s18, 32 }
  0xdc   :  { %p5978_p5 = scmp.ne.s32.totalorder %s95_s18, %s5977_s23  ;;  %p5982_p6 = scmp.lt.s32.totalorder %s95_s18, %s95_s18 }
  0xdd   :  { %p5983_p7 = scmp.lt.s32.totalorder %s5981_s20, %s5977_s23 }
  0xdf   :  { %p5984_p8 = por %p5983_p7, %p5982_p6 }
  0xe1   :  { %p5985_p9 = pnand %p5984_p8, %p5978_p5 }
  0xe3   :  { %5988 = shalt.err (!%p5985_p9)
}
  0xe4   :  { %97 = dma.hbm_to_vmem [thread:$0]  %s6293_s21, 16, %s95_s18, [#allocation3]  }
  0xe5   :  { %s5989_s27 = scalar_lea.hbm %s6303_s29, 3072 }
  0xe6   :  { %p5990_p10 = scmp.ne.s32.totalorder %s6303_s29, %s5989_s27  ;;  %p5993_p11 = scmp.lt.u32.totalorder %s5989_s27, %s6303_s29 }
  0xe8   :  { %p5995_p12 = pnand %p5993_p11, %p5990_p10 }
  0xea   :  { %5998 = shalt.err (!%p5995_p12)
}
  0xeb   :  { %s5999_s26 = scalar_lea.vmem %s114_s22, 3072  ;;  %p6004_p0 = scmp.lt.s32.totalorder %s114_s22, %s114_s22 }
  0xec   :  { %p6000_p13 = scmp.ne.s32.totalorder %s114_s22, %s5999_s26  ;;  %p6005_p1 = scmp.lt.s32.totalorder %s5999_s26, %s5999_s26 }
  0xee   :  { %p6006_p2 = por %p6005_p1, %p6004_p0 }
  0xf0   :  { %p6007_p3 = pnand %p6006_p2, %p6000_p13 }
  0xf2   :  { %6010 = shalt.err (!%p6007_p3)
}
  0xf3   :  { %s6254_s28 = smov 192   ;;  %s6255_s1 = smov 12  }
  0xf4   :  { %119 = dma.hbm_to_vmem [thread:$0]  %s6303_s29, 3072, %s114_s22, [#allocation5], %s6254_s28, %s6254_s28, %s6255_s1  }
  0xf5   :  { %s6256_s21 = smov [#allocation9]   ;;  %s6257_s2 = smov [#allocation12]  }
  0xf6   :  { %s138_s8 = sshll.u32 %s6256_s21, 4  ;;  %s158_s3 = sshll.u32 %s6257_s2, 4  ;;  %s139_s8 = int_to_ptr.vmem [resolvable:$true] %s138_s8  ;;  %s159_s3 = int_to_ptr.vmem [resolvable:$true] %s158_s3 }
  0xf7   :  { %s6011_s7 = scalar_lea.hbm %s6318_s14, 16 }
  0xf8   :  { %p6012_p4 = scmp.ne.s32.totalorder %s6318_s14, %s6011_s7  ;;  %p6015_p5 = scmp.lt.u32.totalorder %s6011_s7, %s6318_s14 }
  0xfa   :  { %p6017_p6 = pnand %p6015_p5, %p6012_p4 }
  0xfc   :  { %6020 = shalt.err (!%p6017_p6)
}
  0xfd   :  { %s6021_s0 = scalar_lea.vmem %s139_s8, 16  ;;  %s6025_s10 = scalar_lea.vmem %s139_s8, 32 }
  0xfe   :  { %p6022_p7 = scmp.ne.s32.totalorder %s139_s8, %s6021_s0  ;;  %p6026_p8 = scmp.lt.s32.totalorder %s139_s8, %s139_s8 }
  0xff   :  { %p6027_p9 = scmp.lt.s32.totalorder %s6025_s10, %s6021_s0 }
 0x101   :  { %p6028_p10 = por %p6027_p9, %p6026_p8 }
 0x103   :  { %p6029_p11 = pnand %p6028_p10, %p6022_p7 }
 0x105   :  { %6032 = shalt.err (!%p6029_p11)
}
 0x106   :  { %141 = dma.hbm_to_vmem [thread:$0]  %s6318_s14, 16, %s139_s8, [#allocation8]  }
 0x107   :  { %s6033_s29 = scalar_lea.hbm %s6328_s24, 16 }
 0x108   :  { %p6034_p12 = scmp.ne.s32.totalorder %s6328_s24, %s6033_s29  ;;  %p6037_p13 = scmp.lt.u32.totalorder %s6033_s29, %s6328_s24 }
 0x10a   :  { %p6039_p0 = pnand %p6037_p13, %p6034_p12 }
 0x10c   :  { %6042 = shalt.err (!%p6039_p0)
}
 0x10d   :  { %s6043_s19 = scalar_lea.vmem %s159_s3, 16  ;;  %s6047_s15 = scalar_lea.vmem %s159_s3, 32 }
 0x10e   :  { %p6044_p1 = scmp.ne.s32.totalorder %s159_s3, %s6043_s19  ;;  %p6048_p2 = scmp.lt.s32.totalorder %s159_s3, %s159_s3 }
 0x10f   :  { %p6049_p3 = scmp.lt.s32.totalorder %s6047_s15, %s6043_s19 }
 0x111   :  { %p6050_p4 = por %p6049_p3, %p6048_p2 }
 0x113   :  { %p6051_p5 = pnand %p6050_p4, %p6044_p1 }
 0x115   :  { %6054 = shalt.err (!%p6051_p5)
}
 0x116   :  { %161 = dma.hbm_to_vmem [thread:$0]  %s6328_s24, 16, %s159_s3, [#allocation11]  }
 0x117   :  { %s6258_s14 = smov [#allocation15]   ;;  %s6259_s13 = smov [#allocation18]  }
 0x118   :  { %s179_s16 = sshll.u32 %s6258_s14, 4  ;;  %s205_s18 = sshll.u32 %s6259_s13, 4  ;;  %s180_s16 = int_to_ptr.vmem [resolvable:$true] %s179_s16  ;;  %s206_s18 = int_to_ptr.vmem [resolvable:$true] %s205_s18 }
 0x119   :  { %s6055_s6 = scalar_lea.hbm %s6343_s12, 4096 }
 0x11a   :  { %p6056_p6 = scmp.ne.s32.totalorder %s6343_s12, %s6055_s6  ;;  %p6059_p7 = scmp.lt.u32.totalorder %s6055_s6, %s6343_s12 }
 0x11c   :  { %p6061_p8 = pnand %p6059_p7, %p6056_p6 }
 0x11e   :  { %6064 = shalt.err (!%p6061_p8)
}
 0x11f   :  { %s6065_s22 = scalar_lea.vmem %s180_s16, 4096  ;;  %p6070_p10 = scmp.lt.s32.totalorder %s180_s16, %s180_s16 }
 0x120   :  { %p6066_p9 = scmp.ne.s32.totalorder %s180_s16, %s6065_s22  ;;  %p6071_p11 = scmp.lt.s32.totalorder %s6065_s22, %s6065_s22 }
 0x122   :  { %p6072_p12 = por %p6071_p11, %p6070_p10 }
 0x124   :  { %p6073_p13 = pnand %p6072_p12, %p6066_p9 }
 0x126   :  { %6076 = shalt.err (!%p6073_p13)
}
 0x127   :  { %185 = dma.hbm_to_vmem [thread:$0]  %s6343_s12, 4096, %s180_s16, [#allocation14], %s6250_s11, %s6250_s11, %s6251_s17  }
 0x128   :  { %s6077_s24 = scalar_lea.hbm %s6363_s30, 3072 }
 0x129   :  { %p6078_p0 = scmp.ne.s32.totalorder %s6363_s30, %s6077_s24  ;;  %p6081_p1 = scmp.lt.u32.totalorder %s6077_s24, %s6363_s30 }
 0x12b   :  { %p6083_p2 = pnand %p6081_p1, %p6078_p0 }
 0x12d   :  { %6086 = shalt.err (!%p6083_p2)
}
 0x12e   :  { %s6087_s25 = scalar_lea.vmem %s206_s18, 3072  ;;  %p6092_p4 = scmp.lt.s32.totalorder %s206_s18, %s206_s18 }
 0x12f   :  { %p6088_p3 = scmp.ne.s32.totalorder %s206_s18, %s6087_s25  ;;  %p6093_p5 = scmp.lt.s32.totalorder %s6087_s25, %s6087_s25 }
 0x131   :  { %p6094_p6 = por %p6093_p5, %p6092_p4 }
 0x133   :  { %p6095_p7 = pnand %p6094_p6, %p6088_p3 }
 0x135   :  { %6098 = shalt.err (!%p6095_p7)
}
 0x136   :  { %s7303_s23 = sld [smem:[#allocation49_spill]]  ;;  %s6260_s12 = smov [#allocation21]  }
 0x137   :  { %211 = dma.hbm_to_vmem [thread:$0]  %s6363_s30, 3072, %s206_s18, [#allocation17], %s6254_s28, %s6254_s28, %s6255_s1  }
 0x138   :  { %s227_s20 = sshll.u32 %s6260_s12, 4  ;;  %s6261_s27 = smov [#allocation24]   ;;  %s228_s20 = int_to_ptr.vmem [resolvable:$true] %s227_s20 }
 0x139   :  { %s258_s26 = sshll.u32 %s6261_s27, 4  ;;  %s259_s26 = int_to_ptr.vmem [resolvable:$true] %s258_s26 }
 0x13c   :  { %s6099_s21 = scalar_lea.hbm %s7303_s23, 1024 }
 0x13d   :  { %p6100_p8 = scmp.ne.s32.totalorder %s7303_s23, %s6099_s21  ;;  %p6103_p9 = scmp.lt.u32.totalorder %s6099_s21, %s7303_s23 }
 0x13f   :  { %p6105_p10 = pnand %p6103_p9, %p6100_p8 }
 0x141   :  { %6108 = shalt.err (!%p6105_p10)
}
 0x142   :  { %s6109_s8 = scalar_lea.vmem %s228_s20, 1024  ;;  %p6114_p12 = scmp.lt.s32.totalorder %s228_s20, %s228_s20 }
 0x143   :  { %p6110_p11 = scmp.ne.s32.totalorder %s228_s20, %s6109_s8  ;;  %p6115_p13 = scmp.lt.s32.totalorder %s6109_s8, %s6109_s8 }
 0x145   :  { %p6116_p0 = por %p6115_p13, %p6114_p12 }
 0x147   :  { %p6117_p1 = pnand %p6116_p0, %p6110_p11 }
 0x149   :  { %6120 = shalt.err (!%p6117_p1)
}
 0x14a   :  { %s7304_s30 = sld [smem:[#allocation53_spill]] }
 0x14b   :  { %233 = dma.hbm_to_vmem [thread:$0]  %s7303_s23, 1024, %s228_s20, [#allocation20], %s6250_s11, %s6250_s11, %s6251_s17  }
 0x150   :  { %s6121_s28 = scalar_lea.hbm %s7304_s30, 64 }
 0x151   :  { %p6122_p2 = scmp.ne.s32.totalorder %s7304_s30, %s6121_s28  ;;  %p6125_p3 = scmp.lt.u32.totalorder %s6121_s28, %s7304_s30 }
 0x153   :  { %p6127_p4 = pnand %p6125_p3, %p6122_p2 }
 0x155   :  { %6130 = shalt.err (!%p6127_p4)
}
 0x156   :  { %s6131_s1 = scalar_lea.vmem %s259_s26, 64  ;;  %p6136_p6 = scmp.lt.s32.totalorder %s259_s26, %s259_s26 }
 0x157   :  { %p6132_p5 = scmp.ne.s32.totalorder %s259_s26, %s6131_s1  ;;  %p6137_p7 = scmp.lt.s32.totalorder %s6131_s1, %s6131_s1 }
 0x159   :  { %p6138_p8 = por %p6137_p7, %p6136_p6 }
 0x15b   :  { %p6139_p9 = pnand %p6138_p8, %p6132_p5 }
 0x15d   :  { %6142 = shalt.err (!%p6139_p9)
}
 0x15e   :  { %s7305_s2 = sld [smem:[#allocation54_spill]]  ;;  %s6262_s3 = smov [#allocation27]  }
 0x15f   :  { %261 = dma.hbm_to_vmem [thread:$0]  %s7304_s30, 64, %s259_s26, [#allocation23]  }
 0x160   :  { %s280_s11 = sshll.u32 %s6262_s3, 4  ;;  %s6263_s17 = smov [#allocation30]   ;;  %s281_s11 = int_to_ptr.vmem [resolvable:$true] %s280_s11 }
 0x161   :  { %s306_s7 = sshll.u32 %s6263_s17, 4  ;;  %s307_s7 = int_to_ptr.vmem [resolvable:$true] %s306_s7 }
 0x164   :  { %s6143_s0 = scalar_lea.hbm %s7305_s2, 16 }
 0x165   :  { %p6144_p10 = scmp.ne.s32.totalorder %s7305_s2, %s6143_s0  ;;  %p6147_p11 = scmp.lt.u32.totalorder %s6143_s0, %s7305_s2 }
 0x167   :  { %p6149_p12 = pnand %p6147_p11, %p6144_p10 }
 0x169   :  { %6152 = shalt.err (!%p6149_p12)
}
 0x16a   :  { %s6153_s10 = scalar_lea.vmem %s281_s11, 16  ;;  %s6157_s29 = scalar_lea.vmem %s281_s11, 32 }
 0x16b   :  { %p6154_p13 = scmp.ne.s32.totalorder %s281_s11, %s6153_s10  ;;  %p6158_p0 = scmp.lt.s32.totalorder %s281_s11, %s281_s11 }
 0x16c   :  { %p6159_p1 = scmp.lt.s32.totalorder %s6157_s29, %s6153_s10 }
 0x16e   :  { %p6160_p2 = por %p6159_p1, %p6158_p0 }
 0x170   :  { %p6161_p3 = pnand %p6160_p2, %p6154_p13 }
 0x172   :  { %6164 = shalt.err (!%p6161_p3)
}
 0x173   :  { %283 = dma.hbm_to_vmem [thread:$0]  %s7305_s2, 16, %s281_s11, [#allocation26]  }
 0x174   :  { %s6165_s19 = scalar_lea.hbm %s6428_s9, 64 }
 0x175   :  { %p6166_p4 = scmp.ne.s32.totalorder %s6428_s9, %s6165_s19  ;;  %p6169_p5 = scmp.lt.u32.totalorder %s6165_s19, %s6428_s9 }
 0x177   :  { %p6171_p6 = pnand %p6169_p5, %p6166_p4 }
 0x179   :  { %6174 = shalt.err (!%p6171_p6)
}
 0x17a   :  { %s6175_s15 = scalar_lea.vmem %s307_s7, 64  ;;  %p6180_p8 = scmp.lt.s32.totalorder %s307_s7, %s307_s7 }
 0x17b   :  { %p6176_p7 = scmp.ne.s32.totalorder %s307_s7, %s6175_s15  ;;  %p6181_p9 = scmp.lt.s32.totalorder %s6175_s15, %s6175_s15 }
 0x17d   :  { %p6182_p10 = por %p6181_p9, %p6180_p8 }
 0x17f   :  { %p6183_p11 = pnand %p6182_p10, %p6176_p7 }
 0x181   :  { %6186 = shalt.err (!%p6183_p11)
}
 0x182   :  { %309 = dma.hbm_to_vmem [thread:$0]  %s6428_s9, 64, %s307_s7, [#allocation29]  }
 0x183   :  { %6187 = dma.done.wait [#allocation3], 16  }
 0x184   :  { %6188 = vsyncadd [#allocation3], 4294967280 }
 0x185   :  { %6189 = dma.done.wait [#allocation5], 3088  }
 0x186   :  { %6190 = vsyncadd [#allocation5], 4294964208 }
 0x187   :  { %6191 = dma.done.wait [#allocation8], 64  }
 0x188   :  { %6192 = vsyncadd [#allocation8], 4294967232 }
 0x189   :  { %6193 = dma.done.wait [#allocation11], 32  }
 0x18a   :  { %6194 = vsyncadd [#allocation11], 4294967264 }
 0x18b   :  { %6195 = dma.done.wait [#allocation14], 4160  }
 0x18c   :  { %6196 = vsyncadd [#allocation14], 4294963136 }
 0x18d   :  { %6197 = dma.done.wait [#allocation17], 3088  }
 0x18e   :  { %6198 = vsyncadd [#allocation17], 4294964208 }
 0x18f   :  { %6199 = dma.done.wait [#allocation20], 1072  }
 0x190   :  { %6200 = vsyncadd [#allocation20], 4294966224 }
 0x191   :  { %6201 = dma.done.wait [#allocation23], 4160  }
 0x192   :  { %6202 = vsyncadd [#allocation23], 4294963136 }
 0x193   :  { %6203 = dma.done.wait [#allocation26], 4112  }
 0x194   :  { %6204 = vsyncadd [#allocation26], 4294963184 }
 0x195   :  { %6205 = dma.done.wait [#allocation29], 4160  }
 0x196   :  { %6206 = vsyncadd [#allocation29], 4294963136  ;;  %s7306_s9 = sld [smem:[#allocation41_spill]]  ;;  %v5321_v4 = vld [vmem:[#allocation6 + $0x4] ss:$12 sps:$4 sm:$0xff]   ;;  %v6264_v39 = vmov 0  }
 0x197   :  { %v5323_v5 = vld [vmem:[#allocation6] ss:$12 sps:$4 sm:$0xff]   ;;  %v5324_v6 = vld [vmem:[#allocation6 + $0x1c] ss:$12 sps:$4 sm:$0xff]   ;;  %771 = vmatprep.subr.bf16.mxu0 %v5321_v4  ;;  %v5327_v24 = vld [vmem:[#allocation6 + $0x18] ss:$12 sps:$4 sm:$0xff]   ;;  %803 = vmatprep.mubr.bf16.mxu0 %v6264_v39 }
 0x198   :  { %v5326_v7 = vld [vmem:[#allocation6 + $0x8] ss:$12 sps:$4 sm:$0xff]   ;;  %772 = vmatpush1.bf16.msra.mxu0 %v5323_v5  ;;  %v5330_v26 = vld [vmem:[#allocation6 + $0x20] ss:$12 sps:$4 sm:$0xff]   ;;  %v5331_v27 = vld [vmem:[#allocation6 + $0x30] ss:$12 sps:$4 sm:$0xff]  }
 0x199   :  { %4763 = vmatprep.subr.bf16.mxu1 %v5326_v7  ;;  %773 = vmatprep.subr.bf16.mxu0 %v5324_v6  ;;  %v5328_v25 = vld [vmem:[#allocation6 + $0x34] ss:$12 sps:$4 sm:$0xff]   ;;  %v5332_v28 = vld [vmem:[#allocation6 + $0x4c] ss:$12 sps:$4 sm:$0xff]   ;;  %v5336_v31 = vld [vmem:[#allocation6 + $0x64] ss:$12 sps:$4 sm:$0xff]  }
 0x19a   :  { %4764 = vmatpush3.bf16.msra.mxu1 %v5326_v7  ;;  %v5334_v29 = vld [vmem:[#allocation6 + $0x38] ss:$12 sps:$4 sm:$0xff]   ;;  %v5335_v30 = vld [vmem:[#allocation6 + $0x48] ss:$12 sps:$4 sm:$0xff]   ;;  %v5338_v32 = vld [vmem:[#allocation6 + $0x50] ss:$12 sps:$4 sm:$0xff]  }
 0x19b   :  { %4765 = vmatprep.subr.bf16.mxu1 %v5330_v26  ;;  %v5339_v33 = vld [vmem:[#allocation6 + $0x60] ss:$12 sps:$4 sm:$0xff]   ;;  %v5340_v34 = vld [vmem:[#allocation6 + $0x7c] ss:$12 sps:$4 sm:$0xff]   ;;  %v5343_v36 = vld [vmem:[#allocation6 + $0x78] ss:$12 sps:$4 sm:$0xff]  }
 0x19c   :  { %v404_v0 = vld [vmem:[%s7306_s9] sm:$0xff]  ;;  %v406_v1 = vld [vmem:[%s7306_s9 + $0x10] sm:$0xff]  ;;  %v405_v2 = vld [vmem:[%s7306_s9 + $0x8] sm:$0xff]  ;;  %774 = vmatpush1.bf16.msra.mxu0 %v5327_v24  ;;  %s7307_s14 = sld [smem:[#allocation44_spill]]  ;;  %s7308_s16 = sld [smem:[#allocation42_spill]] }
 0x19d   :  { %560 = vadd.xlane.f32.xlu0 %v404_v0  ;;  %564 = vadd.xlane.f32.xlu1 %v406_v1  ;;  %v407_v3 = vld [vmem:[%s7306_s9 + $0x18] sm:$0xff]  ;;  %v5346_v38 = vld [vmem:[#allocation6 + $0x80] ss:$12 sps:$4 sm:$0xff]   ;;  %v5347_v40 = vld [vmem:[#allocation6 + $0x90] ss:$12 sps:$4 sm:$0xff]   ;;  %s7309_s13 = sld [smem:[#allocation43_spill]] }
 0x19e   :  { %775 = vmatprep.subr.bf16.mxu0 %v5328_v25  ;;  %4766 = vmatpush3.bf16.msra.mxu1 %v5330_v26  ;;  %v5342_v35 = vld [vmem:[#allocation6 + $0x68] ss:$12 sps:$4 sm:$0xff]   ;;  %v5348_v41 = vld [vmem:[#allocation6 + $0xac] ss:$12 sps:$4 sm:$0xff]   ;;  %v5352_v44 = vld [vmem:[#allocation6 + $0xb0] ss:$12 sps:$4 sm:$0xff]  }
 0x19f   :  { %4767 = vmatprep.subr.bf16.mxu1 %v5334_v29  ;;  %v5344_v37 = vld [vmem:[#allocation6 + $0x94] ss:$12 sps:$4 sm:$0xff]   ;;  %v5350_v42 = vld [vmem:[#allocation6 + $0x98] ss:$12 sps:$4 sm:$0xff]   ;;  %v4253_v62 = vld [vmem:[#allocation2] ss:$0 sm:$0xff] }
 0x1a0   :  { %776 = vmatpush1.bf16.msra.mxu0 %v5331_v27  ;;  %v5351_v43 = vld [vmem:[#allocation6 + $0xa8] ss:$12 sps:$4 sm:$0xff]   ;;  %s7310_s18 = sld [smem:[#allocation45_spill]]  ;;  %s7311_s6 = sld [smem:[#allocation46_spill]] }
 0x1a1   :  { %562 = vadd.xlane.f32.xlu0 %v405_v2  ;;  %566 = vadd.xlane.f32.xlu1 %v407_v3  ;;  %s7312_s22 = sld [smem:[#allocation47_spill]]  ;;  %s7313_s24 = sld [smem:[#allocation48_spill]] }
 0x1a2   :  { %777 = vmatprep.subr.bf16.mxu0 %v5332_v28  ;;  %4768 = vmatpush3.bf16.msra.mxu1 %v5334_v29  ;;  %v388_v45 = vld [vmem:[%s7307_s14] sm:$0xff]  ;;  %v389_v46 = vld [vmem:[%s7307_s14 + $0x8] sm:$0xff]  ;;  %v398_v28 = vld [vmem:[%s7307_s14 + $0x50] sm:$0xff]  ;;  %s7314_s25 = sld [smem:[#allocation50_spill]]  ;;  %s7315_s23 = sld [smem:[#allocation51_spill]] }
 0x1a3   :  { %4769 = vmatprep.subr.bf16.mxu1 %v5338_v32  ;;  %v6555_v47 = vpack.c.bf16 %v389_v46, %v388_v45  ;;  %v396_v25 = vld [vmem:[%s7307_s14 + $0x40] sm:$0xff]  ;;  %v397_v26 = vld [vmem:[%s7307_s14 + $0x48] sm:$0xff]  ;;  %v399_v29 = vld [vmem:[%s7307_s14 + $0x58] sm:$0xff]  ;;  %s7316_s12 = sld [smem:[#allocation52_spill]]  ;;  %s7317_s20 = sld [smem:[#allocation55_spill]] }
 0x1a4   :  { %778 = vmatpush1.bf16.msra.mxu0 %v5335_v30  ;;  %v6584_v27 = vpack.c.bf16 %v397_v26, %v396_v25  ;;  %v6590_v30 = vpack.c.bf16 %v399_v29, %v398_v28  ;;  %v375_v25 = vld [vmem:[%s7308_s16 + $0x38] sm:$0xff] }
 0x1a5   :  { %779 = vmatprep.subr.bf16.mxu0 %v5336_v31  ;;  %v400_v31 = vld [vmem:[%s7307_s14 + $0x60] sm:$0xff] }
 0x1a6   :  { %4770 = vmatpush3.bf16.msra.mxu1 %v5338_v32  ;;  %v401_v32 = vld [vmem:[%s7307_s14 + $0x68] sm:$0xff] }
 0x1a7   :  { %4771 = vmatprep.subr.bf16.mxu1 %v5342_v35 }
 0x1a8   :  { %780 = vmatpush1.bf16.msra.mxu0 %v5339_v33  ;;  %v6596_v33 = vpack.c.bf16 %v401_v32, %v400_v31  ;;  %v374_v31 = vld [vmem:[%s7308_s16 + $0x30] sm:$0xff] }
 0x1a9   :  { %781 = vmatprep.subr.bf16.mxu0 %v5340_v34  ;;  %v402_v34 = vld [vmem:[%s7307_s14 + $0x70] sm:$0xff] }
 0x1aa   :  { %4772 = vmatpush3.bf16.msra.mxu1 %v5342_v35  ;;  %v403_v35 = vld [vmem:[%s7307_s14 + $0x78] sm:$0xff] }
 0x1ab   :  { %4773 = vmatprep.subr.bf16.mxu1 %v5346_v38 }
 0x1ac   :  { %782 = vmatpush1.bf16.msra.mxu0 %v5343_v36  ;;  %v6602_v36 = vpack.c.bf16 %v403_v35, %v402_v34 }
 0x1ad   :  { %783 = vmatprep.subr.bf16.mxu0 %v5344_v37  ;;  %v628_v37 = vlaneseq }
 0x1ae   :  { %4774 = vmatpush3.bf16.msra.mxu1 %v5346_v38 }
 0x1af   :  { %4775 = vmatprep.subr.bf16.mxu1 %v5350_v42  ;;  %v6606_v38 = vshrl.u32 %v628_v37, 7 }
 0x1b0   :  { %784 = vmatpush1.bf16.msra.mxu0 %v5347_v40 }
 0x1b1   :  { %785 = vmatprep.subr.bf16.mxu0 %v5348_v41  ;;  %v6609_v40 = vsub.s32 0, %v6606_v38  ;;  %v442_v41 = vld [vmem:[#allocation7] sm:$0x7] }
 0x1b2   :  { %4776 = vmatpush3.bf16.msra.mxu1 %v5350_v42  ;;  %v6612_v42 = vsub.s32 1, %v6606_v38 }
 0x1b3   :  { %4777 = vmatprep.subr.bf16.mxu1 %v5352_v44 }
 0x1b4   :  { %786 = vmatpush1.bf16.msra.mxu0 %v5351_v43  ;;  %v631_v43 = vrot.slane %v442_v41, %v6609_v40  ;;  %v635_v45 = vrot.slane %v442_v41, %v6612_v42 }
 0x1b6   :  { %4778 = vmatpush3.bf16.msra.mxu1 %v5352_v44  ;;  %v6616_v44 = vsub.s32 2, %v6606_v38 }
 0x1b7   :  { %5104 = vmatprep.subr.bf16.mxu1 %v6555_v47 }
 0x22a   :  { %v561_v8 = vpop.xlane.xlu0 %560  ;;  %v565_v9 = vpop.xlane.xlu1 %564 }
 0x22b   :  { %v569_v10 = vmul.f32 0.0078125, %v561_v8  ;;  %v571_v11 = vmul.f32 0.0078125, %v565_v9 }
 0x22d   :  { %v6536_v12 = vsub.f32 %v404_v0, %v569_v10  ;;  %v6538_v13 = vsub.f32 %v406_v1, %v571_v11 }
 0x22e   :  { %v563_v14 = vpop.xlane.xlu0 %562  ;;  %v567_v15 = vpop.xlane.xlu1 %566 }
 0x22f   :  { %v570_v16 = vmul.f32 0.0078125, %v563_v14  ;;  %v577_v17 = vmul.f32 %v6536_v12, %v6536_v12  ;;  %v572_v18 = vmul.f32 0.0078125, %v567_v15  ;;  %v579_v21 = vmul.f32 %v6538_v13, %v6538_v13  ;;  %v390_v14 = vld [vmem:[%s7307_s14 + $0x10] sm:$0xff]  ;;  %v391_v15 = vld [vmem:[%s7307_s14 + $0x18] sm:$0xff] }
 0x231   :  { %v6542_v19 = vsub.f32 %v405_v2, %v570_v16  ;;  %581 = vadd.xlane.f32.xlu0 %v577_v17  ;;  %v6544_v20 = vsub.f32 %v407_v3, %v572_v18  ;;  %v4254_v3 = vld [vmem:[#allocation4] ss:$0 sm:$0xff]  ;;  %v6565_v18 = vpack.c.bf16 %v391_v15, %v390_v14 }
 0x233   :  { %v578_v22 = vmul.f32 %v6542_v19, %v6542_v19  ;;  %v580_v23 = vmul.f32 %v6544_v20, %v6544_v20 }
 0x235   :  { %585 = vadd.xlane.f32.xlu0 %v579_v21  ;;  %583 = vadd.xlane.f32.xlu1 %v578_v22  ;;  %v394_v22 = vld [vmem:[%s7307_s14 + $0x30] sm:$0xff] }
 0x239   :  { %587 = vadd.xlane.f32.xlu1 %v580_v23  ;;  %v395_v23 = vld [vmem:[%s7307_s14 + $0x38] sm:$0xff] }
 0x23a   :  { %v6577_v24 = vpack.c.bf16 %v395_v23, %v394_v22 }
 0x2be   :  { %v582_v48 = vpop.xlane.xlu0 %581 }
 0x2bf   :  { %v589_v49 = vmul.f32 0.0078125, %v582_v48 }
 0x2c1   :  { %v593_v50 = vadd.f32 1e-05, %v589_v49 }
 0x2c2   :  { %v584_v51 = vpop.xlane.xlu1 %583  ;;  %v586_v52 = vpop.xlane.xlu0 %585 }
 0x2c3   :  { %5609 = vrsqrt.f32 %v593_v50  ;;  %v590_v53 = vmul.f32 0.0078125, %v584_v51  ;;  %v591_v54 = vmul.f32 0.0078125, %v586_v52  ;;  %v639_v50 = vrot.slane %v442_v41, %v6616_v44 }
 0x2c5   :  { %v594_v55 = vadd.f32 1e-05, %v590_v53  ;;  %v595_v56 = vadd.f32 1e-05, %v591_v54  ;;  %v368_v53 = vld [vmem:[%s7308_s16] sm:$0xff] }
 0x2c6   :  { %v588_v57 = vpop.xlane.xlu1 %587  ;;  %v372_v54 = vld [vmem:[%s7308_s16 + $0x20] sm:$0xff] }
 0x2c7   :  { %5611 = vrsqrt.f32 %v594_v55  ;;  %v592_v58 = vmul.f32 0.0078125, %v588_v57 }
 0x2c8   :  { %5613 = vrsqrt.f32 %v595_v56 }
 0x2c9   :  { %v596_v59 = vadd.f32 1e-05, %v592_v58  ;;  %v369_v58 = vld [vmem:[%s7308_s16 + $0x8] sm:$0xff] }
 0x2cb   :  { %5615 = vrsqrt.f32 %v596_v59  ;;  %v373_v59 = vld [vmem:[%s7308_s16 + $0x28] sm:$0xff] }
 0x2cd   :  { %v5610_v60 = vpop.eup %5609 }
 0x2ce   :  { %v601_v61 = vmul.f32 %v5610_v60, %v6536_v12  ;;  %v6627_v60 = vld [vmem:[%s7308_s16 + $0x48] sm:$0xff] }
 0x2d0   :  { %v611_v2 = vmul.f32 %v4253_v62, %v601_v61 }
 0x2d1   :  { %v5612_v63 = vpop.eup %5611 }
 0x2d2   :  { %v5614_v0 = vpop.eup %5613  ;;  %v602_v1 = vmul.f32 %v5612_v63, %v6542_v19  ;;  %v621_v7 = vadd.f32 %v4254_v3, %v611_v2  ;;  %v392_v19 = vld [vmem:[%s7307_s14 + $0x20] sm:$0xff] }
 0x2d3   :  { %v603_v4 = vmul.f32 %v5614_v0, %v6538_v13  ;;  %v376_v63 = vld [vmem:[%s7308_s16 + $0x40] sm:$0xff] }
 0x2d4   :  { %v612_v5 = vmul.f32 %v4253_v62, %v602_v1  ;;  %v6631_v0 = vld [vmem:[%s7308_s16 + $0x60] sm:$0xff]  ;;  %v6634_v1 = vld [vmem:[%s7308_s16 + $0x68] sm:$0xff] }
 0x2d5   :  { %v5616_v6 = vpop.eup %5615  ;;  %v613_v10 = vmul.f32 %v4253_v62, %v603_v4 }
 0x2d6   :  { %v622_v8 = vadd.f32 %v4254_v3, %v612_v5  ;;  %v604_v9 = vmul.f32 %v5616_v6, %v6544_v20  ;;  %v393_v20 = vld [vmem:[%s7307_s14 + $0x28] sm:$0xff]  ;;  %v370_v5 = vld [vmem:[%s7308_s16 + $0x10] sm:$0xff] }
 0x2d7   :  { %v623_v16 = vadd.f32 %v4254_v3, %v613_v10  ;;  %v6571_v21 = vpack.c.bf16 %v393_v20, %v392_v19  ;;  %v371_v10 = vld [vmem:[%s7308_s16 + $0x18] sm:$0xff] }
 0x2d8   :  { %v625_v11 = vpack.c.bf16 %v622_v8, %v621_v7  ;;  %v614_v12 = vmul.f32 %v4253_v62, %v604_v9 }
 0x2da   :  { %804 = vmatmul.mubr.bf16.vlgmr.msra.gmra.mrb[0].mxu0 %v625_v11  ;;  %4779 = vmatprep.mubr.bf16.mxu1 %v625_v11  ;;  %v624_v17 = vadd.f32 %v4254_v3, %v614_v12 }
 0x2db   :  { %813 = vmatprep.mubr.bf16.mxu0 %v6264_v39 }
 0x2dc   :  { %v626_v13 = vpack.c.bf16 %v624_v17, %v623_v16 }
 0x2de   :  { %4780 = vmatmul.mubr.bf16.vlgmr.msra.gmra.mrb[0].mxu1 %v626_v13 }
 0x2df   :  { %5106 = vmatpush3.bf16.msra.mxu1 %v6555_v47 }
 0x2e0   :  { %5108 = vmatprep.subr.bf16.mxu1 %v6565_v18 }
 0x2e2   :  { %814 = vmatmul.mubr.bf16.gmra.mrb[4].mxu0 %v626_v13 }
 0x2e3   :  { %5110 = vmatpush3.bf16.msra.mxu1 %v6565_v18 }
 0x2e4   :  { %5112 = vmatprep.subr.bf16.mxu1 %v6571_v21 }
 0x2e7   :  { %5114 = vmatpush3.bf16.msra.mxu1 %v6571_v21 }
 0x2e8   :  { %5116 = vmatprep.subr.bf16.mxu1 %v6577_v24 }
 0x2eb   :  { %5118 = vmatpush3.bf16.msra.mxu1 %v6577_v24 }
 0x2ec   :  { %5120 = vmatprep.subr.bf16.mxu1 %v6584_v27 }
 0x2ef   :  { %5122 = vmatpush3.bf16.msra.mxu1 %v6584_v27 }
 0x2f0   :  { %5124 = vmatprep.subr.bf16.mxu1 %v6590_v30 }
 0x2f3   :  { %5126 = vmatpush3.bf16.msra.mxu1 %v6590_v30 }
 0x2f4   :  { %5128 = vmatprep.subr.bf16.mxu1 %v6596_v33 }
 0x2f7   :  { %5130 = vmatpush3.bf16.msra.mxu1 %v6596_v33 }
 0x2f8   :  { %5132 = vmatprep.subr.bf16.mxu1 %v6602_v36 }
 0x2fb   :  { %5134 = vmatpush3.bf16.msra.mxu1 %v6602_v36 }
 0x3ad   :  { %v805_v46 = vpop.f32.mrb[0].mxu0 }
 0x3ae   :  { %v806_v48 = vadd.f32 %v805_v46, %v631_v43  ;;  %v807_v49 = vpop.f32.mrb[1].mxu0 }
 0x3af   :  { %v808_v51 = vadd.f32 %v807_v49, %v635_v45  ;;  %v809_v52 = vpop.f32.mrb[2].mxu0 }
 0x3b0   :  { %v873_v55 = vmul.f32 0.17677669, %v806_v48  ;;  %v6622_v56 = vadd.f32 %v809_v52, %v631_v43  ;;  %v811_v57 = vpop.f32.mrb[3].mxu0 }
 0x3b1   :  { %v812_v61 = vadd.f32 %v811_v57, %v635_v45  ;;  %v4781_v62 = vpop.f32.mrb[0].mxu1  ;;  %v877_v4 = vmul.f32 %v808_v51, %v368_v53  ;;  %v881_v6 = vmul.f32 %v808_v51, %v372_v54  ;;  %v885_v16 = vmul.f32 %v808_v51, %v376_v63 }
 0x3b2   :  { %v6636_v2 = vadd.f32 %v4781_v62, %v639_v50  ;;  %v858_v3 = vpop.f32.mrb[1].mxu1  ;;  %4815 = vmatprep.mubr.f32.mxu0 %v873_v55  ;;  %v889_v17 = vmul.f32 %v808_v51, %v6631_v0 }
 0x3b3   :  { %v859_v7 = vadd.f32 %v858_v3, %v639_v50  ;;  %v4782_v8 = vpop.f32.mrb[2].mxu1  ;;  %v878_v9 = vmul.f32 %v812_v61, %v369_v58  ;;  %v882_v11 = vmul.f32 %v812_v61, %v373_v59  ;;  %v886_v12 = vmul.f32 %v812_v61, %v6627_v60 }
 0x3b4   :  { %v870_v14 = vadd.f32 %v4782_v8, %v639_v50  ;;  %v861_v15 = vpop.f32.mrb[3].mxu1  ;;  %v890_v13 = vmul.f32 %v812_v61, %v6634_v1  ;;  %v895_v26 = vmul.f32 %v6636_v2, %v370_v5  ;;  %v899_v8 = vmul.f32 %v6636_v2, %v374_v31 }
 0x3b5   :  { %v862_v19 = vadd.f32 %v861_v15, %v639_v50  ;;  %v815_v20 = vpop.f32.mrb[4].mxu0  ;;  %v5071_v22 = vpack.c.bf16 %v878_v9, %v877_v4  ;;  %v5079_v23 = vpack.c.bf16 %v882_v11, %v881_v6  ;;  %v5087_v32 = vpack.c.bf16 %v886_v12, %v885_v16  ;;  %v378_v4 = vld [vmem:[%s7308_s16 + $0x50] sm:$0xff]  ;;  %v379_v9 = vld [vmem:[%s7308_s16 + $0x58] sm:$0xff] }
 0x3b6   :  { %v6645_v28 = vadd.f32 %v815_v20, %v631_v43  ;;  %v817_v29 = vpop.f32.mrb[5].mxu0  ;;  %v5095_v34 = vpack.c.bf16 %v890_v13, %v889_v17  ;;  %v896_v35 = vmul.f32 %v870_v14, %v371_v10  ;;  %v893_v46 = vmul.f32 %v859_v7, %v368_v53  ;;  %v382_v6 = vld [vmem:[%s7308_s16 + $0x70] sm:$0xff] }
 0x3b7   :  { %v818_v37 = vadd.f32 %v817_v29, %v635_v45  ;;  %v819_v41 = vpop.f32.mrb[6].mxu0  ;;  %5072 = vmatprep.subr.bf16.mxu0 %v5071_v22  ;;  %v894_v48 = vmul.f32 %v862_v19, %v369_v58  ;;  %v898_v49 = vmul.f32 %v862_v19, %v373_v59  ;;  %v897_v55 = vmul.f32 %v859_v7, %v372_v54  ;;  %v383_v59 = vld [vmem:[%s7308_s16 + $0x78] sm:$0xff] }
 0x3b8   :  { %v820_v50 = vadd.f32 %v819_v41, %v631_v43  ;;  %v821_v51 = vpop.f32.mrb[7].mxu0  ;;  %5074 = vmatpush3.bf16.xpose.msra.mxu0 %v5071_v22  ;;  %v6648_v52 = vpack.c.bf16 %v896_v35, %v895_v26  ;;  %v900_v57 = vmul.f32 %v870_v14, %v375_v25  ;;  %v902_v17 = vmul.f32 %v862_v19, %v6627_v60 }
 0x3b9   :  { %v822_v61 = vadd.f32 %v821_v51, %v635_v45  ;;  %v6650_v62 = vpack.c.bf16 %v894_v48, %v893_v46  ;;  %v879_v3 = vmul.f32 %v818_v37, %v370_v5  ;;  %v883_v53 = vmul.f32 %v818_v37, %v374_v31 }
 0x3ba   :  { %v887_v58 = vmul.f32 %v818_v37, %v378_v4  ;;  %v891_v11 = vmul.f32 %v818_v37, %v382_v6  ;;  %v6657_v43 = vpack.c.bf16 %v898_v49, %v897_v55  ;;  %v6660_v16 = vpack.c.bf16 %v900_v57, %v899_v8  ;;  %v387_v49 = vld [vmem:[%s7309_s13 + $0x18] sm:$0xff] }
 0x3bb   :  { %5136 = vmatprep.subr.bf16.mxu1 %v6650_v62  ;;  %v880_v12 = vmul.f32 %v822_v61, %v371_v10  ;;  %v884_v54 = vmul.f32 %v822_v61, %v375_v25  ;;  %v888_v15 = vmul.f32 %v822_v61, %v379_v9  ;;  %v892_v45 = vmul.f32 %v822_v61, %v383_v59 }
 0x3bc   :  { %v901_v5 = vmul.f32 %v859_v7, %v376_v63  ;;  %v903_v13 = vmul.f32 %v6636_v2, %v378_v4  ;;  %v904_v35 = vmul.f32 %v870_v14, %v379_v9  ;;  %v905_v37 = vmul.f32 %v859_v7, %v6631_v0  ;;  %v385_v7 = vld [vmem:[%s7309_s13 + $0x8] sm:$0xff] }
 0x3bd   :  { %v5075_v20 = vpack.c.bf16 %v880_v12, %v879_v3  ;;  %v5083_v22 = vpack.c.bf16 %v884_v54, %v883_v53  ;;  %v5091_v26 = vpack.c.bf16 %v888_v15, %v887_v58  ;;  %v5099_v29 = vpack.c.bf16 %v892_v45, %v891_v11 }
 0x3be   :  { %v6664_v31 = vpack.c.bf16 %v902_v17, %v901_v5  ;;  %v906_v10 = vmul.f32 %v862_v19, %v6634_v1  ;;  %v907_v25 = vmul.f32 %v6636_v2, %v382_v6  ;;  %v908_v41 = vmul.f32 %v870_v14, %v383_v59  ;;  %v384_v14 = vld [vmem:[%s7309_s13] sm:$0xff]  ;;  %v5358_v17 = vld [vmem:[%s7310_s18 + $0x28] sm:$0xff]  }
 0x3bf   :  { %5076 = vmatprep.subr.bf16.mxu0 %v5075_v20  ;;  %v6669_v63 = vpack.c.bf16 %v904_v35, %v903_v13  ;;  %v874_v0 = vmul.f32 0.17677669, %v6622_v56  ;;  %v875_v1 = vmul.f32 0.17677669, %v6645_v28  ;;  %v876_v2 = vmul.f32 0.17677669, %v820_v50 }
 0x3c0   :  { %5078 = vmatpush3.bf16.xpose.msra.mxu0 %v5075_v20  ;;  %v6671_v60 = vpack.c.bf16 %v906_v10, %v905_v37  ;;  %v6673_v46 = vpack.c.bf16 %v908_v41, %v907_v25  ;;  %v5357_v5 = vld [vmem:[%s7310_s18 + $0x20] sm:$0xff]  }
 0x3c1   :  { %5080 = vmatprep.subr.bf16.mxu0 %v5079_v23 }
 0x3c8   :  { %5082 = vmatpush3.bf16.xpose.msra.mxu0 %v5079_v23 }
 0x3c9   :  { %5084 = vmatprep.subr.bf16.mxu0 %v5083_v22 }
 0x3d0   :  { %5086 = vmatpush3.bf16.xpose.msra.mxu0 %v5083_v22 }
 0x3d1   :  { %5088 = vmatprep.subr.bf16.mxu0 %v5087_v32 }
 0x3d8   :  { %5090 = vmatpush3.bf16.xpose.msra.mxu0 %v5087_v32 }
 0x3d9   :  { %5092 = vmatprep.subr.bf16.mxu0 %v5091_v26 }
 0x3e0   :  { %5094 = vmatpush3.bf16.xpose.msra.mxu0 %v5091_v26 }
 0x3e1   :  { %5096 = vmatprep.subr.bf16.mxu0 %v5095_v34 }
 0x3e8   :  { %5098 = vmatpush3.bf16.xpose.msra.mxu0 %v5095_v34  ;;  %v386_v34 = vld [vmem:[%s7309_s13 + $0x10] sm:$0xff] }
 0x3e9   :  { %5100 = vmatprep.subr.bf16.mxu0 %v5099_v29 }
 0x3f0   :  { %5102 = vmatpush3.bf16.xpose.msra.mxu0 %v5099_v29 }
 0x3f7   :  { %4816 = vmatmul.mubr.f32.vlgmr.msra.gmra.mrb[8].mxu0 %v874_v0 }
 0x3f8   :  { %4818 = vmatprep.mubr.f32.mxu0 %v875_v1 }
 0x3fb   :  { %4819 = vmatmul.mubr.f32.gmra.mrb[10].mxu0 %v876_v2 }
 0x4ca   :  { %v4817_v19 = vpop.f32.mrb[8].mxu0 }
 0x4cb   :  { %v981_v23 = vadd.f32 %v4817_v19, %v385_v7  ;;  %v975_v32 = vpop.f32.mrb[9].mxu0 }
 0x4cc   :  { %v976_v48 = vadd.f32 %v975_v32, %v384_v14 }
 0x4cd   :  { %996 = vmax.xlane.f32.xlu1 %v981_v23 }
 0x4ce   :  { %v4820_v51 = vpop.f32.mrb[10].mxu0  ;;  %994 = vmax.xlane.f32.xlu0 %v976_v48 }
 0x4cf   :  { %v991_v55 = vadd.f32 %v4820_v51, %v387_v49  ;;  %v985_v57 = vpop.f32.mrb[11].mxu0 }
 0x4d0   :  { %v986_v56 = vadd.f32 %v985_v57, %v386_v34  ;;  %v5745_v57 = vld [vmem:[%s7306_s9] sm:$0xff] }
 0x4d1   :  { %1000 = vmax.xlane.f32.xlu1 %v991_v55 }
 0x4d2   :  { %998 = vmax.xlane.f32.xlu0 %v986_v56 }
 0x55a   :  { %v997_v28 = vpop.xlane.xlu1 %996 }
 0x55b   :  { %v1003_v61 = vsub.f32 %v981_v23, %v997_v28  ;;  %v995_v50 = vpop.xlane.xlu0 %994  ;;  %v4279_v23 = vld [vmem:[#allocation9] ss:$0 sm:$0xff] }
 0x55c   :  { %v1002_v3 = vsub.f32 %v976_v48, %v995_v50  ;;  %v5746_v50 = vld [vmem:[%s7306_s9 + $0x8] sm:$0xff] }
 0x55d   :  { %v1008_v4 = vmul.f32 1.442695, %v1003_v61 }
 0x55e   :  { %v1006_v6 = vmul.f32 1.442695, %v1002_v3  ;;  %v1001_v8 = vpop.xlane.xlu1 %1000 }
 0x55f   :  { %v1005_v53 = vsub.f32 %v991_v55, %v1001_v8  ;;  %v999_v9 = vpop.xlane.xlu0 %998  ;;  %v5748_v8 = vld [vmem:[%s7306_s9 + $0x18] sm:$0xff] }
 0x560   :  { %5617 = vpow2.f32 %v1006_v6  ;;  %v1004_v58 = vsub.f32 %v986_v56, %v999_v9  ;;  %v5361_v9 = vld [vmem:[%s7311_s6] ss:$16 sps:$4 sm:$0xff]  }
 0x561   :  { %5619 = vpow2.f32 %v1008_v4  ;;  %v1012_v59 = vmul.f32 1.442695, %v1005_v53  ;;  %v5747_v4 = vld [vmem:[%s7306_s9 + $0x10] sm:$0xff] }
 0x562   :  { %v1010_v11 = vmul.f32 1.442695, %v1004_v58  ;;  %v5363_v58 = vld [vmem:[%s7311_s6 + $0x4] ss:$16 sps:$4 sm:$0xff]  }
 0x564   :  { %5621 = vpow2.f32 %v1010_v11  ;;  %v5366_v11 = vld [vmem:[%s7311_s6 + $0xc] ss:$16 sps:$4 sm:$0xff]  }
 0x565   :  { %5623 = vpow2.f32 %v1012_v59  ;;  %v5364_v59 = vld [vmem:[%s7311_s6 + $0x8] ss:$16 sps:$4 sm:$0xff]  }
 0x56a   :  { %v5618_v12 = vpop.eup %5617 }
 0x56b   :  { %v5620_v54 = vpop.eup %5619  ;;  %4853 = vmatprep.mubr.f32.mxu1 %v5618_v12 }
 0x56c   :  { %4854 = vmatmul.mubr.f32.vlgmr.msra.gmra.mrb[4].mxu1 %v5620_v54 }
 0x56d   :  { %5138 = vmatpush3.bf16.msra.mxu1 %v6650_v62  ;;  %v5354_v62 = vld [vmem:[%s7310_s18 + $0x8] sm:$0xff]  }
 0x56e   :  { %v5622_v15 = vpop.eup %5621  ;;  %5140 = vmatprep.subr.bf16.mxu1 %v6648_v52 }
 0x56f   :  { %v5624_v45 = vpop.eup %5623  ;;  %4856 = vmatprep.mubr.f32.mxu1 %v5622_v15 }
 0x570   :  { %4857 = vmatmul.mubr.f32.gmra.mrb[6].mxu1 %v5624_v45 }
 0x571   :  { %5142 = vmatpush3.bf16.msra.mxu1 %v6648_v52  ;;  %v5353_v52 = vld [vmem:[%s7310_s18] sm:$0xff]  }
 0x572   :  { %5144 = vmatprep.subr.bf16.mxu1 %v6657_v43  ;;  %4897 = vmatprep.subr.bf16.mxu0 %v5353_v52 }
 0x573   :  { %4898 = vmatpush3.bf16.msra.mxu0 %v5353_v52 }
 0x574   :  { %4899 = vmatprep.subr.bf16.mxu0 %v5354_v62 }
 0x575   :  { %5146 = vmatpush3.bf16.msra.mxu1 %v6657_v43  ;;  %v5355_v43 = vld [vmem:[%s7310_s18 + $0x10] sm:$0xff]  }
 0x576   :  { %5148 = vmatprep.subr.bf16.mxu1 %v6660_v16 }
 0x577   :  { %4900 = vmatpush3.bf16.msra.mxu0 %v5354_v62 }
 0x578   :  { %4901 = vmatprep.subr.bf16.mxu0 %v5355_v43 }
 0x579   :  { %5150 = vmatpush3.bf16.msra.mxu1 %v6660_v16  ;;  %v5356_v16 = vld [vmem:[%s7310_s18 + $0x18] sm:$0xff]  }
 0x57a   :  { %5152 = vmatprep.subr.bf16.mxu1 %v6664_v31 }
 0x57b   :  { %4902 = vmatpush3.bf16.msra.mxu0 %v5355_v43 }
 0x57c   :  { %4903 = vmatprep.subr.bf16.mxu0 %v5356_v16 }
 0x57d   :  { %5154 = vmatpush3.bf16.msra.mxu1 %v6664_v31 }
 0x57e   :  { %5156 = vmatprep.subr.bf16.mxu1 %v6669_v63 }
 0x57f   :  { %4904 = vmatpush3.bf16.msra.mxu0 %v5356_v16 }
 0x580   :  { %4905 = vmatprep.subr.bf16.mxu0 %v5357_v5 }
 0x581   :  { %5158 = vmatpush3.bf16.msra.mxu1 %v6669_v63 }
 0x582   :  { %5160 = vmatprep.subr.bf16.mxu1 %v6671_v60 }
 0x583   :  { %4906 = vmatpush3.bf16.msra.mxu0 %v5357_v5 }
 0x584   :  { %4907 = vmatprep.subr.bf16.mxu0 %v5358_v17 }
 0x585   :  { %5162 = vmatpush3.bf16.msra.mxu1 %v6671_v60  ;;  %v5359_v60 = vld [vmem:[%s7310_s18 + $0x30] sm:$0xff]  }
 0x586   :  { %5164 = vmatprep.subr.bf16.mxu1 %v6673_v46 }
 0x587   :  { %4908 = vmatpush3.bf16.msra.mxu0 %v5358_v17 }
 0x588   :  { %4909 = vmatprep.subr.bf16.mxu0 %v5359_v60 }
 0x589   :  { %5166 = vmatpush3.bf16.msra.mxu1 %v6673_v46  ;;  %v5360_v46 = vld [vmem:[%s7310_s18 + $0x38] sm:$0xff]  }
 0x58a   :  { %1548 = vmatprep.subr.bf16.mxu1 %v5363_v58 }
 0x58b   :  { %4910 = vmatpush3.bf16.msra.mxu0 %v5359_v60  ;;  %v5373_v60 = vld [vmem:[%s7311_s6 + $0x40] ss:$16 sps:$4 sm:$0xff]  }
 0x58c   :  { %4911 = vmatprep.subr.bf16.mxu0 %v5360_v46 }
 0x58f   :  { %4912 = vmatpush3.bf16.msra.mxu0 %v5360_v46  ;;  %v5376_v46 = vld [vmem:[%s7311_s6 + $0x48] ss:$16 sps:$4 sm:$0xff]  }
 0x590   :  { %1601 = vmatprep.subr.bf16.mxu0 %v5366_v11 }
 0x63f   :  { %v4855_v13 = vpop.f32.mrb[4].mxu1 }
 0x640   :  { %5625 = vrcp.f32 %v4855_v13  ;;  %v1080_v20 = vpop.f32.mrb[5].mxu1 }
 0x641   :  { %5627 = vrcp.f32 %v1080_v20 }
 0x643   :  { %v4858_v22 = vpop.f32.mrb[6].mxu1 }
 0x644   :  { %5629 = vrcp.f32 %v4858_v22  ;;  %v1090_v26 = vpop.f32.mrb[7].mxu1 }
 0x645   :  { %5631 = vrcp.f32 %v1090_v26 }
 0x64a   :  { %v5626_v29 = vpop.eup %5625 }
 0x64b   :  { %v5628_v31 = vpop.eup %5627  ;;  %v1102_v37 = vmul.f32 %v5626_v29, %v5620_v54  ;;  %v5372_v54 = vld [vmem:[%s7311_s6 + $0x2c] ss:$16 sps:$4 sm:$0xff]  }
 0x64c   :  { %v1100_v35 = vmul.f32 %v5628_v31, %v5618_v12  ;;  %v5369_v12 = vld [vmem:[%s7311_s6 + $0x24] ss:$16 sps:$4 sm:$0xff]  }
 0x64e   :  { %v5630_v10 = vpop.eup %5629  ;;  %4891 = vmatprep.mubr.f32.mxu1 %v1100_v35 }
 0x64f   :  { %v5632_v25 = vpop.eup %5631  ;;  %4892 = vmatmul.mubr.f32.vlgmr.msra.gmra.mrb[8].mxu1 %v1102_v37  ;;  %v1106_v63 = vmul.f32 %v5630_v10, %v5624_v45  ;;  %v5370_v45 = vld [vmem:[%s7311_s6 + $0x28] ss:$16 sps:$4 sm:$0xff]  }
 0x650   :  { %v1104_v41 = vmul.f32 %v5632_v25, %v5622_v15  ;;  %1549 = vmatpush1.bf16.msra.mxu1 %v5361_v9  ;;  %v5367_v15 = vld [vmem:[%s7311_s6 + $0x20] ss:$16 sps:$4 sm:$0xff]   ;;  %v5406_v9 = vld [vmem:[%s7311_s6 + $0xe8] ss:$16 sps:$4 sm:$0xff]  }
 0x651   :  { %1550 = vmatprep.subr.bf16.mxu1 %v5369_v12 }
 0x652   :  { %4894 = vmatprep.mubr.f32.mxu1 %v1104_v41  ;;  %v5375_v41 = vld [vmem:[%s7311_s6 + $0x44] ss:$16 sps:$4 sm:$0xff]  }
 0x653   :  { %4895 = vmatmul.mubr.f32.gmra.mrb[10].mxu1 %v1106_v63  ;;  %v5378_v63 = vld [vmem:[%s7311_s6 + $0x4c] ss:$16 sps:$4 sm:$0xff]  }
 0x654   :  { %1580 = vmatprep.mubr.bf16.mxu1 %v6264_v39  ;;  %1551 = vmatpush1.bf16.msra.mxu1 %v5367_v15 }
 0x655   :  { %1552 = vmatprep.subr.bf16.mxu1 %v5375_v41  ;;  %v4289_v41 = vld [vmem:[#allocation12] ss:$0 sm:$0xff] }
 0x658   :  { %1553 = vmatpush1.bf16.msra.mxu1 %v5373_v60 }
 0x722   :  { %v4893_v0 = vpop.f32.mrb[8].mxu1 }
 0x723   :  { %v1173_v1 = vpop.f32.mrb[9].mxu1 }
 0x724   :  { %v1192_v2 = vpack.c.bf16 %v4893_v0, %v1173_v1  ;;  %v5381_v0 = vld [vmem:[%s7311_s6 + $0x64] ss:$16 sps:$4 sm:$0xff]   ;;  %v5384_v1 = vld [vmem:[%s7311_s6 + $0x6c] ss:$16 sps:$4 sm:$0xff]  }
 0x725   :  { %1554 = vmatprep.subr.bf16.mxu1 %v5381_v0 }
 0x726   :  { %v4896_v7 = vpop.f32.mrb[10].mxu1  ;;  %4913 = vmatprep.mubr.bf16.mxu0 %v1192_v2  ;;  %v5379_v2 = vld [vmem:[%s7311_s6 + $0x60] ss:$16 sps:$4 sm:$0xff]  }
 0x727   :  { %v1183_v14 = vpop.f32.mrb[11].mxu1  ;;  %1555 = vmatpush1.bf16.msra.mxu1 %v5379_v2 }
 0x728   :  { %v1193_v19 = vpack.c.bf16 %v4896_v7, %v1183_v14  ;;  %v5382_v7 = vld [vmem:[%s7311_s6 + $0x68] ss:$16 sps:$4 sm:$0xff]   ;;  %v5387_v14 = vld [vmem:[%s7311_s6 + $0x84] ss:$16 sps:$4 sm:$0xff]  }
 0x729   :  { %1556 = vmatprep.subr.bf16.mxu1 %v5387_v14 }
 0x72a   :  { %4914 = vmatmul.mubr.bf16.vlgmr.msra.gmra.mrb[12].mxu0 %v1193_v19  ;;  %v5390_v19 = vld [vmem:[%s7311_s6 + $0x8c] ss:$16 sps:$4 sm:$0xff]  }
 0x72b   :  { %1633 = vmatprep.mubr.bf16.mxu0 %v6264_v39  ;;  %1602 = vmatpush1.bf16.msra.mxu0 %v5364_v59 }
 0x72c   :  { %1603 = vmatprep.subr.bf16.mxu0 %v5372_v54 }
 0x72f   :  { %1604 = vmatpush1.bf16.msra.mxu0 %v5370_v45 }
 0x730   :  { %1605 = vmatprep.subr.bf16.mxu0 %v5378_v63 }
 0x733   :  { %1606 = vmatpush1.bf16.msra.mxu0 %v5376_v46 }
 0x734   :  { %1607 = vmatprep.subr.bf16.mxu0 %v5384_v1 }
 0x737   :  { %1608 = vmatpush1.bf16.msra.mxu0 %v5382_v7 }
 0x738   :  { %1609 = vmatprep.subr.bf16.mxu0 %v5390_v19 }
 0x7fd   :  { %v4915_v32 = vpop.f32.mrb[12].mxu0 }
 0x7fe   :  { %v1282_v48 = vpop.f32.mrb[13].mxu0  ;;  %v1291_v55 = vadd.f32 %v4915_v32, %v4279_v23  ;;  %v5388_v32 = vld [vmem:[%s7311_s6 + $0x88] ss:$16 sps:$4 sm:$0xff]  }
 0x7ff   :  { %v1283_v49 = vadd.f32 %v4279_v23, %v1282_v48  ;;  %v4916_v34 = vpop.f32.mrb[14].mxu0  ;;  %v5393_v48 = vld [vmem:[%s7311_s6 + $0xa4] ss:$16 sps:$4 sm:$0xff]   ;;  %1610 = vmatpush1.bf16.msra.mxu0 %v5388_v32 }
 0x800   :  { %v1285_v51 = vpop.f32.mrb[15].mxu0  ;;  %v1294_v61 = vadd.f32 %v4916_v34, %v4279_v23  ;;  %v6714_v6 = vadd.f32 %v5747_v4, %v1291_v55  ;;  %v5391_v34 = vld [vmem:[%s7311_s6 + $0xa0] ss:$16 sps:$4 sm:$0xff]   ;;  %v5399_v55 = vld [vmem:[%s7311_s6 + $0xc4] ss:$16 sps:$4 sm:$0xff]  }
 0x801   :  { %v6707_v56 = vadd.f32 %v5745_v57, %v1283_v49  ;;  %v1286_v28 = vadd.f32 %v4279_v23, %v1285_v51  ;;  %v5385_v23 = vld [vmem:[%s7311_s6 + $0x80] ss:$16 sps:$4 sm:$0xff]   ;;  %v5396_v49 = vld [vmem:[%s7311_s6 + $0xac] ss:$16 sps:$4 sm:$0xff]   ;;  %v5394_v51 = vld [vmem:[%s7311_s6 + $0xa8] ss:$16 sps:$4 sm:$0xff]  }
 0x802   :  { %v6718_v53 = vadd.f32 %v5748_v8, %v1294_v61  ;;  %1557 = vmatpush1.bf16.msra.mxu1 %v5385_v23  ;;  %1611 = vmatprep.subr.bf16.mxu0 %v5396_v49  ;;  %v5402_v57 = vld [vmem:[%s7311_s6 + $0xcc] ss:$16 sps:$4 sm:$0xff]   ;;  %v5400_v61 = vld [vmem:[%s7311_s6 + $0xc8] ss:$16 sps:$4 sm:$0xff]   ;;  %v5403_v8 = vld [vmem:[%s7311_s6 + $0xe0] ss:$16 sps:$4 sm:$0xff]  }
 0x803   :  { %v6710_v3 = vadd.f32 %v5746_v50, %v1286_v28  ;;  %1301 = vadd.xlane.f32.xlu0 %v6707_v56  ;;  %1558 = vmatprep.subr.bf16.mxu1 %v5393_v48  ;;  %v5397_v28 = vld [vmem:[%s7311_s6 + $0xc0] ss:$16 sps:$4 sm:$0xff]   ;;  %v5405_v50 = vld [vmem:[%s7311_s6 + $0xe4] ss:$16 sps:$4 sm:$0xff]   ;;  %v5408_v4 = vld [vmem:[%s7311_s6 + $0xec] ss:$16 sps:$4 sm:$0xff]  }
 0x804   :  { %1612 = vmatpush1.bf16.msra.mxu0 %v5394_v51  ;;  %v5409_v32 = vld [vmem:[#allocation15 + $0x40] sm:$0xff]   ;;  %v5415_v51 = vld [vmem:[#allocation15 + $0x8] sm:$0xff]  }
 0x805   :  { %1303 = vadd.xlane.f32.xlu1 %v6710_v3  ;;  %1613 = vmatprep.subr.bf16.mxu0 %v5402_v57  ;;  %v5410_v48 = vld [vmem:[#allocation15 + $0xc0] sm:$0xff]   ;;  %v5417_v57 = vld [vmem:[#allocation15 + $0x50] sm:$0xff]  }
 0x806   :  { %1559 = vmatpush1.bf16.msra.mxu1 %v5391_v34  ;;  %v5411_v49 = vld [vmem:[#allocation15] sm:$0xff]   ;;  %v5414_v34 = vld [vmem:[#allocation15 + $0xc8] sm:$0xff]  }
 0x807   :  { %1305 = vadd.xlane.f32.xlu0 %v6714_v6  ;;  %1560 = vmatprep.subr.bf16.mxu1 %v5399_v55  ;;  %v5416_v55 = vld [vmem:[#allocation15 + $0x88] sm:$0xff]  }
 0x808   :  { %1614 = vmatpush1.bf16.msra.mxu0 %v5400_v61  ;;  %v5419_v61 = vld [vmem:[#allocation15 + $0x10] sm:$0xff]  }
 0x809   :  { %1307 = vadd.xlane.f32.xlu1 %v6718_v53  ;;  %1615 = vmatprep.subr.bf16.mxu0 %v5408_v4  ;;  %v5421_v4 = vld [vmem:[#allocation15 + $0x58] sm:$0xff]  }
 0x80a   :  { %1561 = vmatpush1.bf16.msra.mxu1 %v5397_v28  ;;  %v5418_v28 = vld [vmem:[#allocation15 + $0xd0] sm:$0xff]  }
 0x80b   :  { %1562 = vmatprep.subr.bf16.mxu1 %v5405_v50  ;;  %v5420_v50 = vld [vmem:[#allocation15 + $0x90] sm:$0xff]  }
 0x80c   :  { %1616 = vmatpush1.bf16.msra.mxu0 %v5406_v9  ;;  %v5423_v9 = vld [vmem:[#allocation15 + $0x18] sm:$0xff]  }
 0x80d   :  { %4599 = vmatprep.subr.bf16.mxu0 %v5410_v48 }
 0x80e   :  { %1563 = vmatpush1.bf16.msra.mxu1 %v5403_v8  ;;  %v5422_v8 = vld [vmem:[#allocation15 + $0xd8] sm:$0xff]  }
 0x80f   :  { %4571 = vmatprep.subr.bf16.mxu1 %v5409_v32 }
 0x890   :  { %v1302_v52 = vpop.xlane.xlu0 %1301 }
 0x891   :  { %v1309_v62 = vmul.f32 0.0078125, %v1302_v52 }
 0x892   :  { %v1304_v43 = vpop.xlane.xlu1 %1303 }
 0x893   :  { %v6731_v16 = vsub.f32 %v6707_v56, %v1309_v62  ;;  %v1310_v5 = vmul.f32 0.0078125, %v1304_v43 }
 0x894   :  { %v1306_v17 = vpop.xlane.xlu0 %1305 }
 0x895   :  { %v6734_v13 = vsub.f32 %v6710_v3, %v1310_v5  ;;  %v1311_v20 = vmul.f32 0.0078125, %v1306_v17  ;;  %v1317_v22 = vmul.f32 %v6731_v16, %v6731_v16 }
 0x896   :  { %v1308_v26 = vpop.xlane.xlu1 %1307 }
 0x897   :  { %v6739_v29 = vsub.f32 %v6714_v6, %v1311_v20  ;;  %v1312_v31 = vmul.f32 0.0078125, %v1308_v26  ;;  %1321 = vadd.xlane.f32.xlu0 %v1317_v22  ;;  %v1318_v35 = vmul.f32 %v6734_v13, %v6734_v13  ;;  %v4288_v22 = vld [vmem:[#allocation10] ss:$0 sm:$0xff] }
 0x899   :  { %v6744_v37 = vsub.f32 %v6718_v53, %v1312_v31  ;;  %1323 = vadd.xlane.f32.xlu1 %v1318_v35  ;;  %v1319_v10 = vmul.f32 %v6739_v29, %v6739_v29 }
 0x89b   :  { %1325 = vadd.xlane.f32.xlu0 %v1319_v10  ;;  %v1320_v25 = vmul.f32 %v6744_v37, %v6744_v37 }
 0x89d   :  { %1327 = vadd.xlane.f32.xlu1 %v1320_v25 }
 0x924   :  { %v1322_v58 = vpop.xlane.xlu0 %1321 }
 0x925   :  { %v1329_v59 = vmul.f32 0.0078125, %v1322_v58  ;;  %v5424_v58 = vld [vmem:[#allocation15 + $0x98] sm:$0xff]  }
 0x926   :  { %v1324_v11 = vpop.xlane.xlu1 %1323 }
 0x927   :  { %v1333_v12 = vadd.f32 1e-05, %v1329_v59  ;;  %v1330_v54 = vmul.f32 0.0078125, %v1324_v11  ;;  %v5425_v59 = vld [vmem:[#allocation15 + $0x60] sm:$0xff]  }
 0x928   :  { %v1326_v15 = vpop.xlane.xlu0 %1325  ;;  %v5426_v11 = vld [vmem:[#allocation15 + $0xe0] sm:$0xff]  }
 0x929   :  { %5633 = vrsqrt.f32 %v1333_v12  ;;  %v1334_v45 = vadd.f32 1e-05, %v1330_v54  ;;  %v1331_v52 = vmul.f32 0.0078125, %v1326_v15  ;;  %v5427_v12 = vld [vmem:[#allocation15 + $0x20] sm:$0xff]   ;;  %v5429_v15 = vld [vmem:[#allocation15 + $0x68] sm:$0xff]  }
 0x92a   :  { %v1328_v62 = vpop.xlane.xlu1 %1327  ;;  %v5428_v54 = vld [vmem:[#allocation15 + $0xa0] sm:$0xff]  }
 0x92b   :  { %5635 = vrsqrt.f32 %v1334_v45  ;;  %v1335_v43 = vadd.f32 1e-05, %v1331_v52  ;;  %v1332_v5 = vmul.f32 0.0078125, %v1328_v62  ;;  %v5430_v45 = vld [vmem:[#allocation15 + $0xe8] sm:$0xff]  }
 0x92c   :  { %v5431_v52 = vld [vmem:[#allocation15 + $0x28] sm:$0xff]  }
 0x92d   :  { %5637 = vrsqrt.f32 %v1335_v43  ;;  %v1336_v17 = vadd.f32 1e-05, %v1332_v5  ;;  %v5432_v62 = vld [vmem:[#allocation15 + $0xa8] sm:$0xff]   ;;  %v5433_v43 = vld [vmem:[#allocation15 + $0x70] sm:$0xff]  }
 0x92e   :  { %v5434_v5 = vld [vmem:[#allocation15 + $0xf0] sm:$0xff]  }
 0x92f   :  { %5639 = vrsqrt.f32 %v1336_v17  ;;  %v5435_v17 = vld [vmem:[#allocation15 + $0x30] sm:$0xff]  }
 0x933   :  { %v5634_v20 = vpop.eup %5633 }
 0x934   :  { %v1341_v26 = vmul.f32 %v5634_v20, %v6731_v16  ;;  %v5436_v20 = vld [vmem:[#allocation15 + $0xb0] sm:$0xff]  }
 0x935   :  { %v5636_v31 = vpop.eup %5635 }
 0x936   :  { %v1351_v35 = vmul.f32 %v4288_v22, %v1341_v26  ;;  %v1342_v10 = vmul.f32 %v5636_v31, %v6734_v13  ;;  %v5438_v26 = vld [vmem:[#allocation15 + $0xf8] sm:$0xff]  }
 0x937   :  { %v5638_v25 = vpop.eup %5637  ;;  %v5439_v31 = vld [vmem:[#allocation15 + $0x38] sm:$0xff]  }
 0x938   :  { %v1352_v63 = vmul.f32 %v4288_v22, %v1342_v10  ;;  %v1361_v46 = vadd.f32 %v4289_v41, %v1351_v35  ;;  %v1343_v1 = vmul.f32 %v5638_v25, %v6739_v29  ;;  %v5412_v29 = vld [vmem:[#allocation15 + $0x80] sm:$0xff]   ;;  %v5440_v35 = vld [vmem:[#allocation15 + $0xb8] sm:$0xff]  }
 0x939   :  { %v5640_v60 = vpop.eup %5639  ;;  %v494_v10 = vld [vmem:[#allocation13] sm:$0xf] }
 0x93a   :  { %v1362_v0 = vadd.f32 %v4289_v41, %v1352_v63  ;;  %v1344_v2 = vmul.f32 %v5640_v60, %v6744_v37  ;;  %v1353_v19 = vmul.f32 %v4288_v22, %v1343_v1  ;;  %v5413_v37 = vld [vmem:[#allocation15 + $0x48] sm:$0xff]   ;;  %v6781_v25 = vrot.slane %v494_v10, %v6609_v40 }
 0x93b   :  { %v6787_v63 = vsub.s32 3, %v6606_v38 }
 0x93c   :  { %v1365_v7 = vpack.c.bf16 %v1362_v0, %v1361_v46  ;;  %v1354_v14 = vmul.f32 %v4288_v22, %v1344_v2  ;;  %v1363_v13 = vadd.f32 %v4289_v41, %v1353_v19  ;;  %v5437_v22 = vld [vmem:[#allocation15 + $0x78] sm:$0xff]   ;;  %v6790_v0 = vrot.slane %v494_v10, %v6612_v42 }
 0x93d   :  { %v6795_v19 = vrot.slane %v494_v10, %v6787_v63 }
 0x93e   :  { %1581 = vmatmul.mubr.bf16.vlgmr.msra.gmra.mrb[12].mxu1 %v1365_v7  ;;  %1634 = vmatmul.mubr.bf16.vlgmr.msra.gmra.mrb[16].mxu0 %v1365_v7  ;;  %v1364_v16 = vadd.f32 %v4289_v41, %v1354_v14  ;;  %v6784_v41 = vrot.slane %v494_v10, %v6616_v44 }
 0x93f   :  { %1590 = vmatprep.mubr.bf16.mxu1 %v6264_v39  ;;  %1643 = vmatprep.mubr.bf16.mxu0 %v6264_v39 }
 0x940   :  { %v1366_v23 = vpack.c.bf16 %v1364_v16, %v1363_v13  ;;  %4572 = vmatpush3.bf16.msra.mxu1 %v5411_v49  ;;  %4600 = vmatpush3.bf16.msra.mxu0 %v5412_v29 }
 0x941   :  { %4573 = vmatprep.subr.bf16.mxu1 %v5413_v37  ;;  %4601 = vmatprep.subr.bf16.mxu0 %v5414_v34 }
 0x944   :  { %4574 = vmatpush3.bf16.msra.mxu1 %v5415_v51  ;;  %4602 = vmatpush3.bf16.msra.mxu0 %v5416_v55 }
 0x945   :  { %4575 = vmatprep.subr.bf16.mxu1 %v5417_v57  ;;  %4603 = vmatprep.subr.bf16.mxu0 %v5418_v28 }
 0x946   :  { %1591 = vmatmul.mubr.bf16.gmra.mrb[16].mxu1 %v1366_v23  ;;  %1644 = vmatmul.mubr.bf16.gmra.mrb[20].mxu0 %v1366_v23 }
 0x948   :  { %4576 = vmatpush3.bf16.msra.mxu1 %v5419_v61  ;;  %4604 = vmatpush3.bf16.msra.mxu0 %v5420_v50 }
 0x949   :  { %4577 = vmatprep.subr.bf16.mxu1 %v5421_v4  ;;  %4605 = vmatprep.subr.bf16.mxu0 %v5422_v8 }
 0x94c   :  { %4578 = vmatpush3.bf16.msra.mxu1 %v5423_v9  ;;  %4606 = vmatpush3.bf16.msra.mxu0 %v5424_v58 }
 0x94d   :  { %4579 = vmatprep.subr.bf16.mxu1 %v5425_v59  ;;  %4607 = vmatprep.subr.bf16.mxu0 %v5426_v11 }
 0x950   :  { %4580 = vmatpush3.bf16.msra.mxu1 %v5427_v12  ;;  %4608 = vmatpush3.bf16.msra.mxu0 %v5428_v54 }
 0x951   :  { %4581 = vmatprep.subr.bf16.mxu1 %v5429_v15  ;;  %4609 = vmatprep.subr.bf16.mxu0 %v5430_v45 }
 0x954   :  { %4582 = vmatpush3.bf16.msra.mxu1 %v5431_v52  ;;  %4610 = vmatpush3.bf16.msra.mxu0 %v5432_v62 }
 0x955   :  { %4583 = vmatprep.subr.bf16.mxu1 %v5433_v43  ;;  %4611 = vmatprep.subr.bf16.mxu0 %v5434_v5 }
 0x958   :  { %4584 = vmatpush3.bf16.msra.mxu1 %v5435_v17  ;;  %4612 = vmatpush3.bf16.msra.mxu0 %v5436_v20 }
 0x959   :  { %4585 = vmatprep.subr.bf16.mxu1 %v5437_v22  ;;  %4613 = vmatprep.subr.bf16.mxu0 %v5438_v26 }
 0x95c   :  { %4586 = vmatpush3.bf16.msra.mxu1 %v5439_v31  ;;  %4614 = vmatpush3.bf16.msra.mxu0 %v5440_v35 }
 0xa11   :  { %v1582_v60 = vpop.f32.mrb[12].mxu1  ;;  %v1635_v46 = vpop.f32.mrb[16].mxu0 }
 0xa12   :  { %v1583_v1 = vadd.f32 %v1582_v60, %v6781_v25  ;;  %v1636_v2 = vadd.f32 %v1635_v46, %v6784_v41  ;;  %v1584_v7 = vpop.f32.mrb[13].mxu1  ;;  %v1637_v14 = vpop.f32.mrb[17].mxu0 }
 0xa13   :  { %v1586_v16 = vpop.f32.mrb[14].mxu1  ;;  %v1639_v13 = vpop.f32.mrb[18].mxu0  ;;  %v6798_v38 = vadd.f32 %v1584_v7, %v6790_v0  ;;  %v6808_v57 = vadd.f32 %v1637_v14, %v6795_v19 }
 0xa14   :  { %v1670_v23 = vmul.f32 0.044715, %v1583_v1  ;;  %v1672_v32 = vmul.f32 0.044715, %v1636_v2  ;;  %v1587_v48 = vadd.f32 %v1586_v16, %v6781_v25  ;;  %v6802_v49 = vadd.f32 %v1639_v13, %v6784_v41  ;;  %v1588_v29 = vpop.f32.mrb[15].mxu1  ;;  %v1641_v37 = vpop.f32.mrb[19].mxu0 }
 0xa15   :  { %v6805_v55 = vadd.f32 %v1588_v29, %v6790_v0  ;;  %v6811_v61 = vadd.f32 %v1641_v37, %v6795_v19  ;;  %v6813_v50 = vmul.f32 0.5, %v1583_v1  ;;  %v1671_v58 = vmul.f32 0.044715, %v6798_v38 }
 0xa16   :  { %v1686_v34 = vmul.f32 %v1670_v23, %v1583_v1  ;;  %v1688_v51 = vmul.f32 %v1672_v32, %v1636_v2  ;;  %v1674_v28 = vmul.f32 0.044715, %v1587_v48  ;;  %v1676_v9 = vmul.f32 0.044715, %v6802_v49 }
 0xa17   :  { %v1675_v11 = vmul.f32 0.044715, %v6805_v55  ;;  %v6818_v45 = vmul.f32 0.5, %v1636_v2  ;;  %v1673_v17 = vmul.f32 0.044715, %v6808_v57  ;;  %v1687_v7 = vmul.f32 %v1671_v58, %v6798_v38 }
 0xa18   :  { %v1702_v4 = vmul.f32 %v1686_v34, %v1583_v1  ;;  %v1704_v8 = vmul.f32 %v1688_v51, %v1636_v2  ;;  %v1690_v59 = vmul.f32 %v1674_v28, %v1587_v48  ;;  %v1692_v62 = vmul.f32 %v1676_v9, %v6802_v49 }
 0xa19   :  { %v1592_v12 = vpop.f32.mrb[16].mxu1  ;;  %v1645_v54 = vpop.f32.mrb[20].mxu0  ;;  %v1677_v22 = vmul.f32 0.044715, %v6811_v61  ;;  %v1691_v16 = vmul.f32 %v1675_v11, %v6805_v55  ;;  %v1689_v37 = vmul.f32 %v1673_v17, %v6808_v57  ;;  %v1703_v58 = vmul.f32 %v1687_v7, %v6798_v38 }
 0xa1a   :  { %v1718_v15 = vadd.f32 %v1702_v4, %v1583_v1  ;;  %v1720_v52 = vadd.f32 %v1704_v8, %v1636_v2  ;;  %v1594_v43 = vpop.f32.mrb[17].mxu1  ;;  %v1647_v5 = vpop.f32.mrb[21].mxu0  ;;  %v1706_v20 = vmul.f32 %v1690_v59, %v1587_v48  ;;  %v6824_v26 = vadd.f32 %v1592_v12, %v6781_v25 }
 0xa1b   :  { %v1596_v31 = vpop.f32.mrb[18].mxu1  ;;  %v1649_v35 = vpop.f32.mrb[22].mxu0  ;;  %v1708_v46 = vmul.f32 %v1692_v62, %v6802_v49  ;;  %v6830_v13 = vadd.f32 %v1645_v54, %v6784_v41  ;;  %v6835_v29 = vadd.f32 %v1594_v43, %v6790_v0  ;;  %v1693_v51 = vmul.f32 %v1677_v22, %v6811_v61 }
 0xa1c   :  { %v1734_v10 = vmul.f32 0.7978846, %v1718_v15  ;;  %v1736_v60 = vmul.f32 0.7978846, %v1720_v52  ;;  %v1598_v1 = vpop.f32.mrb[19].mxu1  ;;  %v1651_v2 = vpop.f32.mrb[23].mxu0  ;;  %v1722_v14 = vadd.f32 %v1706_v20, %v1587_v48  ;;  %v6841_v8 = vadd.f32 %v1647_v5, %v6795_v19 }
 0xa1d   :  { %v1724_v23 = vadd.f32 %v1708_v46, %v6802_v49  ;;  %v1678_v32 = vmul.f32 0.044715, %v6824_v26  ;;  %v1679_v4 = vmul.f32 0.044715, %v6835_v29  ;;  %v6844_v9 = vadd.f32 %v1596_v31, %v6781_v25 }
 0xa1e   :  { %5641 = vtanh.f32 %v1734_v10  ;;  %v1738_v34 = vmul.f32 0.7978846, %v1722_v14  ;;  %v1707_v59 = vmul.f32 %v1691_v16, %v6805_v55  ;;  %v6849_v11 = vadd.f32 %v1649_v35, %v6784_v41 }
 0xa1f   :  { %5643 = vtanh.f32 %v1736_v60  ;;  %v1740_v28 = vmul.f32 0.7978846, %v1724_v23  ;;  %v1694_v12 = vmul.f32 %v1678_v32, %v6824_v26  ;;  %v1680_v54 = vmul.f32 0.044715, %v6830_v13 }
 0xa20   :  { %5645 = vtanh.f32 %v1738_v34  ;;  %v1681_v15 = vmul.f32 0.044715, %v6841_v8  ;;  %v1658_v52 = vmul.f32 0.5, %v1587_v48  ;;  %v1695_v62 = vmul.f32 %v1679_v4, %v6835_v29 }
 0xa21   :  { %5647 = vtanh.f32 %v1740_v28  ;;  %v6856_v25 = vadd.f32 %v1598_v1, %v6790_v0  ;;  %v6859_v43 = vadd.f32 %v1651_v2, %v6795_v19  ;;  %v1705_v5 = vmul.f32 %v1689_v37, %v6808_v57 }
 0xa22   :  { %v1709_v41 = vmul.f32 %v1693_v51, %v6811_v61  ;;  %v1682_v17 = vmul.f32 0.044715, %v6844_v9  ;;  %v1684_v20 = vmul.f32 0.044715, %v6849_v11  ;;  %v1697_v22 = vmul.f32 %v1681_v15, %v6841_v8 }
 0xa23   :  { %v1683_v48 = vmul.f32 0.044715, %v6856_v25  ;;  %v1685_v31 = vmul.f32 0.044715, %v6859_v43  ;;  %v1719_v0 = vadd.f32 %v1703_v58, %v6798_v38  ;;  %v1660_v35 = vmul.f32 0.5, %v6802_v49 }
 0xa24   :  { %v1710_v19 = vmul.f32 %v1694_v12, %v6824_v26  ;;  %v1696_v10 = vmul.f32 %v1680_v54, %v6830_v13  ;;  %v1723_v60 = vadd.f32 %v1707_v59, %v6805_v55  ;;  %v1711_v46 = vmul.f32 %v1695_v62, %v6835_v29 }
 0xa25   :  { %v1699_v1 = vmul.f32 %v1683_v48, %v6856_v25  ;;  %v1701_v2 = vmul.f32 %v1685_v31, %v6859_v43  ;;  %v1735_v7 = vmul.f32 0.7978846, %v1719_v0  ;;  %v1698_v16 = vmul.f32 %v1682_v17, %v6844_v9 }
 0xa26   :  { %v1739_v23 = vmul.f32 0.7978846, %v1723_v60  ;;  %v1721_v32 = vadd.f32 %v1705_v5, %v6808_v57  ;;  %v1725_v49 = vadd.f32 %v1709_v41, %v6811_v61  ;;  %v1713_v34 = vmul.f32 %v1697_v22, %v6841_v8 }
 0xa27   :  { %v1700_v51 = vmul.f32 %v1684_v20, %v6849_v11  ;;  %v1715_v28 = vmul.f32 %v1699_v1, %v6856_v25  ;;  %5649 = vtanh.f32 %v1735_v7  ;;  %v1712_v54 = vmul.f32 %v1696_v10, %v6830_v13 }
 0xa28   :  { %v5642_v14 = vpop.eup %5641  ;;  %5651 = vtanh.f32 %v1739_v23  ;;  %v1737_v4 = vmul.f32 0.7978846, %v1721_v32  ;;  %v1741_v58 = vmul.f32 0.7978846, %v1725_v49  ;;  %v1717_v15 = vmul.f32 %v1701_v2, %v6859_v43 }
 0xa29   :  { %v5644_v37 = vpop.eup %5643  ;;  %v1766_v59 = vadd.f32 1.0, %v5642_v14  ;;  %v1727_v5 = vadd.f32 %v1711_v46, %v6835_v29  ;;  %v1714_v17 = vmul.f32 %v1698_v16, %v6844_v9  ;;  %v1731_v22 = vadd.f32 %v1715_v28, %v6856_v25 }
 0xa2a   :  { %v5646_v12 = vpop.eup %5645  ;;  %v1768_v62 = vadd.f32 1.0, %v5644_v37  ;;  %5653 = vtanh.f32 %v1737_v4  ;;  %v1716_v48 = vmul.f32 %v1700_v51, %v6849_v11  ;;  %v1729_v2 = vadd.f32 %v1713_v34, %v6841_v8 }
 0xa2b   :  { %v5648_v41 = vpop.eup %5647  ;;  %v1770_v20 = vadd.f32 1.0, %v5646_v12  ;;  %5655 = vtanh.f32 %v1741_v58  ;;  %v1743_v0 = vmul.f32 0.7978846, %v1727_v5  ;;  %v1782_v60 = vmul.f32 %v1766_v59, %v6813_v50 }
 0xa2c   :  { %v1772_v31 = vadd.f32 1.0, %v5648_v41  ;;  %v1747_v1 = vmul.f32 0.7978846, %v1731_v22  ;;  %v1784_v46 = vmul.f32 %v1768_v62, %v6818_v45  ;;  %v1733_v14 = vadd.f32 %v1717_v15, %v6859_v43 }
 0xa2d   :  { %v1786_v10 = vmul.f32 %v1770_v20, %v1658_v52  ;;  %5657 = vtanh.f32 %v1743_v0  ;;  %v1745_v23 = vmul.f32 0.7978846, %v1729_v2  ;;  %v1726_v37 = vadd.f32 %v1710_v19, %v6824_v26 }
 0xa2e   :  { %v1788_v7 = vmul.f32 %v1772_v31, %v1660_v35  ;;  %5659 = vtanh.f32 %v1747_v1  ;;  %v1749_v49 = vmul.f32 0.7978846, %v1733_v14  ;;  %v1730_v51 = vadd.f32 %v1714_v17, %v6844_v9 }
 0xa2f   :  { %v1798_v16 = vpack.c.bf16 %v1786_v10, %v1782_v60  ;;  %5661 = vtanh.f32 %v1745_v23  ;;  %v1728_v50 = vadd.f32 %v1712_v54, %v6830_v13  ;;  %v1742_v34 = vmul.f32 0.7978846, %v1726_v37 }
 0xa30   :  { %v1800_v32 = vpack.c.bf16 %v1788_v7, %v1784_v46  ;;  %5663 = vtanh.f32 %v1749_v49  ;;  %v1746_v45 = vmul.f32 0.7978846, %v1730_v51  ;;  %v1732_v35 = vadd.f32 %v1716_v48, %v6849_v11 }
 0xa31   :  { %v5650_v52 = vpop.eup %5649  ;;  %v1655_v4 = vmul.f32 0.5, %v6798_v38  ;;  %v1744_v59 = vmul.f32 0.7978846, %v1728_v50  ;;  %v1659_v12 = vmul.f32 0.5, %v6805_v55  ;;  %5665 = vtanh.f32 %v1742_v34 }
 0xa32   :  { %v5652_v28 = vpop.eup %5651  ;;  %v1767_v58 = vadd.f32 1.0, %v5650_v52  ;;  %v1748_v19 = vmul.f32 0.7978846, %v1732_v35  ;;  %5667 = vtanh.f32 %v1746_v45  ;;  %v1657_v20 = vmul.f32 0.5, %v6808_v57 }
 0xa33   :  { %v1771_v15 = vadd.f32 1.0, %v5652_v28  ;;  %5669 = vtanh.f32 %v1744_v59  ;;  %v1661_v22 = vmul.f32 0.5, %v6811_v61  ;;  %v1663_v1 = vmul.f32 0.5, %v6835_v29 }
 0xa34   :  { %v5654_v62 = vpop.eup %5653  ;;  %v1783_v54 = vmul.f32 %v1767_v58, %v1655_v4  ;;  %5671 = vtanh.f32 %v1748_v19  ;;  %v1667_v2 = vmul.f32 0.5, %v6856_v25  ;;  %v1665_v37 = vmul.f32 0.5, %v6841_v8 }
 0xa35   :  { %v5656_v5 = vpop.eup %5655  ;;  %v1787_v41 = vmul.f32 %v1771_v15, %v1659_v12  ;;  %v1769_v17 = vadd.f32 1.0, %v5654_v62  ;;  %v1669_v51 = vmul.f32 0.5, %v6859_v43  ;;  %v1666_v4 = vmul.f32 0.5, %v6844_v9  ;;  %v4322_v9 = vld [vmem:[#allocation16] ss:$0 sm:$0xff] }
 0xa36   :  { %v1773_v48 = vadd.f32 1.0, %v5656_v5  ;;  %v1664_v8 = vmul.f32 0.5, %v6830_v13 }
 0xa37   :  { %v5658_v38 = vpop.eup %5657  ;;  %v1799_v31 = vpack.c.bf16 %v1787_v41, %v1783_v54  ;;  %v1785_v55 = vmul.f32 %v1769_v17, %v1657_v20 }
 0xa38   :  { %v5660_v0 = vpop.eup %5659  ;;  %v1789_v60 = vmul.f32 %v1773_v48, %v1661_v22  ;;  %v1775_v10 = vadd.f32 1.0, %v5658_v38 }
 0xa39   :  { %2036 = vmatprep.mubr.bf16.mxu1 %v1799_v31  ;;  %v1779_v46 = vadd.f32 1.0, %v5660_v0  ;;  %v5662_v7 = vpop.eup %5661 }
 0xa3a   :  { %v1801_v14 = vpack.c.bf16 %v1789_v60, %v1785_v55  ;;  %2037 = vmatmul.mubr.bf16.vlgmr.msra.gmra.mrb[20].mxu1 %v1798_v16  ;;  %v5664_v57 = vpop.eup %5663  ;;  %v1791_v23 = vmul.f32 %v1775_v10, %v1663_v1  ;;  %v1777_v49 = vadd.f32 1.0, %v5662_v7  ;;  %v1662_v16 = vmul.f32 0.5, %v6824_v26 }
 0xa3b   :  { %v1795_v61 = vmul.f32 %v1779_v46, %v1667_v2  ;;  %v1781_v50 = vadd.f32 1.0, %v5664_v57  ;;  %v5666_v52 = vpop.eup %5665 }
 0xa3c   :  { %2085 = vmatprep.mubr.bf16.mxu0 %v1801_v14  ;;  %v5668_v29 = vpop.eup %5667  ;;  %v1793_v45 = vmul.f32 %v1777_v49, %v1665_v37  ;;  %v1774_v35 = vadd.f32 1.0, %v5666_v52 }
 0xa3d   :  { %2086 = vmatmul.mubr.bf16.vlgmr.msra.gmra.mrb[24].mxu0 %v1800_v32  ;;  %v1803_v34 = vpack.c.bf16 %v1795_v61, %v1791_v23  ;;  %v1797_v25 = vmul.f32 %v1781_v50, %v1669_v51  ;;  %v5670_v28 = vpop.eup %5669  ;;  %v1778_v58 = vadd.f32 1.0, %v5668_v29  ;;  %v1668_v32 = vmul.f32 0.5, %v6849_v11 }
 0xa3e   :  { %v5672_v59 = vpop.eup %5671  ;;  %v1776_v43 = vadd.f32 1.0, %v5670_v28  ;;  %v1790_v15 = vmul.f32 %v1774_v35, %v1662_v16 }
 0xa3f   :  { %2044 = vmatprep.mubr.bf16.mxu1 %v1803_v34  ;;  %v1805_v12 = vpack.c.bf16 %v1797_v25, %v1793_v45  ;;  %v1794_v19 = vmul.f32 %v1778_v58, %v1666_v4  ;;  %v1780_v62 = vadd.f32 1.0, %v5672_v59  ;;  %v5441_v59 = vld [vmem:[#allocation18] ss:$12 sps:$4 sm:$0xff]  }
 0xa40   :  { %v1792_v54 = vmul.f32 %v1776_v43, %v1664_v8  ;;  %v5446_v8 = vld [vmem:[#allocation18 + $0x1c] ss:$12 sps:$4 sm:$0xff]   ;;  %v5444_v43 = vld [vmem:[#allocation18 + $0x18] ss:$12 sps:$4 sm:$0xff]  }
 0xa41   :  { %2093 = vmatprep.mubr.bf16.mxu0 %v1805_v12  ;;  %v1802_v5 = vpack.c.bf16 %v1794_v19, %v1790_v15  ;;  %v1796_v41 = vmul.f32 %v1780_v62, %v1668_v32  ;;  %v5443_v12 = vld [vmem:[#allocation18 + $0x4] ss:$12 sps:$4 sm:$0xff]  }
 0xa42   :  { %2468 = vmatprep.subr.bf16.mxu1 %v5443_v12 }
 0xa43   :  { %2045 = vmatmul.mubr.bf16.gmra.mrb[24].mxu1 %v1802_v5  ;;  %v1804_v17 = vpack.c.bf16 %v1796_v41, %v1792_v54 }
 0xa44   :  { %2500 = vmatprep.mubr.bf16.mxu1 %v6264_v39  ;;  %2469 = vmatpush1.bf16.msra.mxu1 %v5441_v59 }
 0xa45   :  { %2094 = vmatmul.mubr.bf16.gmra.mrb[28].mxu0 %v1804_v17  ;;  %2470 = vmatprep.subr.bf16.mxu1 %v5446_v8 }
 0xa48   :  { %2471 = vmatpush1.bf16.msra.mxu1 %v5444_v43 }
 0xb0d   :  { %v4587_v26 = vpop.f32.mrb[20].mxu1 }
 0xb0e   :  { %v4588_v20 = vpop.f32.mrb[21].mxu1 }
 0xb0f   :  { %v4589_v22 = vadd.f32 %v4588_v20, %v4587_v26  ;;  %v4590_v13 = vpop.f32.mrb[22].mxu1 }
 0xb10   :  { %v4615_v48 = vpop.f32.mrb[24].mxu0  ;;  %v4591_v38 = vpop.f32.mrb[23].mxu1 }
 0xb11   :  { %v2039_v31 = vadd.f32 %v4589_v22, %v4322_v9  ;;  %v4616_v0 = vpop.f32.mrb[25].mxu0  ;;  %v4592_v11 = vadd.f32 %v4591_v38, %v4590_v13  ;;  %v5449_v38 = vld [vmem:[#allocation18 + $0x34] ss:$12 sps:$4 sm:$0xff]  }
 0xb12   :  { %v4617_v55 = vadd.f32 %v4616_v0, %v4615_v48  ;;  %v4618_v60 = vpop.f32.mrb[26].mxu0  ;;  %v5447_v0 = vld [vmem:[#allocation18 + $0x30] ss:$12 sps:$4 sm:$0xff]   ;;  %2472 = vmatprep.subr.bf16.mxu1 %v5449_v38 }
 0xb13   :  { %v2042_v10 = vadd.f32 %v4592_v11, %v4322_v9  ;;  %v4619_v1 = vpop.f32.mrb[27].mxu0  ;;  %2473 = vmatpush1.bf16.msra.mxu1 %v5447_v0  ;;  %v5453_v11 = vld [vmem:[#allocation18 + $0x4c] ss:$12 sps:$4 sm:$0xff]  }
 0xb14   :  { %v2088_v2 = vadd.f32 %v4617_v55, %v2039_v31  ;;  %v4620_v46 = vadd.f32 %v4619_v1, %v4618_v60  ;;  %v5450_v31 = vld [vmem:[#allocation18 + $0x8] ss:$12 sps:$4 sm:$0xff]   ;;  %v5454_v55 = vld [vmem:[#allocation18 + $0x20] ss:$12 sps:$4 sm:$0xff]   ;;  %2474 = vmatprep.subr.bf16.mxu1 %v5453_v11  ;;  %v5457_v1 = vld [vmem:[#allocation18 + $0x64] ss:$12 sps:$4 sm:$0xff]  }
 0xb15   :  { %4917 = vmatprep.subr.bf16.mxu0 %v5450_v31  ;;  %v5451_v60 = vld [vmem:[#allocation18 + $0x48] ss:$12 sps:$4 sm:$0xff]  }
 0xb16   :  { %v2091_v7 = vadd.f32 %v4620_v46, %v2042_v10  ;;  %v6910_v14 = vadd.f32 %v2088_v2, %v6707_v56  ;;  %v4593_v57 = vpop.f32.mrb[24].mxu1  ;;  %4918 = vmatpush3.bf16.msra.mxu0 %v5450_v31  ;;  %v5455_v10 = vld [vmem:[#allocation18 + $0x60] ss:$12 sps:$4 sm:$0xff]   ;;  %v5458_v2 = vld [vmem:[#allocation18 + $0x38] ss:$12 sps:$4 sm:$0xff]  }
 0xb17   :  { %v4594_v61 = vpop.f32.mrb[25].mxu1  ;;  %4919 = vmatprep.subr.bf16.mxu0 %v5454_v55  ;;  %2475 = vmatpush1.bf16.msra.mxu1 %v5451_v60  ;;  %v5461_v46 = vld [vmem:[#allocation18 + $0x7c] ss:$12 sps:$4 sm:$0xff]  }
 0xb18   :  { %2258 = vadd.xlane.f32.xlu0 %v6910_v14  ;;  %v6914_v23 = vadd.f32 %v2091_v7, %v6710_v3  ;;  %v4621_v49 = vpop.f32.mrb[28].mxu0  ;;  %v4595_v37 = vadd.f32 %v4594_v61, %v4593_v57  ;;  %v4596_v51 = vpop.f32.mrb[26].mxu1  ;;  %v5462_v7 = vld [vmem:[#allocation18 + $0x50] ss:$12 sps:$4 sm:$0xff]   ;;  %2476 = vmatprep.subr.bf16.mxu1 %v5457_v1  ;;  %v5459_v57 = vld [vmem:[#allocation18 + $0x78] ss:$12 sps:$4 sm:$0xff]  }
 0xb19   :  { %v4622_v50 = vpop.f32.mrb[29].mxu0  ;;  %v4597_v52 = vpop.f32.mrb[27].mxu1  ;;  %v5465_v61 = vld [vmem:[#allocation18 + $0x94] ss:$12 sps:$4 sm:$0xff]  }
 0xb1a   :  { %2260 = vadd.xlane.f32.xlu1 %v6914_v23  ;;  %v2047_v34 = vadd.f32 %v4595_v37, %v4322_v9  ;;  %v4623_v29 = vadd.f32 %v4622_v50, %v4621_v49  ;;  %v4624_v45 = vpop.f32.mrb[30].mxu0  ;;  %v4598_v25 = vadd.f32 %v4597_v52, %v4596_v51  ;;  %4920 = vmatpush3.bf16.msra.mxu0 %v5454_v55  ;;  %v5466_v49 = vld [vmem:[#allocation18 + $0x68] ss:$12 sps:$4 sm:$0xff]   ;;  %v5463_v37 = vld [vmem:[#allocation18 + $0x90] ss:$12 sps:$4 sm:$0xff]  }
 0xb1b   :  { %v4625_v56 = vpop.f32.mrb[31].mxu0  ;;  %4921 = vmatprep.subr.bf16.mxu0 %v5458_v2  ;;  %2477 = vmatpush1.bf16.msra.mxu1 %v5455_v10  ;;  %v5469_v51 = vld [vmem:[#allocation18 + $0xac] ss:$12 sps:$4 sm:$0xff]   ;;  %v5467_v52 = vld [vmem:[#allocation18 + $0xa8] ss:$12 sps:$4 sm:$0xff]  }
 0xb1c   :  { %v2096_v35 = vadd.f32 %v4623_v29, %v2047_v34  ;;  %v2050_v28 = vadd.f32 %v4598_v25, %v4322_v9  ;;  %v4626_v16 = vadd.f32 %v4625_v56, %v4624_v45  ;;  %2478 = vmatprep.subr.bf16.mxu1 %v5461_v46  ;;  %v5470_v50 = vld [vmem:[#allocation18 + $0x80] ss:$12 sps:$4 sm:$0xff]   ;;  %v5471_v34 = vld [vmem:[#allocation18 + $0x98] ss:$12 sps:$4 sm:$0xff]   ;;  %v5472_v29 = vld [vmem:[#allocation18 + $0xb0] ss:$12 sps:$4 sm:$0xff]  }
 0xb1d   :  { %v5749_v46 = vld [vmem:[%s7308_s16] sm:$0xff] }
 0xb1e   :  { %v2099_v4 = vadd.f32 %v4626_v16, %v2050_v28  ;;  %v6918_v3 = vadd.f32 %v2096_v35, %v6714_v6  ;;  %4922 = vmatpush3.bf16.msra.mxu0 %v5458_v2 }
 0xb1f   :  { %4923 = vmatprep.subr.bf16.mxu0 %v5462_v7  ;;  %2479 = vmatpush1.bf16.msra.mxu1 %v5459_v57  ;;  %v5750_v57 = vld [vmem:[%s7308_s16 + $0x20] sm:$0xff] }
 0xb20   :  { %2262 = vadd.xlane.f32.xlu0 %v6918_v3  ;;  %v6922_v58 = vadd.f32 %v2099_v4, %v6718_v53  ;;  %2480 = vmatprep.subr.bf16.mxu1 %v5465_v61 }
 0xb22   :  { %2264 = vadd.xlane.f32.xlu1 %v6922_v58  ;;  %4924 = vmatpush3.bf16.msra.mxu0 %v5462_v7 }
 0xb23   :  { %4925 = vmatprep.subr.bf16.mxu0 %v5466_v49  ;;  %2481 = vmatpush1.bf16.msra.mxu1 %v5463_v37 }
 0xb24   :  { %2482 = vmatprep.subr.bf16.mxu1 %v5469_v51  ;;  %v6979_v51 = vld [vmem:[%s7308_s16 + $0x60] sm:$0xff] }
 0xb26   :  { %4926 = vmatpush3.bf16.msra.mxu0 %v5466_v49  ;;  %v6975_v49 = vld [vmem:[%s7308_s16 + $0x40] sm:$0xff] }
 0xb27   :  { %4927 = vmatprep.subr.bf16.mxu0 %v5470_v50  ;;  %2483 = vmatpush1.bf16.msra.mxu1 %v5467_v52  ;;  %v5753_v52 = vld [vmem:[%s7308_s16 + $0x8] sm:$0xff] }
 0xb2a   :  { %4928 = vmatpush3.bf16.msra.mxu0 %v5470_v50 }
 0xb2b   :  { %4929 = vmatprep.subr.bf16.mxu0 %v5471_v34 }
 0xb2e   :  { %4930 = vmatpush3.bf16.msra.mxu0 %v5471_v34 }
 0xb2f   :  { %4931 = vmatprep.subr.bf16.mxu0 %v5472_v29 }
 0xb32   :  { %4932 = vmatpush3.bf16.msra.mxu0 %v5472_v29  ;;  %v5754_v29 = vld [vmem:[%s7308_s16 + $0x28] sm:$0xff] }
 0xb33   :  { %5200 = vmatprep.subr.bf16.mxu0 %v6555_v47 }
 0xba5   :  { %v2259_v15 = vpop.xlane.xlu0 %2258 }
 0xba6   :  { %v2266_v19 = vmul.f32 0.0078125, %v2259_v15 }
 0xba7   :  { %v2261_v32 = vpop.xlane.xlu1 %2260 }
 0xba8   :  { %v6926_v6 = vsub.f32 %v6910_v14, %v2266_v19  ;;  %v2267_v62 = vmul.f32 0.0078125, %v2261_v32  ;;  %v4355_v19 = vld [vmem:[%s7312_s22] ss:$0 sm:$0xff] }
 0xbaa   :  { %v6929_v53 = vsub.f32 %v6914_v23, %v2267_v62  ;;  %v2274_v5 = vmul.f32 %v6926_v6, %v6926_v6 }
 0xbac   :  { %2278 = vadd.xlane.f32.xlu0 %v2274_v5  ;;  %v2275_v54 = vmul.f32 %v6929_v53, %v6929_v53 }
 0xbad   :  { %v2263_v41 = vpop.xlane.xlu0 %2262 }
 0xbae   :  { %2280 = vadd.xlane.f32.xlu1 %v2275_v54  ;;  %v2268_v17 = vmul.f32 0.0078125, %v2263_v41 }
 0xbaf   :  { %v2265_v26 = vpop.xlane.xlu1 %2264 }
 0xbb0   :  { %v6936_v9 = vsub.f32 %v6918_v3, %v2268_v17  ;;  %v2269_v20 = vmul.f32 0.0078125, %v2265_v26  ;;  %v4356_v17 = vld [vmem:[%s7313_s24] ss:$0 sm:$0xff] }
 0xbb2   :  { %v6939_v22 = vsub.f32 %v6922_v58, %v2269_v20  ;;  %v2276_v13 = vmul.f32 %v6936_v9, %v6936_v9 }
 0xbb4   :  { %2282 = vadd.xlane.f32.xlu0 %v2276_v13  ;;  %v2277_v48 = vmul.f32 %v6939_v22, %v6939_v22 }
 0xbb6   :  { %2284 = vadd.xlane.f32.xlu1 %v2277_v48 }
 0xc39   :  { %v2279_v45 = vpop.xlane.xlu0 %2278 }
 0xc3a   :  { %v2286_v25 = vmul.f32 0.0078125, %v2279_v45 }
 0xc3b   :  { %v2281_v56 = vpop.xlane.xlu1 %2280 }
 0xc3c   :  { %v2290_v35 = vadd.f32 1e-05, %v2286_v25  ;;  %v2287_v28 = vmul.f32 0.0078125, %v2281_v56  ;;  %v5755_v25 = vld [vmem:[%s7308_s16 + $0x48] sm:$0xff] }
 0xc3e   :  { %5673 = vrsqrt.f32 %v2290_v35  ;;  %v2291_v16 = vadd.f32 1e-05, %v2287_v28  ;;  %v6986_v35 = vld [vmem:[%s7308_s16 + $0x68] sm:$0xff] }
 0xc40   :  { %5675 = vrsqrt.f32 %v2291_v16 }
 0xc41   :  { %v2283_v4 = vpop.xlane.xlu0 %2282 }
 0xc42   :  { %v2288_v59 = vmul.f32 0.0078125, %v2283_v4 }
 0xc43   :  { %v2285_v12 = vpop.xlane.xlu1 %2284 }
 0xc44   :  { %v2292_v8 = vadd.f32 1e-05, %v2288_v59  ;;  %v2289_v43 = vmul.f32 0.0078125, %v2285_v12 }
 0xc46   :  { %5677 = vrsqrt.f32 %v2292_v8  ;;  %v2293_v32 = vadd.f32 1e-05, %v2289_v43 }
 0xc48   :  { %v5674_v15 = vpop.eup %5673  ;;  %5679 = vrsqrt.f32 %v2293_v32 }
 0xc49   :  { %v2298_v62 = vmul.f32 %v5674_v15, %v6926_v6 }
 0xc4a   :  { %v5676_v5 = vpop.eup %5675 }
 0xc4b   :  { %v2308_v54 = vmul.f32 %v4355_v19, %v2298_v62  ;;  %v2299_v41 = vmul.f32 %v5676_v5, %v6929_v53 }
 0xc4d   :  { %v2309_v26 = vmul.f32 %v4355_v19, %v2299_v41  ;;  %v2318_v20 = vadd.f32 %v4356_v17, %v2308_v54 }
 0xc4f   :  { %v2319_v13 = vadd.f32 %v4356_v17, %v2309_v26 }
 0xc50   :  { %v5678_v38 = vpop.eup %5677 }
 0xc51   :  { %v2322_v48 = vpack.c.bf16 %v2319_v13, %v2318_v20  ;;  %v2300_v31 = vmul.f32 %v5678_v38, %v6936_v9 }
 0xc52   :  { %v5680_v0 = vpop.eup %5679 }
 0xc53   :  { %2501 = vmatmul.mubr.bf16.vlgmr.msra.gmra.mrb[28].mxu1 %v2322_v48  ;;  %4933 = vmatprep.mubr.bf16.mxu0 %v2322_v48  ;;  %v2301_v6 = vmul.f32 %v5680_v0, %v6939_v22  ;;  %v2310_v11 = vmul.f32 %v4355_v19, %v2300_v31 }
 0xc54   :  { %2510 = vmatprep.mubr.bf16.mxu1 %v6264_v39 }
 0xc55   :  { %v2311_v55 = vmul.f32 %v4355_v19, %v2301_v6  ;;  %v2320_v60 = vadd.f32 %v4356_v17, %v2310_v11  ;;  %v5757_v6 = vld [vmem:[%s7308_s16 + $0x10] sm:$0xff] }
 0xc57   :  { %v2321_v10 = vadd.f32 %v4356_v17, %v2311_v55 }
 0xc59   :  { %v2323_v53 = vpack.c.bf16 %v2321_v10, %v2320_v60  ;;  %v5758_v10 = vld [vmem:[%s7308_s16 + $0x30] sm:$0xff] }
 0xc5b   :  { %2511 = vmatmul.mubr.bf16.gmra.mrb[32].mxu1 %v2323_v53  ;;  %4934 = vmatmul.mubr.bf16.vlgmr.msra.gmra.mrb[32].mxu0 %v2323_v53 }
 0xc5c   :  { %5202 = vmatpush3.bf16.msra.mxu0 %v6555_v47  ;;  %v2140_v47 = vld [vmem:[#allocation19] sm:$0x7] }
 0xc5d   :  { %5204 = vmatprep.subr.bf16.mxu0 %v6565_v18  ;;  %v2336_v16 = vrot.slane %v2140_v47, %v6616_v44 }
 0xc60   :  { %5206 = vmatpush3.bf16.msra.mxu0 %v6565_v18  ;;  %v2328_v18 = vrot.slane %v2140_v47, %v6609_v40 }
 0xc61   :  { %5208 = vmatprep.subr.bf16.mxu0 %v6571_v21 }
 0xc64   :  { %5210 = vmatpush3.bf16.msra.mxu0 %v6571_v21  ;;  %v2332_v21 = vrot.slane %v2140_v47, %v6612_v42  ;;  %v5759_v47 = vld [vmem:[%s7308_s16 + $0x50] sm:$0xff] }
 0xc65   :  { %5212 = vmatprep.subr.bf16.mxu0 %v6577_v24 }
 0xc68   :  { %5214 = vmatpush3.bf16.msra.mxu0 %v6577_v24 }
 0xc69   :  { %5216 = vmatprep.subr.bf16.mxu0 %v6584_v27 }
 0xc6c   :  { %5218 = vmatpush3.bf16.msra.mxu0 %v6584_v27 }
 0xc6d   :  { %5220 = vmatprep.subr.bf16.mxu0 %v6590_v30 }
 0xc70   :  { %5222 = vmatpush3.bf16.msra.mxu0 %v6590_v30 }
 0xc71   :  { %5224 = vmatprep.subr.bf16.mxu0 %v6596_v33 }
 0xc74   :  { %5226 = vmatpush3.bf16.msra.mxu0 %v6596_v33 }
 0xc75   :  { %5228 = vmatprep.subr.bf16.mxu0 %v6602_v36 }
 0xc78   :  { %5230 = vmatpush3.bf16.msra.mxu0 %v6602_v36 }
 0xd26   :  { %v2502_v24 = vpop.f32.mrb[28].mxu1 }
 0xd27   :  { %v2503_v27 = vadd.f32 %v2502_v24, %v2328_v18  ;;  %v2504_v30 = vpop.f32.mrb[29].mxu1 }
 0xd28   :  { %v2505_v9 = vadd.f32 %v2504_v30, %v2332_v21  ;;  %v2506_v22 = vpop.f32.mrb[30].mxu1  ;;  %v5761_v30 = vld [vmem:[%s7308_s16 + $0x18] sm:$0xff] }
 0xd29   :  { %v2570_v33 = vmul.f32 0.17677669, %v2503_v27  ;;  %v6970_v1 = vadd.f32 %v2506_v22, %v2328_v18  ;;  %v2508_v36 = vpop.f32.mrb[31].mxu1  ;;  %v5760_v27 = vld [vmem:[%s7308_s16 + $0x70] sm:$0xff] }
 0xd2a   :  { %v2509_v2 = vadd.f32 %v2508_v36, %v2332_v21  ;;  %v2574_v7 = vmul.f32 %v5749_v46, %v2505_v9  ;;  %v2578_v61 = vmul.f32 %v5750_v57, %v2505_v9  ;;  %v2582_v37 = vmul.f32 %v6975_v49, %v2505_v9 }
 0xd2b   :  { %4969 = vmatprep.mubr.f32.mxu1 %v2570_v33  ;;  %v2586_v50 = vmul.f32 %v6979_v51, %v2505_v9  ;;  %v5762_v33 = vld [vmem:[%s7308_s16 + $0x38] sm:$0xff] }
 0xd2c   :  { %v2575_v34 = vmul.f32 %v5753_v52, %v2509_v2  ;;  %v2579_v45 = vmul.f32 %v5754_v29, %v2509_v2  ;;  %v2583_v56 = vmul.f32 %v5755_v25, %v2509_v2  ;;  %v2587_v28 = vmul.f32 %v6986_v35, %v2509_v2  ;;  %v5763_v2 = vld [vmem:[%s7308_s16 + $0x58] sm:$0xff] }
 0xd2e   :  { %v5167_v4 = vpack.c.bf16 %v2575_v34, %v2574_v7  ;;  %v6990_v59 = vpack.c.bf16 %v2579_v45, %v2578_v61  ;;  %v6992_v12 = vpack.c.bf16 %v2583_v56, %v2582_v37  ;;  %v6994_v8 = vpack.c.bf16 %v2587_v28, %v2586_v50  ;;  %v2512_v43 = vpop.f32.mrb[32].mxu1  ;;  %v4935_v15 = vpop.f32.mrb[32].mxu0  ;;  %v5764_v7 = vld [vmem:[%s7308_s16 + $0x78] sm:$0xff] }
 0xd2f   :  { %v6996_v19 = vadd.f32 %v2512_v43, %v2328_v18  ;;  %v2564_v32 = vadd.f32 %v4935_v15, %v2336_v16  ;;  %v2514_v62 = vpop.f32.mrb[33].mxu1  ;;  %v2555_v5 = vpop.f32.mrb[33].mxu0 }
 0xd30   :  { %5168 = vmatprep.subr.bf16.mxu1 %v5167_v4  ;;  %v2515_v54 = vadd.f32 %v2514_v62, %v2332_v21  ;;  %v2556_v41 = vadd.f32 %v2555_v5, %v2336_v16  ;;  %v2516_v17 = vpop.f32.mrb[34].mxu1  ;;  %v4936_v26 = vpop.f32.mrb[34].mxu0 }
 0xd31   :  { %5170 = vmatpush3.bf16.xpose.msra.mxu1 %v5167_v4  ;;  %v6998_v20 = vadd.f32 %v2516_v17, %v2328_v18  ;;  %v2567_v13 = vadd.f32 %v4936_v26, %v2336_v16  ;;  %v2518_v48 = vpop.f32.mrb[35].mxu1  ;;  %v2558_v38 = vpop.f32.mrb[35].mxu0  ;;  %v2592_v55 = vmul.f32 %v5757_v6, %v2564_v32 }
 0xd32   :  { %v2519_v31 = vadd.f32 %v2518_v48, %v2332_v21  ;;  %v2559_v0 = vadd.f32 %v2558_v38, %v2336_v16  ;;  %v2576_v11 = vmul.f32 %v5757_v6, %v2515_v54  ;;  %v2590_v60 = vmul.f32 %v5749_v46, %v2556_v41 }
 0xd33   :  { %v2580_v53 = vmul.f32 %v5758_v10, %v2515_v54  ;;  %v2584_v24 = vmul.f32 %v5759_v47, %v2515_v54  ;;  %v2588_v18 = vmul.f32 %v5760_v27, %v2515_v54  ;;  %v2593_v37 = vmul.f32 %v5761_v30, %v2567_v13 }
 0xd34   :  { %v2577_v9 = vmul.f32 %v5761_v30, %v2519_v31  ;;  %v2591_v22 = vmul.f32 %v5753_v52, %v2559_v0  ;;  %v2581_v36 = vmul.f32 %v5762_v33, %v2519_v31  ;;  %v2585_v21 = vmul.f32 %v5763_v2, %v2519_v31 }
 0xd35   :  { %v2589_v61 = vmul.f32 %v5764_v7, %v2519_v31  ;;  %v2594_v50 = vmul.f32 %v5750_v57, %v2556_v41  ;;  %v2595_v34 = vmul.f32 %v5754_v29, %v2559_v0  ;;  %v7010_v4 = vpack.c.bf16 %v2593_v37, %v2592_v55  ;;  %v5767_v55 = vld [vmem:[%s7309_s13 + $0x18] sm:$0xff] }
 0xd36   :  { %v5171_v45 = vpack.c.bf16 %v2577_v9, %v2576_v11  ;;  %v7008_v46 = vpack.c.bf16 %v2591_v22, %v2590_v60  ;;  %v5179_v56 = vpack.c.bf16 %v2581_v36, %v2580_v53  ;;  %v5187_v28 = vpack.c.bf16 %v2585_v21, %v2584_v24 }
 0xd37   :  { %v5195_v16 = vpack.c.bf16 %v2589_v61, %v2588_v18  ;;  %v7012_v43 = vpack.c.bf16 %v2595_v34, %v2594_v50  ;;  %v2596_v52 = vmul.f32 %v5758_v10, %v2564_v32  ;;  %v2597_v15 = vmul.f32 %v5762_v33, %v2567_v13  ;;  %v5768_v10 = vld [vmem:[%s7309_s13 + $0x10] sm:$0xff]  ;;  %v5473_v50 = vld [vmem:[#allocation21] sm:$0xff]   ;;  %v5474_v34 = vld [vmem:[#allocation21 + $0x8] sm:$0xff]  }
 0xd38   :  { %5172 = vmatprep.subr.bf16.mxu1 %v5171_v45  ;;  %5232 = vmatprep.subr.bf16.mxu0 %v7008_v46  ;;  %v2598_v62 = vmul.f32 %v6975_v49, %v2556_v41  ;;  %v2599_v5 = vmul.f32 %v5755_v25, %v2559_v0  ;;  %v2600_v57 = vmul.f32 %v5759_v47, %v2564_v32  ;;  %v2572_v25 = vmul.f32 0.17677669, %v6996_v19 }
 0xd39   :  { %5174 = vmatpush3.bf16.xpose.msra.mxu1 %v5171_v45  ;;  %v2601_v29 = vmul.f32 %v5763_v2, %v2567_v13  ;;  %v2602_v54 = vmul.f32 %v6979_v51, %v2556_v41  ;;  %v2603_v17 = vmul.f32 %v6986_v35, %v2559_v0  ;;  %v7019_v26 = vpack.c.bf16 %v2597_v15, %v2596_v52  ;;  %v5475_v45 = vld [vmem:[#allocation21 + $0x10] sm:$0xff]  }
 0xd3a   :  { %5176 = vmatprep.subr.bf16.mxu1 %v6990_v59  ;;  %v7021_v48 = vpack.c.bf16 %v2599_v5, %v2598_v62  ;;  %v2604_v38 = vmul.f32 %v5760_v27, %v2564_v32  ;;  %v2605_v31 = vmul.f32 %v5764_v7, %v2567_v13  ;;  %v2571_v51 = vmul.f32 0.17677669, %v6970_v1  ;;  %v5766_v13 = vld [vmem:[%s7309_s13] sm:$0xff] }
 0xd3b   :  { %v7023_v6 = vpack.c.bf16 %v2601_v29, %v2600_v57  ;;  %v7025_v11 = vpack.c.bf16 %v2603_v17, %v2602_v54  ;;  %v2573_v35 = vmul.f32 0.17677669, %v6998_v20 }
 0xd3c   :  { %v7027_v49 = vpack.c.bf16 %v2605_v31, %v2604_v38  ;;  %v5480_v38 = vld [vmem:[#allocation21 + $0x38] sm:$0xff]  }
 0xd41   :  { %5178 = vmatpush3.bf16.xpose.msra.mxu1 %v6990_v59 }
 0xd42   :  { %5180 = vmatprep.subr.bf16.mxu1 %v5179_v56 }
 0xd49   :  { %5182 = vmatpush3.bf16.xpose.msra.mxu1 %v5179_v56  ;;  %v5477_v56 = vld [vmem:[#allocation21 + $0x20] sm:$0xff]  }
 0xd4a   :  { %5184 = vmatprep.subr.bf16.mxu1 %v6992_v12 }
 0xd51   :  { %5186 = vmatpush3.bf16.xpose.msra.mxu1 %v6992_v12  ;;  %v5765_v12 = vld [vmem:[%s7309_s13 + $0x8] sm:$0xff] }
 0xd52   :  { %5188 = vmatprep.subr.bf16.mxu1 %v5187_v28 }
 0xd59   :  { %5190 = vmatpush3.bf16.xpose.msra.mxu1 %v5187_v28  ;;  %v5478_v28 = vld [vmem:[#allocation21 + $0x28] sm:$0xff]  }
 0xd5a   :  { %5192 = vmatprep.subr.bf16.mxu1 %v6994_v8 }
 0xd61   :  { %5194 = vmatpush3.bf16.xpose.msra.mxu1 %v6994_v8 }
 0xd62   :  { %5196 = vmatprep.subr.bf16.mxu1 %v5195_v16 }
 0xd69   :  { %5198 = vmatpush3.bf16.xpose.msra.mxu1 %v5195_v16 }
 0xd6a   :  { %5051 = vmatprep.subr.bf16.mxu1 %v5473_v50 }
 0xd70   :  { %4970 = vmatmul.mubr.f32.vlgmr.msra.gmra.mrb[36].mxu1 %v2571_v51 }
 0xd71   :  { %4972 = vmatprep.mubr.f32.mxu1 %v2572_v25  ;;  %5052 = vmatpush3.bf16.msra.mxu1 %v5473_v50 }
 0xd72   :  { %5053 = vmatprep.subr.bf16.mxu1 %v5474_v34 }
 0xd74   :  { %4973 = vmatmul.mubr.f32.gmra.mrb[38].mxu1 %v2573_v35  ;;  %v4381_v35 = vld [vmem:[%s7314_s25] ss:$0 sm:$0xff] }
 0xd75   :  { %5054 = vmatpush3.bf16.msra.mxu1 %v5474_v34 }
 0xd76   :  { %5055 = vmatprep.subr.bf16.mxu1 %v5475_v45 }
 0xd79   :  { %5056 = vmatpush3.bf16.msra.mxu1 %v5475_v45 }
 0xe43   :  { %v4971_v59 = vpop.f32.mrb[36].mxu1 }
 0xe44   :  { %v2678_v32 = vadd.f32 %v5765_v12, %v4971_v59  ;;  %v2672_v41 = vpop.f32.mrb[37].mxu1 }
 0xe45   :  { %v2673_v0 = vadd.f32 %v5766_v13, %v2672_v41 }
 0xe46   :  { %2693 = vmax.xlane.f32.xlu1 %v2678_v32 }
 0xe47   :  { %2691 = vmax.xlane.f32.xlu0 %v2673_v0  ;;  %v4974_v8 = vpop.f32.mrb[38].mxu1 }
 0xe48   :  { %v2688_v60 = vadd.f32 %v5767_v55, %v4974_v8  ;;  %v2682_v1 = vpop.f32.mrb[39].mxu1 }
 0xe49   :  { %v2683_v19 = vadd.f32 %v5768_v10, %v2682_v1 }
 0xe4a   :  { %2697 = vmax.xlane.f32.xlu1 %v2688_v60 }
 0xe4b   :  { %2695 = vmax.xlane.f32.xlu0 %v2683_v19 }
 0xed3   :  { %v2694_v53 = vpop.xlane.xlu1 %2693 }
 0xed4   :  { %v2700_v47 = vsub.f32 %v2678_v32, %v2694_v53  ;;  %v2692_v20 = vpop.xlane.xlu0 %2691  ;;  %v5483_v53 = vld [vmem:[#allocation22 + $0x4] ss:$16 sps:$4 sm:$0xff]  }
 0xed5   :  { %v2699_v24 = vsub.f32 %v2673_v0, %v2692_v20  ;;  %v5486_v20 = vld [vmem:[#allocation22 + $0xc] ss:$16 sps:$4 sm:$0xff]  }
 0xed6   :  { %v2705_v27 = vmul.f32 1.442695, %v2700_v47  ;;  %v5484_v47 = vld [vmem:[#allocation22 + $0x8] ss:$16 sps:$4 sm:$0xff]  }
 0xed7   :  { %v2703_v18 = vmul.f32 1.442695, %v2699_v24  ;;  %v2698_v30 = vpop.xlane.xlu1 %2697  ;;  %v5492_v24 = vld [vmem:[#allocation22 + $0x2c] ss:$16 sps:$4 sm:$0xff]  }
 0xed8   :  { %v2702_v9 = vsub.f32 %v2688_v60, %v2698_v30  ;;  %v2696_v22 = vpop.xlane.xlu0 %2695 }
 0xed9   :  { %5681 = vpow2.f32 %v2703_v18  ;;  %v2701_v33 = vsub.f32 %v2683_v19, %v2696_v22 }
 0xeda   :  { %5683 = vpow2.f32 %v2705_v27  ;;  %v2709_v36 = vmul.f32 1.442695, %v2702_v9  ;;  %v5490_v27 = vld [vmem:[#allocation22 + $0x28] ss:$16 sps:$4 sm:$0xff]  }
 0xedb   :  { %v2707_v2 = vmul.f32 1.442695, %v2701_v33 }
 0xedd   :  { %5685 = vpow2.f32 %v2707_v2 }
 0xede   :  { %5687 = vpow2.f32 %v2709_v36 }
 0xee3   :  { %v5682_v21 = vpop.eup %5681 }
 0xee4   :  { %v5684_v7 = vpop.eup %5683  ;;  %5007 = vmatprep.mubr.f32.mxu0 %v5682_v21 }
 0xee5   :  { %5008 = vmatmul.mubr.f32.vlgmr.msra.gmra.mrb[36].mxu0 %v5684_v7 }
 0xee6   :  { %5234 = vmatpush3.bf16.msra.mxu0 %v7008_v46  ;;  %v5476_v46 = vld [vmem:[#allocation21 + $0x18] sm:$0xff]  }
 0xee7   :  { %v5686_v61 = vpop.eup %5685  ;;  %5236 = vmatprep.subr.bf16.mxu0 %v7010_v4  ;;  %5057 = vmatprep.subr.bf16.mxu1 %v5476_v46 }
 0xee8   :  { %v5688_v37 = vpop.eup %5687  ;;  %5010 = vmatprep.mubr.f32.mxu0 %v5686_v61  ;;  %5058 = vmatpush3.bf16.msra.mxu1 %v5476_v46 }
 0xee9   :  { %5011 = vmatmul.mubr.f32.gmra.mrb[38].mxu0 %v5688_v37  ;;  %5059 = vmatprep.subr.bf16.mxu1 %v5477_v56 }
 0xeea   :  { %5238 = vmatpush3.bf16.msra.mxu0 %v7010_v4 }
 0xeeb   :  { %5240 = vmatprep.subr.bf16.mxu0 %v7012_v43 }
 0xeec   :  { %5060 = vmatpush3.bf16.msra.mxu1 %v5477_v56  ;;  %v5495_v56 = vld [vmem:[#allocation22 + $0x44] ss:$16 sps:$4 sm:$0xff]  }
 0xeed   :  { %5061 = vmatprep.subr.bf16.mxu1 %v5478_v28 }
 0xeee   :  { %5242 = vmatpush3.bf16.msra.mxu0 %v7012_v43 }
 0xeef   :  { %5244 = vmatprep.subr.bf16.mxu0 %v7019_v26 }
 0xef0   :  { %5062 = vmatpush3.bf16.msra.mxu1 %v5478_v28  ;;  %v5498_v28 = vld [vmem:[#allocation22 + $0x4c] ss:$16 sps:$4 sm:$0xff]  }
 0xef2   :  { %5246 = vmatpush3.bf16.msra.mxu0 %v7019_v26 }
 0xef3   :  { %5248 = vmatprep.subr.bf16.mxu0 %v7021_v48 }
 0xef6   :  { %5250 = vmatpush3.bf16.msra.mxu0 %v7021_v48  ;;  %v5479_v48 = vld [vmem:[#allocation21 + $0x30] sm:$0xff]  }
 0xef7   :  { %5252 = vmatprep.subr.bf16.mxu0 %v7023_v6  ;;  %5063 = vmatprep.subr.bf16.mxu1 %v5479_v48 }
 0xef8   :  { %5064 = vmatpush3.bf16.msra.mxu1 %v5479_v48  ;;  %v5514_v48 = vld [vmem:[#allocation22 + $0xa8] ss:$16 sps:$4 sm:$0xff]  }
 0xef9   :  { %5065 = vmatprep.subr.bf16.mxu1 %v5480_v38 }
 0xefa   :  { %5254 = vmatpush3.bf16.msra.mxu0 %v7023_v6 }
 0xefb   :  { %5256 = vmatprep.subr.bf16.mxu0 %v7025_v11 }
 0xefc   :  { %5066 = vmatpush3.bf16.msra.mxu1 %v5480_v38  ;;  %v5516_v38 = vld [vmem:[#allocation22 + $0xac] ss:$16 sps:$4 sm:$0xff]  }
 0xefd   :  { %3298 = vmatprep.subr.bf16.mxu1 %v5486_v20 }
 0xefe   :  { %5258 = vmatpush3.bf16.msra.mxu0 %v7025_v11 }
 0xeff   :  { %5260 = vmatprep.subr.bf16.mxu0 %v7027_v49 }
 0xf02   :  { %5262 = vmatpush3.bf16.msra.mxu0 %v7027_v49 }
 0xf03   :  { %3245 = vmatprep.subr.bf16.mxu0 %v5483_v53 }
 0xfb8   :  { %v5009_v16 = vpop.f32.mrb[36].mxu0 }
 0xfb9   :  { %5689 = vrcp.f32 %v5009_v16  ;;  %v2777_v4 = vpop.f32.mrb[37].mxu0  ;;  %v5493_v16 = vld [vmem:[#allocation22 + $0x40] ss:$16 sps:$4 sm:$0xff]  }
 0xfba   :  { %5691 = vrcp.f32 %v2777_v4  ;;  %v5496_v4 = vld [vmem:[#allocation22 + $0x48] ss:$16 sps:$4 sm:$0xff]  }
 0xfbc   :  { %v5012_v43 = vpop.f32.mrb[38].mxu0 }
 0xfbd   :  { %5693 = vrcp.f32 %v5012_v43  ;;  %v2787_v52 = vpop.f32.mrb[39].mxu0  ;;  %v5501_v43 = vld [vmem:[#allocation22 + $0x64] ss:$16 sps:$4 sm:$0xff]  }
 0xfbe   :  { %5695 = vrcp.f32 %v2787_v52  ;;  %v5504_v52 = vld [vmem:[#allocation22 + $0x6c] ss:$16 sps:$4 sm:$0xff]  }
 0xfc3   :  { %v5690_v15 = vpop.eup %5689 }
 0xfc4   :  { %v5692_v62 = vpop.eup %5691  ;;  %v2799_v57 = vmul.f32 %v5690_v15, %v5684_v7  ;;  %v5499_v15 = vld [vmem:[#allocation22 + $0x60] ss:$16 sps:$4 sm:$0xff]  }
 0xfc5   :  { %v2797_v5 = vmul.f32 %v5692_v62, %v5682_v21  ;;  %v5502_v62 = vld [vmem:[#allocation22 + $0x68] ss:$16 sps:$4 sm:$0xff]  }
 0xfc7   :  { %v5694_v29 = vpop.eup %5693  ;;  %5045 = vmatprep.mubr.f32.mxu0 %v2797_v5  ;;  %v5507_v5 = vld [vmem:[#allocation22 + $0x84] ss:$16 sps:$4 sm:$0xff]  }
 0xfc8   :  { %v5696_v54 = vpop.eup %5695  ;;  %5046 = vmatmul.mubr.f32.vlgmr.msra.gmra.mrb[40].mxu0 %v2799_v57  ;;  %v2803_v26 = vmul.f32 %v5694_v29, %v5688_v37  ;;  %v5510_v57 = vld [vmem:[#allocation22 + $0x8c] ss:$16 sps:$4 sm:$0xff]   ;;  %v5505_v29 = vld [vmem:[#allocation22 + $0x80] ss:$16 sps:$4 sm:$0xff]  }
 0xfc9   :  { %v2801_v17 = vmul.f32 %v5696_v54, %v5686_v61  ;;  %v5508_v54 = vld [vmem:[#allocation22 + $0x88] ss:$16 sps:$4 sm:$0xff]  }
 0xfcb   :  { %5048 = vmatprep.mubr.f32.mxu0 %v2801_v17  ;;  %v5513_v17 = vld [vmem:[#allocation22 + $0xa4] ss:$16 sps:$4 sm:$0xff]  }
 0xfcc   :  { %5049 = vmatmul.mubr.f32.gmra.mrb[42].mxu0 %v2803_v26  ;;  %v5511_v26 = vld [vmem:[#allocation22 + $0xa0] ss:$16 sps:$4 sm:$0xff]  }
 0xfcd   :  { %3277 = vmatprep.mubr.bf16.mxu0 %v6264_v39 }
0x109b   :  { %v5047_v31 = vpop.f32.mrb[40].mxu0 }
0x109c   :  { %v2870_v6 = vpop.f32.mrb[41].mxu0 }
0x109d   :  { %v2889_v11 = vpack.c.bf16 %v5047_v31, %v2870_v6  ;;  %v5519_v31 = vld [vmem:[#allocation22 + $0xc4] ss:$16 sps:$4 sm:$0xff]   ;;  %v5522_v6 = vld [vmem:[#allocation22 + $0xcc] ss:$16 sps:$4 sm:$0xff]  }
0x109f   :  { %v5050_v49 = vpop.f32.mrb[42].mxu0  ;;  %5067 = vmatprep.mubr.bf16.mxu1 %v2889_v11  ;;  %v5517_v11 = vld [vmem:[#allocation22 + $0xc0] ss:$16 sps:$4 sm:$0xff]  }
0x10a0   :  { %v2880_v51 = vpop.f32.mrb[43].mxu0 }
0x10a1   :  { %v2890_v25 = vpack.c.bf16 %v5050_v49, %v2880_v51  ;;  %v5520_v49 = vld [vmem:[#allocation22 + $0xc8] ss:$16 sps:$4 sm:$0xff]   ;;  %v5525_v51 = vld [vmem:[#allocation22 + $0xe4] ss:$16 sps:$4 sm:$0xff]  }
0x10a3   :  { %5068 = vmatmul.mubr.bf16.vlgmr.msra.gmra.mrb[40].mxu1 %v2890_v25  ;;  %v5528_v25 = vld [vmem:[#allocation22 + $0xec] ss:$16 sps:$4 sm:$0xff]  }
0x10a4   :  { %3330 = vmatprep.mubr.bf16.mxu1 %v6264_v39  ;;  %3299 = vmatpush1.bf16.msra.mxu1 %v5484_v47 }
0x10a5   :  { %3300 = vmatprep.subr.bf16.mxu1 %v5492_v24 }
0x10a8   :  { %3301 = vmatpush1.bf16.msra.mxu1 %v5490_v27 }
0x10a9   :  { %3302 = vmatprep.subr.bf16.mxu1 %v5498_v28 }
0x10ac   :  { %3303 = vmatpush1.bf16.msra.mxu1 %v5496_v4  ;;  %v5529_v4 = vld [vmem:[#allocation25 + $0x40] sm:$0xff]  }
0x10ad   :  { %3304 = vmatprep.subr.bf16.mxu1 %v5504_v52  ;;  %v5531_v52 = vld [vmem:[#allocation25] sm:$0xff]  }
0x10b0   :  { %3305 = vmatpush1.bf16.msra.mxu1 %v5502_v62  ;;  %v5535_v62 = vld [vmem:[#allocation25 + $0x8] sm:$0xff]  }
0x10b1   :  { %3306 = vmatprep.subr.bf16.mxu1 %v5510_v57  ;;  %v5537_v57 = vld [vmem:[#allocation25 + $0x50] sm:$0xff]  }
0x10b4   :  { %3307 = vmatpush1.bf16.msra.mxu1 %v5508_v54  ;;  %v5539_v54 = vld [vmem:[#allocation25 + $0x10] sm:$0xff]  }
0x10b5   :  { %3308 = vmatprep.subr.bf16.mxu1 %v5516_v38  ;;  %v5543_v38 = vld [vmem:[#allocation25 + $0x18] sm:$0xff]  }
0x10b8   :  { %3309 = vmatpush1.bf16.msra.mxu1 %v5514_v48  ;;  %v5542_v48 = vld [vmem:[#allocation25 + $0xd8] sm:$0xff]  }
0x10b9   :  { %3310 = vmatprep.subr.bf16.mxu1 %v5522_v6  ;;  %v5545_v6 = vld [vmem:[#allocation25 + $0x60] sm:$0xff]  }
0x10bc   :  { %3311 = vmatpush1.bf16.msra.mxu1 %v5520_v49  ;;  %v5547_v49 = vld [vmem:[#allocation25 + $0x20] sm:$0xff]  }
0x10bd   :  { %3312 = vmatprep.subr.bf16.mxu1 %v5528_v25  ;;  %v5549_v25 = vld [vmem:[#allocation25 + $0x68] sm:$0xff]  }
0x1176   :  { %v5069_v59 = vpop.f32.mrb[40].mxu1 }
0x1177   :  { %v2979_v12 = vpop.f32.mrb[41].mxu1  ;;  %v2988_v0 = vadd.f32 %v5069_v59, %v4381_v35  ;;  %v5526_v59 = vld [vmem:[#allocation22 + $0xe8] ss:$16 sps:$4 sm:$0xff]  }
0x1178   :  { %v2980_v32 = vadd.f32 %v4381_v35, %v2979_v12  ;;  %v5070_v41 = vpop.f32.mrb[42].mxu1  ;;  %3313 = vmatpush1.bf16.msra.mxu1 %v5526_v59  ;;  %v5551_v59 = vld [vmem:[#allocation25 + $0x28] sm:$0xff]  }
0x1179   :  { %v2982_v13 = vpop.f32.mrb[43].mxu1  ;;  %v2991_v60 = vadd.f32 %v5070_v41, %v4381_v35  ;;  %v7067_v10 = vadd.f32 %v2988_v0, %v6918_v3  ;;  %v5487_v3 = vld [vmem:[#allocation22 + $0x20] ss:$16 sps:$4 sm:$0xff]  }
0x117a   :  { %v7060_v8 = vadd.f32 %v2980_v32, %v6910_v14  ;;  %v2983_v55 = vadd.f32 %v4381_v35, %v2982_v13  ;;  %v5481_v14 = vld [vmem:[#allocation22] ss:$16 sps:$4 sm:$0xff]  }
0x117b   :  { %v7071_v19 = vadd.f32 %v2991_v60, %v6922_v58  ;;  %3246 = vmatpush1.bf16.msra.mxu0 %v5481_v14  ;;  %v5523_v35 = vld [vmem:[#allocation22 + $0xe0] ss:$16 sps:$4 sm:$0xff]  }
0x117c   :  { %v7063_v1 = vadd.f32 %v2983_v55, %v6914_v23  ;;  %2998 = vadd.xlane.f32.xlu0 %v7060_v8  ;;  %v5489_v23 = vld [vmem:[#allocation22 + $0x24] ss:$16 sps:$4 sm:$0xff]  }
0x117d   :  { %3247 = vmatprep.subr.bf16.mxu0 %v5489_v23 }
0x117e   :  { %3000 = vadd.xlane.f32.xlu1 %v7063_v1 }
0x117f   :  { %3248 = vmatpush1.bf16.msra.mxu0 %v5487_v3  ;;  %v4390_v3 = vld [vmem:[%s7315_s23] ss:$0 sm:$0xff] }
0x1180   :  { %3002 = vadd.xlane.f32.xlu0 %v7067_v10  ;;  %3249 = vmatprep.subr.bf16.mxu0 %v5495_v56 }
0x1182   :  { %3004 = vadd.xlane.f32.xlu1 %v7071_v19 }
0x1183   :  { %3250 = vmatpush1.bf16.msra.mxu0 %v5493_v16 }
0x1184   :  { %3251 = vmatprep.subr.bf16.mxu0 %v5501_v43  ;;  %v5530_v43 = vld [vmem:[#allocation25 + $0xc0] sm:$0xff]  }
0x1185   :  { %4735 = vmatprep.subr.bf16.mxu1 %v5530_v43 }
0x1187   :  { %3252 = vmatpush1.bf16.msra.mxu0 %v5499_v15  ;;  %v5534_v15 = vld [vmem:[#allocation25 + $0xc8] sm:$0xff]  }
0x1188   :  { %3253 = vmatprep.subr.bf16.mxu0 %v5507_v5  ;;  %v5536_v5 = vld [vmem:[#allocation25 + $0x88] sm:$0xff]  }
0x118b   :  { %3254 = vmatpush1.bf16.msra.mxu0 %v5505_v29  ;;  %v5538_v29 = vld [vmem:[#allocation25 + $0xd0] sm:$0xff]  }
0x118c   :  { %3255 = vmatprep.subr.bf16.mxu0 %v5513_v17  ;;  %v5540_v17 = vld [vmem:[#allocation25 + $0x90] sm:$0xff]  }
0x118f   :  { %3256 = vmatpush1.bf16.msra.mxu0 %v5511_v26  ;;  %v5541_v26 = vld [vmem:[#allocation25 + $0x58] sm:$0xff]  }
0x1190   :  { %3257 = vmatprep.subr.bf16.mxu0 %v5519_v31  ;;  %v5544_v31 = vld [vmem:[#allocation25 + $0x98] sm:$0xff]  }
0x1193   :  { %3258 = vmatpush1.bf16.msra.mxu0 %v5517_v11  ;;  %v5546_v11 = vld [vmem:[#allocation25 + $0xe0] sm:$0xff]  }
0x1194   :  { %3259 = vmatprep.subr.bf16.mxu0 %v5525_v51  ;;  %v5548_v51 = vld [vmem:[#allocation25 + $0xa0] sm:$0xff]  }
0x1197   :  { %3260 = vmatpush1.bf16.msra.mxu0 %v5523_v35  ;;  %v5550_v35 = vld [vmem:[#allocation25 + $0xe8] sm:$0xff]  }
0x1198   :  { %4707 = vmatprep.subr.bf16.mxu0 %v5529_v4 }
0x1209   :  { %v2999_v58 = vpop.xlane.xlu0 %2998 }
0x120a   :  { %v3006_v18 = vmul.f32 0.0078125, %v2999_v58 }
0x120b   :  { %v3001_v30 = vpop.xlane.xlu1 %3000 }
0x120c   :  { %v7076_v9 = vsub.f32 %v7060_v8, %v3006_v18  ;;  %v3007_v22 = vmul.f32 0.0078125, %v3001_v30 }
0x120d   :  { %v3003_v33 = vpop.xlane.xlu0 %3002 }
0x120e   :  { %v7079_v36 = vsub.f32 %v7063_v1, %v3007_v22  ;;  %v3008_v2 = vmul.f32 0.0078125, %v3003_v33  ;;  %v3014_v21 = vmul.f32 %v7076_v9, %v7076_v9  ;;  %v4391_v33 = vld [vmem:[%s7316_s12] ss:$0 sm:$0xff] }
0x120f   :  { %v3005_v7 = vpop.xlane.xlu1 %3004 }
0x1210   :  { %v7084_v61 = vsub.f32 %v7067_v10, %v3008_v2  ;;  %v3009_v37 = vmul.f32 0.0078125, %v3005_v7  ;;  %3018 = vadd.xlane.f32.xlu0 %v3014_v21  ;;  %v3015_v50 = vmul.f32 %v7079_v36, %v7079_v36 }
0x1212   :  { %v7089_v34 = vsub.f32 %v7071_v19, %v3009_v37  ;;  %3020 = vadd.xlane.f32.xlu1 %v3015_v50  ;;  %v3016_v45 = vmul.f32 %v7084_v61, %v7084_v61 }
0x1214   :  { %3022 = vadd.xlane.f32.xlu0 %v3016_v45  ;;  %v3017_v46 = vmul.f32 %v7089_v34, %v7089_v34 }
0x1216   :  { %3024 = vadd.xlane.f32.xlu1 %v3017_v46 }
0x129d   :  { %v3019_v12 = vpop.xlane.xlu0 %3018 }
0x129e   :  { %v3026_v32 = vmul.f32 0.0078125, %v3019_v12  ;;  %v5552_v12 = vld [vmem:[#allocation25 + $0xa8] sm:$0xff]  }
0x129f   :  { %v3021_v41 = vpop.xlane.xlu1 %3020 }
0x12a0   :  { %v3030_v13 = vadd.f32 1e-05, %v3026_v32  ;;  %v3027_v0 = vmul.f32 0.0078125, %v3021_v41  ;;  %v5553_v32 = vld [vmem:[#allocation25 + $0x70] sm:$0xff]  }
0x12a1   :  { %v3023_v55 = vpop.xlane.xlu0 %3022  ;;  %v5554_v41 = vld [vmem:[#allocation25 + $0xf0] sm:$0xff]  }
0x12a2   :  { %5697 = vrsqrt.f32 %v3030_v13  ;;  %v3031_v60 = vadd.f32 1e-05, %v3027_v0  ;;  %v3028_v14 = vmul.f32 0.0078125, %v3023_v55  ;;  %v5555_v13 = vld [vmem:[#allocation25 + $0x30] sm:$0xff]   ;;  %v5557_v55 = vld [vmem:[#allocation25 + $0x78] sm:$0xff]  }
0x12a3   :  { %v3025_v53 = vpop.xlane.xlu1 %3024  ;;  %v5556_v0 = vld [vmem:[#allocation25 + $0xb0] sm:$0xff]  }
0x12a4   :  { %5699 = vrsqrt.f32 %v3031_v60  ;;  %v3032_v47 = vadd.f32 1e-05, %v3028_v14  ;;  %v3029_v20 = vmul.f32 0.0078125, %v3025_v53  ;;  %v5558_v60 = vld [vmem:[#allocation25 + $0xf8] sm:$0xff]  }
0x12a5   :  { %v5559_v14 = vld [vmem:[#allocation25 + $0x38] sm:$0xff]  }
0x12a6   :  { %5701 = vrsqrt.f32 %v3032_v47  ;;  %v3033_v23 = vadd.f32 1e-05, %v3029_v20  ;;  %v5560_v53 = vld [vmem:[#allocation25 + $0xb8] sm:$0xff]  }
0x12a7   :  { %v2192_v47 = vld [vmem:[#allocation24] sm:$0xf] }
0x12a8   :  { %5703 = vrsqrt.f32 %v3033_v23  ;;  %v7104_v20 = vrot.slane %v2192_v47, %v6609_v40  ;;  %v7107_v23 = vrot.slane %v2192_v47, %v6616_v44 }
0x12ac   :  { %v5698_v24 = vpop.eup %5697 }
0x12ad   :  { %v3038_v27 = vmul.f32 %v5698_v24, %v7076_v9 }
0x12ae   :  { %v5700_v58 = vpop.eup %5699 }
0x12af   :  { %v3048_v18 = vmul.f32 %v4390_v3, %v3038_v27  ;;  %v3039_v30 = vmul.f32 %v5700_v58, %v7079_v36  ;;  %v7110_v27 = vrot.slane %v2192_v47, %v6612_v42 }
0x12b0   :  { %v5702_v22 = vpop.eup %5701 }
0x12b1   :  { %v3049_v2 = vmul.f32 %v4390_v3, %v3039_v30  ;;  %v3058_v7 = vadd.f32 %v4391_v33, %v3048_v18  ;;  %v3040_v50 = vmul.f32 %v5702_v22, %v7084_v61  ;;  %v5532_v61 = vld [vmem:[#allocation25 + $0x80] sm:$0xff]  }
0x12b2   :  { %v5704_v21 = vpop.eup %5703 }
0x12b3   :  { %v3059_v37 = vadd.f32 %v4391_v33, %v3049_v2  ;;  %v3041_v45 = vmul.f32 %v5704_v21, %v7089_v34  ;;  %v3050_v28 = vmul.f32 %v4390_v3, %v3040_v50  ;;  %v5533_v34 = vld [vmem:[#allocation25 + $0x48] sm:$0xff]  }
0x12b5   :  { %v3062_v46 = vpack.c.bf16 %v3059_v37, %v3058_v7  ;;  %v3051_v56 = vmul.f32 %v4390_v3, %v3041_v45  ;;  %v3060_v36 = vadd.f32 %v4391_v33, %v3050_v28 }
0x12b7   :  { %3278 = vmatmul.mubr.bf16.vlgmr.msra.gmra.mrb[44].mxu0 %v3062_v46  ;;  %3331 = vmatmul.mubr.bf16.vlgmr.msra.gmra.mrb[44].mxu1 %v3062_v46  ;;  %v3061_v9 = vadd.f32 %v4391_v33, %v3051_v56  ;;  %v7115_v33 = vrot.slane %v2192_v47, %v6787_v63 }
0x12b8   :  { %3287 = vmatprep.mubr.bf16.mxu0 %v6264_v39  ;;  %3340 = vmatprep.mubr.bf16.mxu1 %v6264_v39 }
0x12b9   :  { %v3063_v16 = vpack.c.bf16 %v3061_v9, %v3060_v36  ;;  %4708 = vmatpush3.bf16.msra.mxu0 %v5531_v52  ;;  %4736 = vmatpush3.bf16.msra.mxu1 %v5532_v61 }
0x12ba   :  { %4709 = vmatprep.subr.bf16.mxu0 %v5533_v34  ;;  %4737 = vmatprep.subr.bf16.mxu1 %v5534_v15 }
0x12bd   :  { %4710 = vmatpush3.bf16.msra.mxu0 %v5535_v62  ;;  %4738 = vmatpush3.bf16.msra.mxu1 %v5536_v5 }
0x12be   :  { %4711 = vmatprep.subr.bf16.mxu0 %v5537_v57  ;;  %4739 = vmatprep.subr.bf16.mxu1 %v5538_v29 }
0x12bf   :  { %3288 = vmatmul.mubr.bf16.gmra.mrb[48].mxu0 %v3063_v16  ;;  %3341 = vmatmul.mubr.bf16.gmra.mrb[48].mxu1 %v3063_v16 }
0x12c1   :  { %4712 = vmatpush3.bf16.msra.mxu0 %v5539_v54  ;;  %4740 = vmatpush3.bf16.msra.mxu1 %v5540_v17 }
0x12c2   :  { %4713 = vmatprep.subr.bf16.mxu0 %v5541_v26  ;;  %4741 = vmatprep.subr.bf16.mxu1 %v5542_v48 }
0x12c5   :  { %4714 = vmatpush3.bf16.msra.mxu0 %v5543_v38  ;;  %4742 = vmatpush3.bf16.msra.mxu1 %v5544_v31 }
0x12c6   :  { %4715 = vmatprep.subr.bf16.mxu0 %v5545_v6  ;;  %4743 = vmatprep.subr.bf16.mxu1 %v5546_v11 }
0x12c9   :  { %4716 = vmatpush3.bf16.msra.mxu0 %v5547_v49  ;;  %4744 = vmatpush3.bf16.msra.mxu1 %v5548_v51 }
0x12ca   :  { %4717 = vmatprep.subr.bf16.mxu0 %v5549_v25  ;;  %4745 = vmatprep.subr.bf16.mxu1 %v5550_v35 }
0x12cd   :  { %4718 = vmatpush3.bf16.msra.mxu0 %v5551_v59  ;;  %4746 = vmatpush3.bf16.msra.mxu1 %v5552_v12 }
0x12ce   :  { %4719 = vmatprep.subr.bf16.mxu0 %v5553_v32  ;;  %4747 = vmatprep.subr.bf16.mxu1 %v5554_v41 }
0x12d1   :  { %4720 = vmatpush3.bf16.msra.mxu0 %v5555_v13  ;;  %4748 = vmatpush3.bf16.msra.mxu1 %v5556_v0 }
0x12d2   :  { %4721 = vmatprep.subr.bf16.mxu0 %v5557_v55  ;;  %4749 = vmatprep.subr.bf16.mxu1 %v5558_v60 }
0x12d5   :  { %4722 = vmatpush3.bf16.msra.mxu0 %v5559_v14  ;;  %4750 = vmatpush3.bf16.msra.mxu1 %v5560_v53 }
0x138a   :  { %v3279_v24 = vpop.f32.mrb[44].mxu0  ;;  %v3332_v3 = vpop.f32.mrb[44].mxu1 }
0x138b   :  { %v3280_v58 = vadd.f32 %v3279_v24, %v7104_v20  ;;  %v3333_v18 = vadd.f32 %v3332_v3, %v7107_v23  ;;  %v3281_v30 = vpop.f32.mrb[45].mxu0  ;;  %v3334_v22 = vpop.f32.mrb[45].mxu1 }
0x138c   :  { %v3283_v2 = vpop.f32.mrb[46].mxu0  ;;  %v3336_v21 = vpop.f32.mrb[46].mxu1  ;;  %v7118_v50 = vadd.f32 %v3281_v30, %v7110_v27  ;;  %v7128_v4 = vadd.f32 %v3334_v22, %v7115_v33 }
0x138d   :  { %v3367_v7 = vmul.f32 0.044715, %v3280_v58  ;;  %v3369_v37 = vmul.f32 0.044715, %v3333_v18  ;;  %v3284_v45 = vadd.f32 %v3283_v2, %v7104_v20  ;;  %v7122_v46 = vadd.f32 %v3336_v21, %v7107_v23  ;;  %v3285_v56 = vpop.f32.mrb[47].mxu0  ;;  %v3338_v28 = vpop.f32.mrb[47].mxu1 }
0x138e   :  { %v7125_v16 = vadd.f32 %v3285_v56, %v7110_v27  ;;  %v7131_v52 = vadd.f32 %v3338_v28, %v7115_v33  ;;  %v7133_v61 = vmul.f32 0.5, %v3280_v58  ;;  %v3368_v5 = vmul.f32 0.044715, %v7118_v50 }
0x138f   :  { %v3383_v9 = vmul.f32 %v3367_v7, %v3280_v58  ;;  %v3385_v36 = vmul.f32 %v3369_v37, %v3333_v18  ;;  %v3371_v43 = vmul.f32 0.044715, %v3284_v45  ;;  %v3373_v62 = vmul.f32 0.044715, %v7122_v46 }
0x1390   :  { %v3372_v29 = vmul.f32 0.044715, %v7125_v16  ;;  %v7138_v48 = vmul.f32 0.5, %v3333_v18  ;;  %v3370_v49 = vmul.f32 0.044715, %v7128_v4  ;;  %v3384_v60 = vmul.f32 %v3368_v5, %v7118_v50 }
0x1391   :  { %v3399_v34 = vmul.f32 %v3383_v9, %v3280_v58  ;;  %v3401_v15 = vmul.f32 %v3385_v36, %v3333_v18  ;;  %v3387_v57 = vmul.f32 %v3371_v43, %v3284_v45  ;;  %v3389_v31 = vmul.f32 %v3373_v62, %v7122_v46 }
0x1392   :  { %v3289_v54 = vpop.f32.mrb[48].mxu0  ;;  %v3342_v17 = vpop.f32.mrb[48].mxu1  ;;  %v3374_v25 = vmul.f32 0.044715, %v7131_v52  ;;  %v3388_v53 = vmul.f32 %v3372_v29, %v7125_v16  ;;  %v3400_v56 = vmul.f32 %v3384_v60, %v7118_v50 }
0x1393   :  { %v3415_v26 = vadd.f32 %v3399_v34, %v3280_v58  ;;  %v3417_v38 = vadd.f32 %v3401_v15, %v3333_v18  ;;  %v3291_v6 = vpop.f32.mrb[49].mxu0  ;;  %v3344_v11 = vpop.f32.mrb[49].mxu1  ;;  %v3403_v51 = vmul.f32 %v3387_v57, %v3284_v45  ;;  %v7144_v35 = vadd.f32 %v3289_v54, %v7104_v20 }
0x1394   :  { %v3293_v59 = vpop.f32.mrb[50].mxu0  ;;  %v3346_v12 = vpop.f32.mrb[50].mxu1  ;;  %v3405_v13 = vmul.f32 %v3389_v31, %v7122_v46  ;;  %v7150_v47 = vadd.f32 %v3342_v17, %v7107_v23  ;;  %v7155_v58 = vadd.f32 %v3291_v6, %v7110_v27  ;;  %v3386_v18 = vmul.f32 %v3370_v49, %v7128_v4 }
0x1395   :  { %v3431_v32 = vmul.f32 0.7978846, %v3415_v26  ;;  %v3433_v41 = vmul.f32 0.7978846, %v3417_v38  ;;  %v3295_v0 = vpop.f32.mrb[51].mxu0  ;;  %v3348_v55 = vpop.f32.mrb[51].mxu1  ;;  %v3419_v14 = vadd.f32 %v3403_v51, %v3284_v45  ;;  %v3390_v22 = vmul.f32 %v3374_v25, %v7131_v52 }
0x1396   :  { %v3421_v24 = vadd.f32 %v3405_v13, %v7122_v46  ;;  %v3375_v3 = vmul.f32 0.044715, %v7144_v35  ;;  %v3376_v21 = vmul.f32 0.044715, %v7155_v58  ;;  %v7161_v7 = vadd.f32 %v3344_v11, %v7115_v33 }
0x1397   :  { %5705 = vtanh.f32 %v3431_v32  ;;  %v3435_v30 = vmul.f32 0.7978846, %v3419_v14  ;;  %v7164_v37 = vadd.f32 %v3293_v59, %v7104_v20  ;;  %v3404_v28 = vmul.f32 %v3388_v53, %v7125_v16 }
0x1398   :  { %5707 = vtanh.f32 %v3433_v41  ;;  %v3437_v2 = vmul.f32 0.7978846, %v3421_v24  ;;  %v7169_v9 = vadd.f32 %v3346_v12, %v7107_v23  ;;  %v3391_v36 = vmul.f32 %v3375_v3, %v7144_v35 }
0x1399   :  { %5709 = vtanh.f32 %v3435_v30  ;;  %v3377_v43 = vmul.f32 0.044715, %v7150_v47  ;;  %v3378_v34 = vmul.f32 0.044715, %v7161_v7  ;;  %v3355_v15 = vmul.f32 0.5, %v3284_v45 }
0x139a   :  { %5711 = vtanh.f32 %v3437_v2  ;;  %v3392_v62 = vmul.f32 %v3376_v21, %v7155_v58  ;;  %v7176_v20 = vadd.f32 %v3295_v0, %v7110_v27  ;;  %v7179_v5 = vadd.f32 %v3348_v55, %v7115_v33 }
0x139b   :  { %v3402_v57 = vmul.f32 %v3386_v18, %v7128_v4  ;;  %v3406_v23 = vmul.f32 %v3390_v22, %v7131_v52  ;;  %v3379_v29 = vmul.f32 0.044715, %v7164_v37  ;;  %v3381_v54 = vmul.f32 0.044715, %v7169_v9 }
0x139c   :  { %v3394_v17 = vmul.f32 %v3378_v34, %v7161_v7  ;;  %v3380_v45 = vmul.f32 0.044715, %v7176_v20  ;;  %v3382_v26 = vmul.f32 0.044715, %v7179_v5  ;;  %v3416_v27 = vadd.f32 %v3400_v56, %v7118_v50 }
0x139d   :  { %v3357_v38 = vmul.f32 0.5, %v7122_v46  ;;  %v3407_v33 = vmul.f32 %v3391_v36, %v7144_v35  ;;  %v3393_v31 = vmul.f32 %v3377_v43, %v7150_v47  ;;  %v3420_v6 = vadd.f32 %v3404_v28, %v7125_v16 }
0x139e   :  { %v3408_v11 = vmul.f32 %v3392_v62, %v7155_v58  ;;  %v3396_v49 = vmul.f32 %v3380_v45, %v7176_v20  ;;  %v3398_v51 = vmul.f32 %v3382_v26, %v7179_v5  ;;  %v3432_v25 = vmul.f32 0.7978846, %v3416_v27 }
0x139f   :  { %v3395_v12 = vmul.f32 %v3379_v29, %v7164_v37  ;;  %v3436_v32 = vmul.f32 0.7978846, %v3420_v6  ;;  %v3418_v41 = vadd.f32 %v3402_v57, %v7128_v4  ;;  %v3422_v46 = vadd.f32 %v3406_v23, %v7131_v52 }
0x13a0   :  { %v3410_v0 = vmul.f32 %v3394_v17, %v7161_v7  ;;  %v3397_v55 = vmul.f32 %v3381_v54, %v7169_v9  ;;  %v3412_v60 = vmul.f32 %v3396_v49, %v7176_v20  ;;  %5713 = vtanh.f32 %v3432_v25 }
0x13a1   :  { %v5706_v59 = vpop.eup %5705  ;;  %5715 = vtanh.f32 %v3436_v32  ;;  %v3434_v14 = vmul.f32 0.7978846, %v3418_v41  ;;  %v3438_v53 = vmul.f32 0.7978846, %v3422_v46  ;;  %v3409_v18 = vmul.f32 %v3393_v31, %v7150_v47 }
0x13a2   :  { %v5708_v13 = vpop.eup %5707  ;;  %v3463_v24 = vadd.f32 1.0, %v5706_v59  ;;  %v3414_v30 = vmul.f32 %v3398_v51, %v7179_v5  ;;  %v3424_v2 = vadd.f32 %v3408_v11, %v7155_v58  ;;  %v3411_v56 = vmul.f32 %v3395_v12, %v7164_v37 }
0x13a3   :  { %v5710_v3 = vpop.eup %5709  ;;  %v3465_v22 = vadd.f32 1.0, %v5708_v13  ;;  %5717 = vtanh.f32 %v3434_v14  ;;  %v3428_v36 = vadd.f32 %v3412_v60, %v7176_v20  ;;  %v3413_v43 = vmul.f32 %v3397_v55, %v7169_v9 }
0x13a4   :  { %v5712_v21 = vpop.eup %5711  ;;  %v3467_v28 = vadd.f32 1.0, %v5710_v3  ;;  %5719 = vtanh.f32 %v3438_v53  ;;  %v3440_v62 = vmul.f32 0.7978846, %v3424_v2  ;;  %v3479_v57 = vmul.f32 %v3463_v24, %v7133_v61 }
0x13a5   :  { %v3469_v34 = vadd.f32 1.0, %v5712_v21  ;;  %v3444_v29 = vmul.f32 0.7978846, %v3428_v36  ;;  %v3426_v54 = vadd.f32 %v3410_v0, %v7161_v7  ;;  %v3481_v17 = vmul.f32 %v3465_v22, %v7138_v48 }
0x13a6   :  { %v3483_v23 = vmul.f32 %v3467_v28, %v3355_v15  ;;  %5721 = vtanh.f32 %v3440_v62  ;;  %v3430_v26 = vadd.f32 %v3414_v30, %v7179_v5  ;;  %v3423_v49 = vadd.f32 %v3407_v33, %v7144_v35 }
0x13a7   :  { %v3485_v45 = vmul.f32 %v3469_v34, %v3357_v38  ;;  %5723 = vtanh.f32 %v3444_v29  ;;  %v3442_v31 = vmul.f32 0.7978846, %v3426_v54  ;;  %v3427_v51 = vadd.f32 %v3411_v56, %v7164_v37 }
0x13a8   :  { %v3495_v27 = vpack.c.bf16 %v3483_v23, %v3479_v57  ;;  %v3446_v11 = vmul.f32 0.7978846, %v3430_v26  ;;  %v3425_v61 = vadd.f32 %v3409_v18, %v7150_v47  ;;  %v3439_v25 = vmul.f32 0.7978846, %v3423_v49 }
0x13a9   :  { %v3497_v6 = vpack.c.bf16 %v3485_v45, %v3481_v17  ;;  %5725 = vtanh.f32 %v3442_v31  ;;  %v3443_v48 = vmul.f32 0.7978846, %v3427_v51  ;;  %v3429_v38 = vadd.f32 %v3413_v43, %v7169_v9 }
0x13aa   :  { %v5714_v15 = vpop.eup %5713  ;;  %5727 = vtanh.f32 %v3446_v11  ;;  %v3352_v12 = vmul.f32 0.5, %v7118_v50  ;;  %v3441_v41 = vmul.f32 0.7978846, %v3425_v61  ;;  %v3356_v46 = vmul.f32 0.5, %v7125_v16 }
0x13ab   :  { %v5716_v59 = vpop.eup %5715  ;;  %v3464_v32 = vadd.f32 1.0, %v5714_v15  ;;  %5729 = vtanh.f32 %v3439_v25  ;;  %v3445_v33 = vmul.f32 0.7978846, %v3429_v38  ;;  %v3354_v24 = vmul.f32 0.5, %v7128_v4 }
0x13ac   :  { %v3468_v13 = vadd.f32 1.0, %v5716_v59  ;;  %5731 = vtanh.f32 %v3443_v48  ;;  %v3358_v3 = vmul.f32 0.5, %v7131_v52  ;;  %v3360_v56 = vmul.f32 0.5, %v7155_v58 }
0x13ad   :  { %v5718_v0 = vpop.eup %5717  ;;  %v3480_v60 = vmul.f32 %v3464_v32, %v3352_v12  ;;  %5733 = vtanh.f32 %v3441_v41  ;;  %v3364_v28 = vmul.f32 0.5, %v7176_v20  ;;  %v3362_v23 = vmul.f32 0.5, %v7161_v7 }
0x13ae   :  { %v5720_v55 = vpop.eup %5719  ;;  %v3484_v14 = vmul.f32 %v3468_v13, %v3356_v46  ;;  %v3466_v53 = vadd.f32 1.0, %v5718_v0  ;;  %5735 = vtanh.f32 %v3445_v33  ;;  %v3366_v29 = vmul.f32 0.5, %v7179_v5 }
0x13af   :  { %v3470_v18 = vadd.f32 1.0, %v5720_v55  ;;  %v3363_v49 = vmul.f32 0.5, %v7164_v37  ;;  %v3361_v7 = vmul.f32 0.5, %v7150_v47  ;;  %v4424_v37 = vld [vmem:[#allocation27] ss:$0 sm:$0xff] }
0x13b0   :  { %v5722_v50 = vpop.eup %5721  ;;  %v3496_v30 = vpack.c.bf16 %v3484_v14, %v3480_v60  ;;  %v3482_v16 = vmul.f32 %v3466_v53, %v3354_v24 }
0x13b1   :  { %v5724_v22 = vpop.eup %5723  ;;  %v3486_v2 = vmul.f32 %v3470_v18, %v3358_v3  ;;  %v3472_v21 = vadd.f32 1.0, %v5722_v50 }
0x13b2   :  { %3733 = vmatprep.mubr.bf16.mxu0 %v3496_v30  ;;  %v3476_v36 = vadd.f32 1.0, %v5724_v22 }
0x13b3   :  { %v5726_v43 = vpop.eup %5725  ;;  %v3498_v34 = vpack.c.bf16 %v3486_v2, %v3482_v16  ;;  %3734 = vmatmul.mubr.bf16.vlgmr.msra.gmra.mrb[52].mxu0 %v3495_v27  ;;  %v3488_v62 = vmul.f32 %v3472_v21, %v3360_v56  ;;  %v3359_v27 = vmul.f32 0.5, %v7144_v35 }
0x13b4   :  { %v5728_v4 = vpop.eup %5727  ;;  %v3492_v52 = vmul.f32 %v3476_v36, %v3364_v28  ;;  %v3474_v57 = vadd.f32 1.0, %v5726_v43 }
0x13b5   :  { %3782 = vmatprep.mubr.bf16.mxu1 %v3498_v34  ;;  %v3478_v54 = vadd.f32 1.0, %v5728_v4  ;;  %v5730_v17 = vpop.eup %5729 }
0x13b6   :  { %3783 = vmatmul.mubr.bf16.vlgmr.msra.gmra.mrb[52].mxu1 %v3497_v6  ;;  %v3500_v45 = vpack.c.bf16 %v3492_v52, %v3488_v62  ;;  %v5732_v58 = vpop.eup %5731  ;;  %v3490_v26 = vmul.f32 %v3474_v57, %v3362_v23  ;;  %v3471_v31 = vadd.f32 1.0, %v5730_v17  ;;  %v3365_v6 = vmul.f32 0.5, %v7169_v9 }
0x13b7   :  { %v3494_v20 = vmul.f32 %v3478_v54, %v3366_v29  ;;  %v5734_v11 = vpop.eup %5733  ;;  %v3475_v51 = vadd.f32 1.0, %v5732_v58  ;;  %v5561_v58 = vld [vmem:[#allocation28] ss:$16 sps:$4 sm:$0xff]  }
0x13b8   :  { %3741 = vmatprep.mubr.bf16.mxu0 %v3500_v45  ;;  %v5736_v61 = vpop.eup %5735  ;;  %v3473_v5 = vadd.f32 1.0, %v5734_v11  ;;  %v3487_v25 = vmul.f32 %v3471_v31, %v3359_v27  ;;  %v5566_v31 = vld [vmem:[#allocation28 + $0xc] ss:$16 sps:$4 sm:$0xff]   ;;  %v5569_v11 = vld [vmem:[#allocation28 + $0x24] ss:$16 sps:$4 sm:$0xff]  }
0x13b9   :  { %v3502_v15 = vpack.c.bf16 %v3494_v20, %v3490_v26  ;;  %v3491_v48 = vmul.f32 %v3475_v51, %v3363_v49  ;;  %v3477_v38 = vadd.f32 1.0, %v5736_v61  ;;  %v5563_v26 = vld [vmem:[#allocation28 + $0x4] ss:$16 sps:$4 sm:$0xff]   ;;  %v5564_v20 = vld [vmem:[#allocation28 + $0x8] ss:$16 sps:$4 sm:$0xff]   ;;  %4138 = vmatprep.subr.bf16.mxu1 %v5566_v31 }
0x13ba   :  { %v3489_v12 = vmul.f32 %v3473_v5, %v3361_v7  ;;  %4085 = vmatprep.subr.bf16.mxu0 %v5563_v26  ;;  %v5572_v27 = vld [vmem:[#allocation28 + $0x2c] ss:$16 sps:$4 sm:$0xff]   ;;  %v5567_v49 = vld [vmem:[#allocation28 + $0x20] ss:$16 sps:$4 sm:$0xff]   ;;  %4139 = vmatpush1.bf16.msra.mxu1 %v5564_v20  ;;  %v5570_v51 = vld [vmem:[#allocation28 + $0x28] ss:$16 sps:$4 sm:$0xff]  }
0x13bb   :  { %3790 = vmatprep.mubr.bf16.mxu1 %v3502_v15  ;;  %v3499_v59 = vpack.c.bf16 %v3491_v48, %v3487_v25  ;;  %v3493_v32 = vmul.f32 %v3477_v38, %v3365_v6  ;;  %4086 = vmatpush1.bf16.msra.mxu0 %v5561_v58  ;;  %v4457_v26 = vld [vmem:[%s7317_s20] ss:$0 sm:$0xff] }
0x13bc   :  { %4087 = vmatprep.subr.bf16.mxu0 %v5569_v11  ;;  %4140 = vmatprep.subr.bf16.mxu1 %v5572_v27 }
0x13bd   :  { %3742 = vmatmul.mubr.bf16.gmra.mrb[56].mxu0 %v3499_v59  ;;  %v3501_v41 = vpack.c.bf16 %v3493_v32, %v3489_v12 }
0x13be   :  { %4117 = vmatprep.mubr.bf16.mxu0 %v6264_v39  ;;  %4141 = vmatpush1.bf16.msra.mxu1 %v5570_v51  ;;  %v4458_v51 = vld [vmem:[%s6418_s4] ss:$0 sm:$0xff] }
0x13bf   :  { %3791 = vmatmul.mubr.bf16.gmra.mrb[56].mxu1 %v3501_v41  ;;  %4088 = vmatpush1.bf16.msra.mxu0 %v5567_v49 }
0x13c0   :  { %4170 = vmatprep.mubr.bf16.mxu1 %v6264_v39 }
0x1486   :  { %v4723_v35 = vpop.f32.mrb[52].mxu0 }
0x1487   :  { %v4724_v47 = vpop.f32.mrb[53].mxu0 }
0x1488   :  { %v4725_v46 = vadd.f32 %v4724_v47, %v4723_v35  ;;  %v4726_v13 = vpop.f32.mrb[54].mxu0  ;;  %v5575_v47 = vld [vmem:[#allocation28 + $0x44] ss:$16 sps:$4 sm:$0xff]  }
0x1489   :  { %v4751_v33 = vpop.f32.mrb[52].mxu1  ;;  %v4727_v0 = vpop.f32.mrb[55].mxu0  ;;  %4089 = vmatprep.subr.bf16.mxu0 %v5575_v47 }
0x148a   :  { %v3736_v9 = vadd.f32 %v4725_v46, %v4424_v37  ;;  %v4752_v55 = vpop.f32.mrb[53].mxu1  ;;  %v4728_v60 = vadd.f32 %v4727_v0, %v4726_v13  ;;  %v5578_v46 = vld [vmem:[#allocation28 + $0x4c] ss:$16 sps:$4 sm:$0xff]   ;;  %v5573_v13 = vld [vmem:[#allocation28 + $0x40] ss:$16 sps:$4 sm:$0xff]  }
0x148b   :  { %v4753_v14 = vadd.f32 %v4752_v55, %v4751_v33  ;;  %v4754_v53 = vpop.f32.mrb[54].mxu1  ;;  %v5576_v33 = vld [vmem:[#allocation28 + $0x48] ss:$16 sps:$4 sm:$0xff]   ;;  %4142 = vmatprep.subr.bf16.mxu1 %v5578_v46  ;;  %4090 = vmatpush1.bf16.msra.mxu0 %v5573_v13  ;;  %v5581_v0 = vld [vmem:[#allocation28 + $0x64] ss:$16 sps:$4 sm:$0xff]  }
0x148c   :  { %v3739_v24 = vadd.f32 %v4728_v60, %v4424_v37  ;;  %v4755_v3 = vpop.f32.mrb[55].mxu1  ;;  %4143 = vmatpush1.bf16.msra.mxu1 %v5576_v33  ;;  %v5579_v55 = vld [vmem:[#allocation28 + $0x60] ss:$16 sps:$4 sm:$0xff]   ;;  %v5582_v60 = vld [vmem:[#allocation28 + $0x68] ss:$16 sps:$4 sm:$0xff]   ;;  %4091 = vmatprep.subr.bf16.mxu0 %v5581_v0 }
0x148d   :  { %v3785_v18 = vadd.f32 %v4753_v14, %v3736_v9  ;;  %v4756_v50 = vadd.f32 %v4755_v3, %v4754_v53  ;;  %v5584_v9 = vld [vmem:[#allocation28 + $0x6c] ss:$16 sps:$4 sm:$0xff]   ;;  %v5585_v14 = vld [vmem:[#allocation28 + $0x80] ss:$16 sps:$4 sm:$0xff]   ;;  %v5587_v53 = vld [vmem:[#allocation28 + $0x84] ss:$16 sps:$4 sm:$0xff]  }
0x148e   :  { %4144 = vmatprep.subr.bf16.mxu1 %v5584_v9  ;;  %v5590_v3 = vld [vmem:[#allocation28 + $0x8c] ss:$16 sps:$4 sm:$0xff]  }
0x148f   :  { %v3788_v30 = vadd.f32 %v4756_v50, %v3739_v24  ;;  %v3799_v22 = vadd.f32 %v3785_v18, %v7060_v8  ;;  %4092 = vmatpush1.bf16.msra.mxu0 %v5579_v55  ;;  %v5588_v24 = vld [vmem:[#allocation28 + $0x88] ss:$16 sps:$4 sm:$0xff]   ;;  %v5593_v18 = vld [vmem:[#allocation28 + $0xa4] ss:$16 sps:$4 sm:$0xff]   ;;  %v5596_v50 = vld [vmem:[#allocation28 + $0xac] ss:$16 sps:$4 sm:$0xff]  }
0x1490   :  { %v4729_v16 = vpop.f32.mrb[56].mxu0  ;;  %4145 = vmatpush1.bf16.msra.mxu1 %v5582_v60  ;;  %4093 = vmatprep.subr.bf16.mxu0 %v5587_v53 }
0x1491   :  { %3805 = vadd.xlane.f32.xlu0 %v3799_v22  ;;  %v3800_v2 = vadd.f32 %v3788_v30, %v7063_v1  ;;  %v4730_v21 = vpop.f32.mrb[57].mxu0  ;;  %4146 = vmatprep.subr.bf16.mxu1 %v5590_v3  ;;  %v5591_v30 = vld [vmem:[#allocation28 + $0xa0] ss:$16 sps:$4 sm:$0xff]  }
0x1492   :  { %v4757_v56 = vpop.f32.mrb[56].mxu1  ;;  %v4731_v28 = vadd.f32 %v4730_v21, %v4729_v16  ;;  %v4732_v36 = vpop.f32.mrb[58].mxu0  ;;  %v5599_v16 = vld [vmem:[#allocation28 + $0xc4] ss:$16 sps:$4 sm:$0xff]   ;;  %v5597_v21 = vld [vmem:[#allocation28 + $0xc0] ss:$16 sps:$4 sm:$0xff]  }
0x1493   :  { %3807 = vadd.xlane.f32.xlu1 %v3800_v2  ;;  %v4758_v43 = vpop.f32.mrb[57].mxu1  ;;  %v4733_v34 = vpop.f32.mrb[59].mxu0  ;;  %4094 = vmatpush1.bf16.msra.mxu0 %v5585_v14 }
0x1494   :  { %v3744_v4 = vadd.f32 %v4731_v28, %v4424_v37  ;;  %v4759_v62 = vadd.f32 %v4758_v43, %v4757_v56  ;;  %v4760_v52 = vpop.f32.mrb[58].mxu1  ;;  %v4734_v57 = vadd.f32 %v4733_v34, %v4732_v36  ;;  %4147 = vmatpush1.bf16.msra.mxu1 %v5588_v24  ;;  %4095 = vmatprep.subr.bf16.mxu0 %v5593_v18  ;;  %v5600_v56 = vld [vmem:[#allocation28 + $0xc8] ss:$16 sps:$4 sm:$0xff]   ;;  %v5605_v28 = vld [vmem:[#allocation28 + $0xe4] ss:$16 sps:$4 sm:$0xff]  }
0x1495   :  { %v4761_v23 = vpop.f32.mrb[59].mxu1  ;;  %4148 = vmatprep.subr.bf16.mxu1 %v5596_v50  ;;  %v5608_v36 = vld [vmem:[#allocation28 + $0xec] ss:$16 sps:$4 sm:$0xff]   ;;  %v5603_v43 = vld [vmem:[#allocation28 + $0xe0] ss:$16 sps:$4 sm:$0xff]  }
0x1496   :  { %v3793_v29 = vadd.f32 %v4759_v62, %v3744_v4  ;;  %v3747_v54 = vadd.f32 %v4734_v57, %v4424_v37  ;;  %v4762_v17 = vadd.f32 %v4761_v23, %v4760_v52  ;;  %v5606_v34 = vld [vmem:[#allocation28 + $0xe8] ss:$16 sps:$4 sm:$0xff]  }
0x1497   :  { %4096 = vmatpush1.bf16.msra.mxu0 %v5591_v30 }
0x1498   :  { %v3796_v8 = vadd.f32 %v4762_v17, %v3747_v54  ;;  %v3801_v45 = vadd.f32 %v3793_v29, %v7067_v10  ;;  %4097 = vmatprep.subr.bf16.mxu0 %v5599_v16 }
0x149a   :  { %3809 = vadd.xlane.f32.xlu0 %v3801_v45  ;;  %v3802_v1 = vadd.f32 %v3796_v8, %v7071_v19 }
0x149b   :  { %4098 = vmatpush1.bf16.msra.mxu0 %v5597_v21 }
0x149c   :  { %3811 = vadd.xlane.f32.xlu1 %v3802_v1  ;;  %4099 = vmatprep.subr.bf16.mxu0 %v5605_v28 }
0x149f   :  { %4100 = vmatpush1.bf16.msra.mxu0 %v5603_v43 }
0x151e   :  { %v3806_v10 = vpop.xlane.xlu0 %3805 }
0x151f   :  { %v3813_v61 = vmul.f32 0.0078125, %v3806_v10 }
0x1520   :  { %v3808_v19 = vpop.xlane.xlu1 %3807 }
0x1521   :  { %v7234_v15 = vsub.f32 %v3799_v22, %v3813_v61  ;;  %v3814_v7 = vmul.f32 0.0078125, %v3808_v19  ;;  %v5594_v22 = vld [vmem:[#allocation28 + $0xa8] ss:$16 sps:$4 sm:$0xff]  }
0x1522   :  { %4149 = vmatpush1.bf16.msra.mxu1 %v5594_v22 }
0x1523   :  { %v7236_v5 = vsub.f32 %v3800_v2, %v3814_v7  ;;  %v3821_v25 = vmul.f32 %v7234_v15, %v7234_v15  ;;  %v5602_v2 = vld [vmem:[#allocation28 + $0xcc] ss:$16 sps:$4 sm:$0xff]  }
0x1524   :  { %4150 = vmatprep.subr.bf16.mxu1 %v5602_v2 }
0x1525   :  { %3825 = vadd.xlane.f32.xlu0 %v3821_v25  ;;  %v3822_v48 = vmul.f32 %v7236_v5, %v7236_v5 }
0x1526   :  { %4151 = vmatpush1.bf16.msra.mxu1 %v5600_v56 }
0x1527   :  { %3827 = vadd.xlane.f32.xlu1 %v3822_v48  ;;  %v3810_v6 = vpop.xlane.xlu0 %3809  ;;  %4152 = vmatprep.subr.bf16.mxu1 %v5608_v36 }
0x1528   :  { %v3815_v38 = vmul.f32 0.0078125, %v3810_v6 }
0x1529   :  { %v3812_v59 = vpop.xlane.xlu1 %3811 }
0x152a   :  { %v7242_v12 = vsub.f32 %v3801_v45, %v3815_v38  ;;  %v3816_v32 = vmul.f32 0.0078125, %v3812_v59  ;;  %4153 = vmatpush1.bf16.msra.mxu1 %v5606_v34 }
0x152c   :  { %v7244_v41 = vsub.f32 %v3802_v1, %v3816_v32  ;;  %v3823_v35 = vmul.f32 %v7242_v12, %v7242_v12 }
0x152e   :  { %3829 = vadd.xlane.f32.xlu0 %v3823_v35  ;;  %v3824_v37 = vmul.f32 %v7244_v41, %v7244_v41 }
0x1530   :  { %3831 = vadd.xlane.f32.xlu1 %v3824_v37  ;;  %v3903_v37 = vld [vmem:[#allocation30] sm:$0xf] }
0x1531   :  { %v3908_v47 = vrot.slane %v3903_v37, %v6609_v40  ;;  %v3912_v46 = vrot.slane %v3903_v37, %v6612_v42 }
0x15b2   :  { %v3826_v4 = vpop.xlane.xlu0 %3825 }
0x15b3   :  { %v3833_v62 = vmul.f32 0.0078125, %v3826_v4 }
0x15b4   :  { %v3828_v52 = vpop.xlane.xlu1 %3827 }
0x15b5   :  { %v3837_v57 = vadd.f32 1e-05, %v3833_v62  ;;  %v3834_v23 = vmul.f32 0.0078125, %v3828_v52 }
0x15b7   :  { %5737 = vrsqrt.f32 %v3837_v57  ;;  %v3838_v29 = vadd.f32 1e-05, %v3834_v23 }
0x15b9   :  { %5739 = vrsqrt.f32 %v3838_v29 }
0x15bb   :  { %v3830_v54 = vpop.xlane.xlu0 %3829 }
0x15bc   :  { %v3835_v17 = vmul.f32 0.0078125, %v3830_v54 }
0x15bd   :  { %v3832_v8 = vpop.xlane.xlu1 %3831 }
0x15be   :  { %v3839_v45 = vadd.f32 1e-05, %v3835_v17  ;;  %v3836_v1 = vmul.f32 0.0078125, %v3832_v8 }
0x15c0   :  { %5741 = vrsqrt.f32 %v3839_v45  ;;  %v3840_v20 = vadd.f32 1e-05, %v3836_v1 }
0x15c1   :  { %v5738_v58 = vpop.eup %5737 }
0x15c2   :  { %v3845_v31 = vmul.f32 %v5738_v58, %v7234_v15  ;;  %5743 = vrsqrt.f32 %v3840_v20 }
0x15c3   :  { %v5740_v11 = vpop.eup %5739 }
0x15c4   :  { %v3855_v27 = vmul.f32 %v4457_v26, %v3845_v31  ;;  %v3846_v49 = vmul.f32 %v5740_v11, %v7236_v5 }
0x15c6   :  { %v3856_v10 = vmul.f32 %v4457_v26, %v3846_v49  ;;  %v3865_v61 = vadd.f32 %v4458_v51, %v3855_v27 }
0x15c8   :  { %v3866_v19 = vadd.f32 %v4458_v51, %v3856_v10 }
0x15ca   :  { %v3869_v7 = vpack.c.bf16 %v3866_v19, %v3865_v61  ;;  %v5742_v25 = vpop.eup %5741 }
0x15cb   :  { %v3847_v48 = vmul.f32 %v5742_v25, %v7242_v12  ;;  %v3916_v12 = vrot.slane %v3903_v37, %v6616_v44 }
0x15cc   :  { %4118 = vmatmul.mubr.bf16.vlgmr.msra.gmra.mrb[60].mxu0 %v3869_v7  ;;  %4171 = vmatmul.mubr.bf16.vlgmr.msra.gmra.mrb[60].mxu1 %v3869_v7  ;;  %v5744_v6 = vpop.eup %5743 }
0x15cd   :  { %4127 = vmatprep.mubr.bf16.mxu0 %v6264_v39  ;;  %4180 = vmatprep.mubr.bf16.mxu1 %v6264_v39  ;;  %v3848_v15 = vmul.f32 %v5744_v6, %v7244_v41  ;;  %v3857_v38 = vmul.f32 %v4457_v26, %v3847_v48  ;;  %v3920_v39 = vrot.slane %v3903_v37, %v6787_v63 }
0x15cf   :  { %v3858_v59 = vmul.f32 %v4457_v26, %v3848_v15  ;;  %v3867_v5 = vadd.f32 %v4458_v51, %v3857_v38 }
0x15d1   :  { %v3868_v32 = vadd.f32 %v4458_v51, %v3858_v59 }
0x15d3   :  { %v3870_v35 = vpack.c.bf16 %v3868_v32, %v3867_v5 }
0x15d5   :  { %4128 = vmatmul.mubr.bf16.gmra.mrb[64].mxu0 %v3870_v35  ;;  %4181 = vmatmul.mubr.bf16.gmra.mrb[64].mxu1 %v3870_v35 }
0x169f   :  { %v4119_v13 = vpop.f32.mrb[60].mxu0  ;;  %v4172_v41 = vpop.f32.mrb[60].mxu1 }
0x16a0   :  { %v4120_v33 = vadd.f32 %v4119_v13, %v3908_v47  ;;  %v4173_v0 = vadd.f32 %v4172_v41, %v3916_v12  ;;  %v4121_v9 = vpop.f32.mrb[61].mxu0  ;;  %v4174_v55 = vpop.f32.mrb[61].mxu1 }
0x16a1   :  { %v4122_v60 = vadd.f32 %v4121_v9, %v3912_v46  ;;  %v4175_v14 = vadd.f32 %v4174_v55, %v3920_v39  ;;  %v4123_v40 = vpop.f32.mrb[62].mxu0  ;;  %v4176_v44 = vpop.f32.mrb[62].mxu1 }
0x16a2   :  { %4191 = vst [vmem:[%s6433_s5] sm:$0xff] %v4120_v33  ;;  %4193 = vst [vmem:[%s6433_s5 + $0x10] sm:$0xff] %v4173_v0  ;;  %v4124_v42 = vadd.f32 %v4123_v40, %v3908_v47  ;;  %v4177_v63 = vadd.f32 %v4176_v44, %v3916_v12  ;;  %v4125_v53 = vpop.f32.mrb[63].mxu0  ;;  %v4178_v24 = vpop.f32.mrb[63].mxu1 }
0x16a3   :  { %4192 = vst [vmem:[%s6433_s5 + $0x8] sm:$0xff] %v4122_v60  ;;  %4194 = vst [vmem:[%s6433_s5 + $0x18] sm:$0xff] %v4175_v14  ;;  %v4126_v3 = vadd.f32 %v4125_v53, %v3912_v46  ;;  %v4179_v18 = vadd.f32 %v4178_v24, %v3920_v39 }
0x16a4   :  { %4195 = vst [vmem:[%s6433_s5 + $0x20] sm:$0xff] %v4124_v42  ;;  %4197 = vst [vmem:[%s6433_s5 + $0x30] sm:$0xff] %v4177_v63 }
0x16a5   :  { %4196 = vst [vmem:[%s6433_s5 + $0x28] sm:$0xff] %v4126_v3  ;;  %4198 = vst [vmem:[%s6433_s5 + $0x38] sm:$0xff] %v4179_v18 }
0x16a8   :  { %v4129_v50 = vpop.f32.mrb[64].mxu0  ;;  %v4182_v30 = vpop.f32.mrb[64].mxu1 }
0x16a9   :  { %v4130_v22 = vadd.f32 %v4129_v50, %v3908_v47  ;;  %v4183_v16 = vadd.f32 %v4182_v30, %v3916_v12  ;;  %v4131_v2 = vpop.f32.mrb[65].mxu0  ;;  %v4184_v21 = vpop.f32.mrb[65].mxu1 }
0x16aa   :  { %v4132_v56 = vadd.f32 %v4131_v2, %v3912_v46  ;;  %v4185_v28 = vadd.f32 %v4184_v21, %v3920_v39  ;;  %v4133_v36 = vpop.f32.mrb[66].mxu0  ;;  %v4186_v43 = vpop.f32.mrb[66].mxu1 }
0x16ab   :  { %4199 = vst [vmem:[%s6433_s5 + $0x40] sm:$0xff] %v4130_v22  ;;  %4201 = vst [vmem:[%s6433_s5 + $0x50] sm:$0xff] %v4183_v16  ;;  %v4134_v34 = vadd.f32 %v4133_v36, %v3908_v47  ;;  %v4187_v4 = vadd.f32 %v4186_v43, %v3916_v12  ;;  %v4135_v62 = vpop.f32.mrb[67].mxu0  ;;  %v4188_v52 = vpop.f32.mrb[67].mxu1 }
0x16ac   :  { %4200 = vst [vmem:[%s6433_s5 + $0x48] sm:$0xff] %v4132_v56  ;;  %4202 = vst [vmem:[%s6433_s5 + $0x58] sm:$0xff] %v4185_v28  ;;  %v4136_v57 = vadd.f32 %v4135_v62, %v3912_v46  ;;  %v4189_v23 = vadd.f32 %v4188_v52, %v3920_v39 }
0x16ad   :  { %4203 = vst [vmem:[%s6433_s5 + $0x60] sm:$0xff] %v4134_v34  ;;  %4205 = vst [vmem:[%s6433_s5 + $0x70] sm:$0xff] %v4187_v4 }
0x16ae   :  { %4204 = vst [vmem:[%s6433_s5 + $0x68] sm:$0xff] %v4136_v57  ;;  %4206 = vst [vmem:[%s6433_s5 + $0x78] sm:$0xff] %v4189_v23 }
0x16af   :  { %4211 = vsyncpa [#allocation3], 1 }
0x16b0   :  { %4212 = vsyncpa [#allocation5], 1 }
0x16b1   :  { %4213 = vsyncpa [#allocation8], 1 }
0x16b2   :  { %4214 = vsyncpa [#allocation11], 1 }
0x16b3   :  { %4215 = vsyncpa [#allocation14], 1 }
0x16b4   :  { %4216 = vsyncpa [#allocation17], 1 }
0x16b5   :  { %4217 = vsyncpa [#allocation20], 1 }
0x16b6   :  { %4218 = vsyncpa [#allocation23], 1 }
0x16b7   :  { %4219 = vsyncpa [#allocation26], 1 }
0x16b8   :  { %4220 = vsyncpa [#allocation29], 1 }

</bundles_post_ra>
